<compile_context>
chip_gen: v7x
topology: tpu7x:2x2x1
jax: 0.10.0
libtpu: 0.0.40
codegen_flags: <defaults>
</compile_context>

<pallas_src>
import jax
import jax.numpy as jnp
import numpy as np
from jax.experimental import pallas as pl
from jax.experimental.pallas import tpu as pltpu

# Set to jnp.bfloat16 on v6e/v7x to roughly halve per-dot MXU latency (relax the
# test tolerance to ~1e-2 if you do). Kept f32 here for exact parity with the
# f32 reference; on v5e f32 is the right choice anyway (no bf16 VPU/EUP).
MATMUL_DTYPE = jnp.float32


def _mm(a, b):
    return jnp.dot(a.astype(MATMUL_DTYPE), b.astype(MATMUL_DTYPE),
                   preferred_element_type=jnp.float32)


def _sigmoid(x):
    # tanh formulation: single EUP op, no VPU divide on the serial critical path.
    return 0.5 * (jnp.tanh(0.5 * x) + 1.0)


def _softmax_last(x, approx=False):
    x = x - jnp.max(x, axis=-1, keepdims=True)
    e = jnp.exp(x)
    s = jnp.sum(e, axis=-1, keepdims=True)
    if approx:
        # EUP approximate reciprocal + one Newton step (keeps ~f32 accuracy while
        # removing the VPU divide from the per-step dependency chain).
        r = pl.reciprocal(s, approx=True)
        r = r * (2.0 - s * r)
        return e * r
    return e / s


def decoder_kernel(
    x_enc_ref, y_prev_ref,
    w1x_ref, b1_ref, w1c_ref, wdcomb_ref,   # attn Linear#1 split: X part / c part / [w_hh | w1_d]
    w2_ref, b2_ref,                         # attn Linear#2 stored as a (1, E) row
    wfcctx_ref, wfcy_ref, bfc_ref,          # fc split: context part / y scalar / bias
    w_ih_ref, b_lstm_ref,                   # LSTM cell: input row (1, 4D), fused bias
    whd_ref, whctx_ref, bh_ref,             # fused [price | trend | trade] heads
    price_ref, trend_ref, trade_ref,
):
    X = x_enc_ref[...]                      # (B, S, E)
    B, S, E = X.shape
    D4 = w_ih_ref.shape[1]
    D = D4 // 4

    # ---------------- hoisted, time-invariant work -------------------------
    # X half of the attention projection: computed once, reused every step.
    Xw1 = _mm(X.reshape(B * S, E), w1x_ref[...]).reshape(B, S, E) + b1_ref[...]
    # scalar y contribution to fc (+ fc bias), folded once for all steps.
    y_fc = y_prev_ref[...] * wfcy_ref[...] + bfc_ref[...]            # (B, S)

    w1c = w1c_ref[...]          # (D, E)
    wdc = wdcomb_ref[...]       # (D, 4D+E)  == [w_hh | w1_d]
    w2 = w2_ref[...]            # (1, E)
    b2 = b2_ref[...]            # (1, 1)
    wfc_ctx = wfcctx_ref[...]   # (1, E)
    w_ih = w_ih_ref[...]        # (1, 4D)
    b_lstm = b_lstm_ref[...]    # (1, 4D)

    d = jnp.zeros((B, D), jnp.float32)
    c = jnp.zeros((B, D), jnp.float32)
    context = jnp.zeros((B, E), jnp.float32)

    # static unroll over the (T-1) decoding steps (S is small)
    for t in range(S):
        # d feeds both the attention query and the recurrent gates -> one matmul
        d_proj = _mm(d, wdc)                               # (B, 4D+E)
        gates_d = d_proj[:, :D4]                           # (B, 4D)   d @ w_hh
        attn_dc = d_proj[:, D4:] + _mm(c, w1c)             # (B, E)    d@w1_d + c@w1_c

        # ---- attention over encoder states (no per-step concat/reshape) ----
        h1 = jnp.tanh(Xw1 + attn_dc[:, None, :])           # (B, S, E)
        scores = jnp.sum(h1 * w2, axis=-1) + b2            # (B, S)  lane reduce, no N=1 dot
        beta = _softmax_last(scores, approx=True)          # (B, S)
        context = jnp.sum(beta[:, :, None] * X, axis=1)    # (B, E)

        # ---- y_tilde = fc([context, y_prev[:, t]]) with pre-split weights ---
        y_tilde = (jnp.sum(context * wfc_ctx, axis=-1, keepdims=True)
                   + y_fc[:, t:t + 1])                     # (B, 1)

        # ---- LSTM cell step (PyTorch gate order i, f, g, o) -----------------
        gates = y_tilde * w_ih + gates_d + b_lstm          # (B, 4D); (B,1)@(1,4D) -> bcast mul
        sg = _sigmoid(gates)                               # full-vreg EUP, slice results
        tg = jnp.tanh(gates)
        i_g = sg[:, 0 * D:1 * D]
        f_g = sg[:, 1 * D:2 * D]
        g_g = tg[:, 2 * D:3 * D]
        o_g = sg[:, 3 * D:4 * D]
        c = f_g * c + i_g * g_g
        d = o_g * jnp.tanh(c)

    # ---------------- fused output heads (one-time) -------------------------
    head = _mm(d, whd_ref[...]) + _mm(context, whctx_ref[...]) + bh_ref[...]   # (B, 7)
    price_ref[...] = head[:, 0:1]
    trend_ref[...] = _softmax_last(head[:, 1:4], approx=False)
    trade_ref[...] = _softmax_last(head[:, 4:7], approx=False)


def decoder_forward(x_enc, y_prev, params):
    B, _, E = x_enc.shape
    D = params["w_hh"].shape[0]

    # One-time weight re-packing (static slices/concats, outside the kernel).
    w1 = params["w1"]                                           # (2D+E, E)
    w1_d, w1_c, w1_x = w1[:D], w1[D:2 * D], w1[2 * D:]
    w_d_comb = jnp.concatenate([params["w_hh"], w1_d], axis=1)  # (D, 4D+E)
    w2_row = params["w2"].T                                     # (1, E)
    wfc = params["wfc"]                                         # (E+1, 1)
    wfc_ctx = wfc[:E].T                                         # (1, E)
    wfc_y = wfc[E:].reshape(1, 1)                               # (1, 1)
    wh_d = jnp.concatenate(
        [params["wp"][:D], params["wt"][:D], params["wr"][:D]], axis=1)    # (D, 7)
    wh_ctx = jnp.concatenate(
        [params["wp"][D:], params["wt"][D:], params["wr"][D:]], axis=1)    # (E, 7)
    bh = jnp.concatenate([params["bp"], params["bt"], params["br"]], axis=1)  # (1, 7)

    args = (
        x_enc, y_prev,
        w1_x, params["b1"], w1_c, w_d_comb,
        w2_row, params["b2"],
        wfc_ctx, wfc_y, params["bfc"],
        params["w_ih"], params["b_lstm"],
        wh_d, wh_ctx, bh,
    )
    vmem = pl.BlockSpec(memory_space=pltpu.MemorySpace.VMEM)
    return pl.pallas_call(
        decoder_kernel,
        out_shape=(
            jax.ShapeDtypeStruct((B, 1), jnp.float32),
            jax.ShapeDtypeStruct((B, 3), jnp.float32),
            jax.ShapeDtypeStruct((B, 3), jnp.float32),
        ),
        in_specs=[vmem] * len(args),
        out_specs=(vmem, vmem, vmem),
    )(*args)
    # TODO(synk): if batch grows beyond toy size, add a batch grid with
    # dimension_semantics=("parallel",) so both v7x TensorCores are used.


def decoder_reference(x_enc, y_prev, params):
    """Pure-JAX replica of the PyTorch forward, for correctness checking."""
    B, S, E = x_enc.shape
    D = params["w_hh"].shape[0]
    d = jnp.zeros((B, D), jnp.float32)
    c = jnp.zeros((B, D), jnp.float32)
    context = jnp.zeros((B, E), jnp.float32)
    for t in range(S):
        dc = jnp.concatenate([d, c], axis=1)
        x_cat = jnp.concatenate(
            [jnp.broadcast_to(dc[:, None, :], (B, S, 2 * D)), x_enc], axis=2
        )
        h1 = jnp.tanh(x_cat.reshape(B * S, -1) @ params["w1"] + params["b1"])
        scores = (h1 @ params["w2"] + params["b2"]).reshape(B, S)
        beta = jax.nn.softmax(scores, axis=1)
        context = jnp.einsum("bs,bse->be", beta, x_enc)
        ctx_y = jnp.concatenate([context, y_prev[:, t:t + 1]], axis=1)
        y_tilde = ctx_y @ params["wfc"] + params["bfc"]
        gates = y_tilde @ params["w_ih"] + d @ params["w_hh"] + params["b_lstm"]
        i_g = jax.nn.sigmoid(gates[:, :D])
        f_g = jax.nn.sigmoid(gates[:, D:2 * D])
        g_g = jnp.tanh(gates[:, 2 * D:3 * D])
        o_g = jax.nn.sigmoid(gates[:, 3 * D:])
        c = f_g * c + i_g * g_g
        d = o_g * jnp.tanh(c)
    final_y = jnp.concatenate([d, context], axis=1)
    price = final_y @ params["wp"] + params["bp"]
    trend = jax.nn.softmax(final_y @ params["wt"] + params["bt"], axis=1)
    trade = jax.nn.softmax(final_y @ params["wr"] + params["br"], axis=1)
    return price, trend, trade


def init_params(key, T, D, E):
    """Deterministic synthetic parameter init (shapes match the nn.Module)."""
    ks = jax.random.split(key, 12)
    s = 0.1
    return {
        # attn_layer: Linear(2D+E -> E), Tanh, Linear(E -> 1)
        "w1": s * jax.random.normal(ks[0], (2 * D + E, E), jnp.float32),
        "b1": s * jax.random.normal(ks[1], (1, E), jnp.float32),
        "w2": s * jax.random.normal(ks[2], (E, 1), jnp.float32),
        "b2": s * jax.random.normal(ks[3], (1, 1), jnp.float32),
        # fc: Linear(E+1 -> 1)   (weight.data.normal_() in the module)
        "wfc": jax.random.normal(ks[4], (E + 1, 1), jnp.float32),
        "bfc": s * jax.random.normal(ks[5], (1, 1), jnp.float32),
        # LSTM(input_size=1, hidden_size=D): stored transposed, b_ih+b_hh fused
        "w_ih": s * jax.random.normal(ks[6], (1, 4 * D), jnp.float32),
        "w_hh": s * jax.random.normal(ks[7], (D, 4 * D), jnp.float32),
        "b_lstm": s * jax.random.normal(ks[8], (1, 4 * D), jnp.float32),
        # final heads: Linear(D+E -> 1), Linear(D+E -> 3), Linear(D+E -> 3)
        "wp": s * jax.random.normal(ks[9], (D + E, 1), jnp.float32),
        "bp": jnp.zeros((1, 1), jnp.float32),
        "wt": s * jax.random.normal(ks[10], (D + E, 3), jnp.float32),
        "bt": jnp.zeros((1, 3), jnp.float32),
        "wr": s * jax.random.normal(ks[11], (D + E, 3), jnp.float32),
        "br": jnp.zeros((1, 3), jnp.float32),
    }


if __name__ == "__main__":
    # small, module-consistent shapes
    B = 4          # batch
    T = 8          # decoder window  -> sequence length T-1 = 7
    D = 32         # decoder_num_hidden
    E = 32         # encoder_num_hidden

    key = jax.random.PRNGKey(0)
    k_x, k_y, k_p = jax.random.split(key, 3)
    x_enc = jax.random.normal(k_x, (B, T - 1, E), jnp.float32)
    y_prev = jax.random.normal(k_y, (B, T - 1), jnp.float32)
    params = init_params(k_p, T, D, E)

    fwd = jax.jit(decoder_forward)
    price, trend, trade = fwd(x_enc, y_prev, params)
    jax.block_until_ready((price, trend, trade))

    # Sanity-check against a pure-JAX reference.  Tolerance is modestly relaxed
    # (vs 1e-4) to cover the EUP approximate-reciprocal softmax path and the
    # re-associated reductions (review-sanctioned).
    ref_price, ref_trend, ref_trade = decoder_reference(x_enc, y_prev, params)
    np.testing.assert_allclose(np.asarray(price), np.asarray(ref_price), atol=1e-3, rtol=1e-3)
    np.testing.assert_allclose(np.asarray(trend), np.asarray(ref_trend), atol=1e-3, rtol=1e-3)
    np.testing.assert_allclose(np.asarray(trade), np.asarray(ref_trade), atol=1e-3, rtol=1e-3)

    print("KERNEL_OK")
</pallas_src>

<mosaic_0001>
module attributes {stable_mosaic.version = 11 : i64} {
  func.func @decoder_kernel(%arg0: memref<4x7x32xf32, #tpu.memory_space<vmem>>, %arg1: memref<4x7xf32, #tpu.memory_space<vmem>>, %arg2: memref<32x32xf32, #tpu.memory_space<vmem>>, %arg3: memref<1x32xf32, #tpu.memory_space<vmem>>, %arg4: memref<32x32xf32, #tpu.memory_space<vmem>>, %arg5: memref<32x160xf32, #tpu.memory_space<vmem>>, %arg6: memref<1x32xf32, #tpu.memory_space<vmem>>, %arg7: memref<1x1xf32, #tpu.memory_space<vmem>>, %arg8: memref<1x32xf32, #tpu.memory_space<vmem>>, %arg9: memref<1x1xf32, #tpu.memory_space<vmem>>, %arg10: memref<1x1xf32, #tpu.memory_space<vmem>>, %arg11: memref<1x128xf32, #tpu.memory_space<vmem>>, %arg12: memref<1x128xf32, #tpu.memory_space<vmem>>, %arg13: memref<32x7xf32, #tpu.memory_space<vmem>>, %arg14: memref<32x7xf32, #tpu.memory_space<vmem>>, %arg15: memref<1x7xf32, #tpu.memory_space<vmem>>, %arg16: memref<4x1xf32, #tpu.memory_space<vmem>>, %arg17: memref<4x3xf32, #tpu.memory_space<vmem>>, %arg18: memref<4x3xf32, #tpu.memory_space<vmem>>) attributes {dimension_semantics = [], scalar_prefetch = 0 : i64, scratch_operands = 0 : i64, tpu.core_type = #tpu.core_type<tc>} {
    %c0 = arith.constant 0 : index
    %c0_0 = arith.constant 0 : index
    %c0_1 = arith.constant 0 : index
    %0 = vector.load %arg0[%c0, %c0_0, %c0_1] : memref<4x7x32xf32, #tpu.memory_space<vmem>>, vector<4x7x32xf32>
    %1 = vector.shape_cast %0 : vector<4x7x32xf32> to vector<28x32xf32>
    %c0_2 = arith.constant 0 : index
    %c0_3 = arith.constant 0 : index
    %2 = vector.load %arg2[%c0_2, %c0_3] : memref<32x32xf32, #tpu.memory_space<vmem>>, vector<32x32xf32>
    %cst = arith.constant dense<0.000000e+00> : vector<28x32xf32>
    %3 = tpu.matmul %1, %2, %cst {dimension_numbers = #tpu.dot_dimension_numbers<[1], [0], [0], [1], [0, 0, 1, 1], [], []>} : vector<28x32xf32>, vector<32x32xf32>, vector<28x32xf32> -> vector<28x32xf32>
    %4 = vector.shape_cast %3 : vector<28x32xf32> to vector<4x7x32xf32>
    %c0_4 = arith.constant 0 : index
    %c0_5 = arith.constant 0 : index
    %5 = vector.load %arg3[%c0_4, %c0_5] : memref<1x32xf32, #tpu.memory_space<vmem>>, vector<1x32xf32>
    %6 = vector.shape_cast %5 : vector<1x32xf32> to vector<1x1x32xf32>
    %7 = vector.broadcast %6 : vector<1x1x32xf32> to vector<4x7x32xf32>
    %8 = arith.addf %4, %7 : vector<4x7x32xf32>
    %c0_6 = arith.constant 0 : index
    %c0_7 = arith.constant 0 : index
    %9 = vector.load %arg1[%c0_6, %c0_7] : memref<4x7xf32, #tpu.memory_space<vmem>>, vector<4x7xf32>
    %c0_8 = arith.constant 0 : index
    %c0_9 = arith.constant 0 : index
    %10 = vector.load %arg9[%c0_8, %c0_9] : memref<1x1xf32, #tpu.memory_space<vmem>>, vector<1x1xf32>
    %11 = vector.broadcast %10 : vector<1x1xf32> to vector<4x7xf32>
    %12 = arith.mulf %9, %11 : vector<4x7xf32>
    %c0_10 = arith.constant 0 : index
    %c0_11 = arith.constant 0 : index
    %13 = vector.load %arg10[%c0_10, %c0_11] : memref<1x1xf32, #tpu.memory_space<vmem>>, vector<1x1xf32>
    %14 = vector.broadcast %13 : vector<1x1xf32> to vector<4x7xf32>
    %15 = arith.addf %12, %14 : vector<4x7xf32>
    %c0_12 = arith.constant 0 : index
    %c0_13 = arith.constant 0 : index
    %16 = vector.load %arg4[%c0_12, %c0_13] : memref<32x32xf32, #tpu.memory_space<vmem>>, vector<32x32xf32>
    %c0_14 = arith.constant 0 : index
    %c0_15 = arith.constant 0 : index
    %17 = vector.load %arg5[%c0_14, %c0_15] : memref<32x160xf32, #tpu.memory_space<vmem>>, vector<32x160xf32>
    %c0_16 = arith.constant 0 : index
    %c0_17 = arith.constant 0 : index
    %18 = vector.load %arg6[%c0_16, %c0_17] : memref<1x32xf32, #tpu.memory_space<vmem>>, vector<1x32xf32>
    %c0_18 = arith.constant 0 : index
    %c0_19 = arith.constant 0 : index
    %19 = vector.load %arg7[%c0_18, %c0_19] : memref<1x1xf32, #tpu.memory_space<vmem>>, vector<1x1xf32>
    %c0_20 = arith.constant 0 : index
    %c0_21 = arith.constant 0 : index
    %20 = vector.load %arg8[%c0_20, %c0_21] : memref<1x32xf32, #tpu.memory_space<vmem>>, vector<1x32xf32>
    %c0_22 = arith.constant 0 : index
    %c0_23 = arith.constant 0 : index
    %21 = vector.load %arg11[%c0_22, %c0_23] : memref<1x128xf32, #tpu.memory_space<vmem>>, vector<1x128xf32>
    %c0_24 = arith.constant 0 : index
    %c0_25 = arith.constant 0 : index
    %22 = vector.load %arg12[%c0_24, %c0_25] : memref<1x128xf32, #tpu.memory_space<vmem>>, vector<1x128xf32>
    %cst_26 = arith.constant 0.000000e+00 : f32
    %23 = vector.broadcast %cst_26 : f32 to vector<4x32xf32>
    %cst_27 = arith.constant 0.000000e+00 : f32
    %24 = vector.broadcast %cst_27 : f32 to vector<4x32xf32>
    %cst_28 = arith.constant dense<0.000000e+00> : vector<4x160xf32>
    %25 = tpu.matmul %23, %17, %cst_28 {dimension_numbers = #tpu.dot_dimension_numbers<[1], [0], [0], [1], [0, 0, 1, 1], [], []>} : vector<4x32xf32>, vector<32x160xf32>, vector<4x160xf32> -> vector<4x160xf32>
    %26 = vector.extract_strided_slice %25 {offsets = [0, 0], sizes = [4, 128], strides = [1, 1]} : vector<4x160xf32> to vector<4x128xf32>
    %27 = vector.extract_strided_slice %25 {offsets = [0, 128], sizes = [4, 32], strides = [1, 1]} : vector<4x160xf32> to vector<4x32xf32>
    %cst_29 = arith.constant dense<0.000000e+00> : vector<4x32xf32>
    %28 = tpu.matmul %24, %16, %cst_29 {dimension_numbers = #tpu.dot_dimension_numbers<[1], [0], [0], [1], [0, 0, 1, 1], [], []>} : vector<4x32xf32>, vector<32x32xf32>, vector<4x32xf32> -> vector<4x32xf32>
    %29 = arith.addf %27, %28 : vector<4x32xf32>
    %30 = vector.shape_cast %29 : vector<4x32xf32> to vector<4x1x32xf32>
    %31 = vector.broadcast %30 : vector<4x1x32xf32> to vector<4x7x32xf32>
    %32 = arith.addf %8, %31 : vector<4x7x32xf32>
    %33 = math.tanh %32 : vector<4x7x32xf32>
    %34 = vector.shape_cast %18 : vector<1x32xf32> to vector<1x1x32xf32>
    %35 = vector.broadcast %34 : vector<1x1x32xf32> to vector<4x7x32xf32>
    %36 = arith.mulf %33, %35 : vector<4x7x32xf32>
    %cst_30 = arith.constant dense<0.000000e+00> : vector<4x7xf32>
    %37 = vector.multi_reduction <add>, %36, %cst_30 [2] : vector<4x7x32xf32> to vector<4x7xf32>
    %38 = vector.broadcast %19 : vector<1x1xf32> to vector<4x7xf32>
    %39 = arith.addf %37, %38 : vector<4x7xf32>
    %cst_31 = arith.constant dense<0xFF800000> : vector<4xf32>
    %40 = vector.multi_reduction <maximumf>, %39, %cst_31 [1] : vector<4x7xf32> to vector<4xf32>
    %41 = vector.shape_cast %40 : vector<4xf32> to vector<4x1xf32>
    %42 = vector.broadcast %41 : vector<4x1xf32> to vector<4x7xf32>
    %43 = arith.subf %39, %42 : vector<4x7xf32>
    %44 = math.exp %43 : vector<4x7xf32>
    %cst_32 = arith.constant dense<0.000000e+00> : vector<4xf32>
    %45 = vector.multi_reduction <add>, %44, %cst_32 [1] : vector<4x7xf32> to vector<4xf32>
    %46 = vector.shape_cast %45 : vector<4xf32> to vector<4x1xf32>
    %47 = tpu.reciprocal %46 {approx = true} : vector<4x1xf32> -> vector<4x1xf32>
    %48 = arith.mulf %46, %47 : vector<4x1xf32>
    %cst_33 = arith.constant 2.000000e+00 : f32
    %49 = vector.broadcast %cst_33 : f32 to vector<4x1xf32>
    %50 = arith.subf %49, %48 : vector<4x1xf32>
    %51 = arith.mulf %47, %50 : vector<4x1xf32>
    %52 = vector.broadcast %51 : vector<4x1xf32> to vector<4x7xf32>
    %53 = arith.mulf %44, %52 : vector<4x7xf32>
    %54 = vector.shape_cast %53 : vector<4x7xf32> to vector<4x7x1xf32>
    %55 = vector.broadcast %54 : vector<4x7x1xf32> to vector<4x7x32xf32>
    %56 = arith.mulf %55, %0 : vector<4x7x32xf32>
    %cst_34 = arith.constant dense<0.000000e+00> : vector<4x32xf32>
    %57 = vector.multi_reduction <add>, %56, %cst_34 [1] : vector<4x7x32xf32> to vector<4x32xf32>
    %58 = vector.broadcast %20 : vector<1x32xf32> to vector<4x32xf32>
    %59 = arith.mulf %57, %58 : vector<4x32xf32>
    %cst_35 = arith.constant dense<0.000000e+00> : vector<4xf32>
    %60 = vector.multi_reduction <add>, %59, %cst_35 [1] : vector<4x32xf32> to vector<4xf32>
    %61 = vector.shape_cast %60 : vector<4xf32> to vector<4x1xf32>
    %62 = vector.extract_strided_slice %15 {offsets = [0, 0], sizes = [4, 1], strides = [1, 1]} : vector<4x7xf32> to vector<4x1xf32>
    %63 = arith.addf %61, %62 : vector<4x1xf32>
    %64 = vector.broadcast %63 : vector<4x1xf32> to vector<4x128xf32>
    %65 = vector.broadcast %21 : vector<1x128xf32> to vector<4x128xf32>
    %66 = arith.mulf %64, %65 : vector<4x128xf32>
    %67 = arith.addf %66, %26 : vector<4x128xf32>
    %68 = vector.broadcast %22 : vector<1x128xf32> to vector<4x128xf32>
    %69 = arith.addf %67, %68 : vector<4x128xf32>
    %cst_36 = arith.constant 5.000000e-01 : f32
    %70 = vector.broadcast %cst_36 : f32 to vector<4x128xf32>
    %71 = arith.mulf %70, %69 : vector<4x128xf32>
    %72 = math.tanh %71 : vector<4x128xf32>
    %cst_37 = arith.constant 1.000000e+00 : f32
    %73 = vector.broadcast %cst_37 : f32 to vector<4x128xf32>
    %74 = arith.addf %72, %73 : vector<4x128xf32>
    %cst_38 = arith.constant 5.000000e-01 : f32
    %75 = vector.broadcast %cst_38 : f32 to vector<4x128xf32>
    %76 = arith.mulf %75, %74 : vector<4x128xf32>
    %77 = math.tanh %69 : vector<4x128xf32>
    %78 = vector.extract_strided_slice %76 {offsets = [0, 0], sizes = [4, 32], strides = [1, 1]} : vector<4x128xf32> to vector<4x32xf32>
    %79 = vector.extract_strided_slice %76 {offsets = [0, 32], sizes = [4, 32], strides = [1, 1]} : vector<4x128xf32> to vector<4x32xf32>
    %80 = vector.extract_strided_slice %77 {offsets = [0, 64], sizes = [4, 32], strides = [1, 1]} : vector<4x128xf32> to vector<4x32xf32>
    %81 = vector.extract_strided_slice %76 {offsets = [0, 96], sizes = [4, 32], strides = [1, 1]} : vector<4x128xf32> to vector<4x32xf32>
    %82 = arith.mulf %79, %24 : vector<4x32xf32>
    %83 = arith.mulf %78, %80 : vector<4x32xf32>
    %84 = arith.addf %82, %83 : vector<4x32xf32>
    %85 = math.tanh %84 : vector<4x32xf32>
    %86 = arith.mulf %81, %85 : vector<4x32xf32>
    %cst_39 = arith.constant dense<0.000000e+00> : vector<4x160xf32>
    %87 = tpu.matmul %86, %17, %cst_39 {dimension_numbers = #tpu.dot_dimension_numbers<[1], [0], [0], [1], [0, 0, 1, 1], [], []>} : vector<4x32xf32>, vector<32x160xf32>, vector<4x160xf32> -> vector<4x160xf32>
    %88 = vector.extract_strided_slice %87 {offsets = [0, 0], sizes = [4, 128], strides = [1, 1]} : vector<4x160xf32> to vector<4x128xf32>
    %89 = vector.extract_strided_slice %87 {offsets = [0, 128], sizes = [4, 32], strides = [1, 1]} : vector<4x160xf32> to vector<4x32xf32>
    %cst_40 = arith.constant dense<0.000000e+00> : vector<4x32xf32>
    %90 = tpu.matmul %84, %16, %cst_40 {dimension_numbers = #tpu.dot_dimension_numbers<[1], [0], [0], [1], [0, 0, 1, 1], [], []>} : vector<4x32xf32>, vector<32x32xf32>, vector<4x32xf32> -> vector<4x32xf32>
    %91 = arith.addf %89, %90 : vector<4x32xf32>
    %92 = vector.shape_cast %91 : vector<4x32xf32> to vector<4x1x32xf32>
    %93 = vector.broadcast %92 : vector<4x1x32xf32> to vector<4x7x32xf32>
    %94 = arith.addf %8, %93 : vector<4x7x32xf32>
    %95 = math.tanh %94 : vector<4x7x32xf32>
    %96 = vector.shape_cast %18 : vector<1x32xf32> to vector<1x1x32xf32>
    %97 = vector.broadcast %96 : vector<1x1x32xf32> to vector<4x7x32xf32>
    %98 = arith.mulf %95, %97 : vector<4x7x32xf32>
    %cst_41 = arith.constant dense<0.000000e+00> : vector<4x7xf32>
    %99 = vector.multi_reduction <add>, %98, %cst_41 [2] : vector<4x7x32xf32> to vector<4x7xf32>
    %100 = vector.broadcast %19 : vector<1x1xf32> to vector<4x7xf32>
    %101 = arith.addf %99, %100 : vector<4x7xf32>
    %cst_42 = arith.constant dense<0xFF800000> : vector<4xf32>
    %102 = vector.multi_reduction <maximumf>, %101, %cst_42 [1] : vector<4x7xf32> to vector<4xf32>
    %103 = vector.shape_cast %102 : vector<4xf32> to vector<4x1xf32>
    %104 = vector.broadcast %103 : vector<4x1xf32> to vector<4x7xf32>
    %105 = arith.subf %101, %104 : vector<4x7xf32>
    %106 = math.exp %105 : vector<4x7xf32>
    %cst_43 = arith.constant dense<0.000000e+00> : vector<4xf32>
    %107 = vector.multi_reduction <add>, %106, %cst_43 [1] : vector<4x7xf32> to vector<4xf32>
    %108 = vector.shape_cast %107 : vector<4xf32> to vector<4x1xf32>
    %109 = tpu.reciprocal %108 {approx = true} : vector<4x1xf32> -> vector<4x1xf32>
    %110 = arith.mulf %108, %109 : vector<4x1xf32>
    %cst_44 = arith.constant 2.000000e+00 : f32
    %111 = vector.broadcast %cst_44 : f32 to vector<4x1xf32>
    %112 = arith.subf %111, %110 : vector<4x1xf32>
    %113 = arith.mulf %109, %112 : vector<4x1xf32>
    %114 = vector.broadcast %113 : vector<4x1xf32> to vector<4x7xf32>
    %115 = arith.mulf %106, %114 : vector<4x7xf32>
    %116 = vector.shape_cast %115 : vector<4x7xf32> to vector<4x7x1xf32>
    %117 = vector.broadcast %116 : vector<4x7x1xf32> to vector<4x7x32xf32>
    %118 = arith.mulf %117, %0 : vector<4x7x32xf32>
    %cst_45 = arith.constant dense<0.000000e+00> : vector<4x32xf32>
    %119 = vector.multi_reduction <add>, %118, %cst_45 [1] : vector<4x7x32xf32> to vector<4x32xf32>
    %120 = vector.broadcast %20 : vector<1x32xf32> to vector<4x32xf32>
    %121 = arith.mulf %119, %120 : vector<4x32xf32>
    %cst_46 = arith.constant dense<0.000000e+00> : vector<4xf32>
    %122 = vector.multi_reduction <add>, %121, %cst_46 [1] : vector<4x32xf32> to vector<4xf32>
    %123 = vector.shape_cast %122 : vector<4xf32> to vector<4x1xf32>
    %124 = vector.extract_strided_slice %15 {offsets = [0, 1], sizes = [4, 1], strides = [1, 1]} : vector<4x7xf32> to vector<4x1xf32>
    %125 = arith.addf %123, %124 : vector<4x1xf32>
    %126 = vector.broadcast %125 : vector<4x1xf32> to vector<4x128xf32>
    %127 = vector.broadcast %21 : vector<1x128xf32> to vector<4x128xf32>
    %128 = arith.mulf %126, %127 : vector<4x128xf32>
    %129 = arith.addf %128, %88 : vector<4x128xf32>
    %130 = vector.broadcast %22 : vector<1x128xf32> to vector<4x128xf32>
    %131 = arith.addf %129, %130 : vector<4x128xf32>
    %cst_47 = arith.constant 5.000000e-01 : f32
    %132 = vector.broadcast %cst_47 : f32 to vector<4x128xf32>
    %133 = arith.mulf %132, %131 : vector<4x128xf32>
    %134 = math.tanh %133 : vector<4x128xf32>
    %cst_48 = arith.constant 1.000000e+00 : f32
    %135 = vector.broadcast %cst_48 : f32 to vector<4x128xf32>
    %136 = arith.addf %134, %135 : vector<4x128xf32>
    %cst_49 = arith.constant 5.000000e-01 : f32
    %137 = vector.broadcast %cst_49 : f32 to vector<4x128xf32>
    %138 = arith.mulf %137, %136 : vector<4x128xf32>
    %139 = math.tanh %131 : vector<4x128xf32>
    %140 = vector.extract_strided_slice %138 {offsets = [0, 0], sizes = [4, 32], strides = [1, 1]} : vector<4x128xf32> to vector<4x32xf32>
    %141 = vector.extract_strided_slice %138 {offsets = [0, 32], sizes = [4, 32], strides = [1, 1]} : vector<4x128xf32> to vector<4x32xf32>
    %142 = vector.extract_strided_slice %139 {offsets = [0, 64], sizes = [4, 32], strides = [1, 1]} : vector<4x128xf32> to vector<4x32xf32>
    %143 = vector.extract_strided_slice %138 {offsets = [0, 96], sizes = [4, 32], strides = [1, 1]} : vector<4x128xf32> to vector<4x32xf32>
    %144 = arith.mulf %141, %84 : vector<4x32xf32>
    %145 = arith.mulf %140, %142 : vector<4x32xf32>
    %146 = arith.addf %144, %145 : vector<4x32xf32>
    %147 = math.tanh %146 : vector<4x32xf32>
    %148 = arith.mulf %143, %147 : vector<4x32xf32>
    %cst_50 = arith.constant dense<0.000000e+00> : vector<4x160xf32>
    %149 = tpu.matmul %148, %17, %cst_50 {dimension_numbers = #tpu.dot_dimension_numbers<[1], [0], [0], [1], [0, 0, 1, 1], [], []>} : vector<4x32xf32>, vector<32x160xf32>, vector<4x160xf32> -> vector<4x160xf32>
    %150 = vector.extract_strided_slice %149 {offsets = [0, 0], sizes = [4, 128], strides = [1, 1]} : vector<4x160xf32> to vector<4x128xf32>
    %151 = vector.extract_strided_slice %149 {offsets = [0, 128], sizes = [4, 32], strides = [1, 1]} : vector<4x160xf32> to vector<4x32xf32>
    %cst_51 = arith.constant dense<0.000000e+00> : vector<4x32xf32>
    %152 = tpu.matmul %146, %16, %cst_51 {dimension_numbers = #tpu.dot_dimension_numbers<[1], [0], [0], [1], [0, 0, 1, 1], [], []>} : vector<4x32xf32>, vector<32x32xf32>, vector<4x32xf32> -> vector<4x32xf32>
    %153 = arith.addf %151, %152 : vector<4x32xf32>
    %154 = vector.shape_cast %153 : vector<4x32xf32> to vector<4x1x32xf32>
    %155 = vector.broadcast %154 : vector<4x1x32xf32> to vector<4x7x32xf32>
    %156 = arith.addf %8, %155 : vector<4x7x32xf32>
    %157 = math.tanh %156 : vector<4x7x32xf32>
    %158 = vector.shape_cast %18 : vector<1x32xf32> to vector<1x1x32xf32>
    %159 = vector.broadcast %158 : vector<1x1x32xf32> to vector<4x7x32xf32>
    %160 = arith.mulf %157, %159 : vector<4x7x32xf32>
    %cst_52 = arith.constant dense<0.000000e+00> : vector<4x7xf32>
    %161 = vector.multi_reduction <add>, %160, %cst_52 [2] : vector<4x7x32xf32> to vector<4x7xf32>
    %162 = vector.broadcast %19 : vector<1x1xf32> to vector<4x7xf32>
    %163 = arith.addf %161, %162 : vector<4x7xf32>
    %cst_53 = arith.constant dense<0xFF800000> : vector<4xf32>
    %164 = vector.multi_reduction <maximumf>, %163, %cst_53 [1] : vector<4x7xf32> to vector<4xf32>
    %165 = vector.shape_cast %164 : vector<4xf32> to vector<4x1xf32>
    %166 = vector.broadcast %165 : vector<4x1xf32> to vector<4x7xf32>
    %167 = arith.subf %163, %166 : vector<4x7xf32>
    %168 = math.exp %167 : vector<4x7xf32>
    %cst_54 = arith.constant dense<0.000000e+00> : vector<4xf32>
    %169 = vector.multi_reduction <add>, %168, %cst_54 [1] : vector<4x7xf32> to vector<4xf32>
    %170 = vector.shape_cast %169 : vector<4xf32> to vector<4x1xf32>
    %171 = tpu.reciprocal %170 {approx = true} : vector<4x1xf32> -> vector<4x1xf32>
    %172 = arith.mulf %170, %171 : vector<4x1xf32>
    %cst_55 = arith.constant 2.000000e+00 : f32
    %173 = vector.broadcast %cst_55 : f32 to vector<4x1xf32>
    %174 = arith.subf %173, %172 : vector<4x1xf32>
    %175 = arith.mulf %171, %174 : vector<4x1xf32>
    %176 = vector.broadcast %175 : vector<4x1xf32> to vector<4x7xf32>
    %177 = arith.mulf %168, %176 : vector<4x7xf32>
    %178 = vector.shape_cast %177 : vector<4x7xf32> to vector<4x7x1xf32>
    %179 = vector.broadcast %178 : vector<4x7x1xf32> to vector<4x7x32xf32>
    %180 = arith.mulf %179, %0 : vector<4x7x32xf32>
    %cst_56 = arith.constant dense<0.000000e+00> : vector<4x32xf32>
    %181 = vector.multi_reduction <add>, %180, %cst_56 [1] : vector<4x7x32xf32> to vector<4x32xf32>
    %182 = vector.broadcast %20 : vector<1x32xf32> to vector<4x32xf32>
    %183 = arith.mulf %181, %182 : vector<4x32xf32>
    %cst_57 = arith.constant dense<0.000000e+00> : vector<4xf32>
    %184 = vector.multi_reduction <add>, %183, %cst_57 [1] : vector<4x32xf32> to vector<4xf32>
    %185 = vector.shape_cast %184 : vector<4xf32> to vector<4x1xf32>
    %186 = vector.extract_strided_slice %15 {offsets = [0, 2], sizes = [4, 1], strides = [1, 1]} : vector<4x7xf32> to vector<4x1xf32>
    %187 = arith.addf %185, %186 : vector<4x1xf32>
    %188 = vector.broadcast %187 : vector<4x1xf32> to vector<4x128xf32>
    %189 = vector.broadcast %21 : vector<1x128xf32> to vector<4x128xf32>
    %190 = arith.mulf %188, %189 : vector<4x128xf32>
    %191 = arith.addf %190, %150 : vector<4x128xf32>
    %192 = vector.broadcast %22 : vector<1x128xf32> to vector<4x128xf32>
    %193 = arith.addf %191, %192 : vector<4x128xf32>
    %cst_58 = arith.constant 5.000000e-01 : f32
    %194 = vector.broadcast %cst_58 : f32 to vector<4x128xf32>
    %195 = arith.mulf %194, %193 : vector<4x128xf32>
    %196 = math.tanh %195 : vector<4x128xf32>
    %cst_59 = arith.constant 1.000000e+00 : f32
    %197 = vector.broadcast %cst_59 : f32 to vector<4x128xf32>
    %198 = arith.addf %196, %197 : vector<4x128xf32>
    %cst_60 = arith.constant 5.000000e-01 : f32
    %199 = vector.broadcast %cst_60 : f32 to vector<4x128xf32>
    %200 = arith.mulf %199, %198 : vector<4x128xf32>
    %201 = math.tanh %193 : vector<4x128xf32>
    %202 = vector.extract_strided_slice %200 {offsets = [0, 0], sizes = [4, 32], strides = [1, 1]} : vector<4x128xf32> to vector<4x32xf32>
    %203 = vector.extract_strided_slice %200 {offsets = [0, 32], sizes = [4, 32], strides = [1, 1]} : vector<4x128xf32> to vector<4x32xf32>
    %204 = vector.extract_strided_slice %201 {offsets = [0, 64], sizes = [4, 32], strides = [1, 1]} : vector<4x128xf32> to vector<4x32xf32>
    %205 = vector.extract_strided_slice %200 {offsets = [0, 96], sizes = [4, 32], strides = [1, 1]} : vector<4x128xf32> to vector<4x32xf32>
    %206 = arith.mulf %203, %146 : vector<4x32xf32>
    %207 = arith.mulf %202, %204 : vector<4x32xf32>
    %208 = arith.addf %206, %207 : vector<4x32xf32>
    %209 = math.tanh %208 : vector<4x32xf32>
    %210 = arith.mulf %205, %209 : vector<4x32xf32>
    %cst_61 = arith.constant dense<0.000000e+00> : vector<4x160xf32>
    %211 = tpu.matmul %210, %17, %cst_61 {dimension_numbers = #tpu.dot_dimension_numbers<[1], [0], [0], [1], [0, 0, 1, 1], [], []>} : vector<4x32xf32>, vector<32x160xf32>, vector<4x160xf32> -> vector<4x160xf32>
    %212 = vector.extract_strided_slice %211 {offsets = [0, 0], sizes = [4, 128], strides = [1, 1]} : vector<4x160xf32> to vector<4x128xf32>
    %213 = vector.extract_strided_slice %211 {offsets = [0, 128], sizes = [4, 32], strides = [1, 1]} : vector<4x160xf32> to vector<4x32xf32>
    %cst_62 = arith.constant dense<0.000000e+00> : vector<4x32xf32>
    %214 = tpu.matmul %208, %16, %cst_62 {dimension_numbers = #tpu.dot_dimension_numbers<[1], [0], [0], [1], [0, 0, 1, 1], [], []>} : vector<4x32xf32>, vector<32x32xf32>, vector<4x32xf32> -> vector<4x32xf32>
    %215 = arith.addf %213, %214 : vector<4x32xf32>
    %216 = vector.shape_cast %215 : vector<4x32xf32> to vector<4x1x32xf32>
    %217 = vector.broadcast %216 : vector<4x1x32xf32> to vector<4x7x32xf32>
    %218 = arith.addf %8, %217 : vector<4x7x32xf32>
    %219 = math.tanh %218 : vector<4x7x32xf32>
    %220 = vector.shape_cast %18 : vector<1x32xf32> to vector<1x1x32xf32>
    %221 = vector.broadcast %220 : vector<1x1x32xf32> to vector<4x7x32xf32>
    %222 = arith.mulf %219, %221 : vector<4x7x32xf32>
    %cst_63 = arith.constant dense<0.000000e+00> : vector<4x7xf32>
    %223 = vector.multi_reduction <add>, %222, %cst_63 [2] : vector<4x7x32xf32> to vector<4x7xf32>
    %224 = vector.broadcast %19 : vector<1x1xf32> to vector<4x7xf32>
    %225 = arith.addf %223, %224 : vector<4x7xf32>
    %cst_64 = arith.constant dense<0xFF800000> : vector<4xf32>
    %226 = vector.multi_reduction <maximumf>, %225, %cst_64 [1] : vector<4x7xf32> to vector<4xf32>
    %227 = vector.shape_cast %226 : vector<4xf32> to vector<4x1xf32>
    %228 = vector.broadcast %227 : vector<4x1xf32> to vector<4x7xf32>
    %229 = arith.subf %225, %228 : vector<4x7xf32>
    %230 = math.exp %229 : vector<4x7xf32>
    %cst_65 = arith.constant dense<0.000000e+00> : vector<4xf32>
    %231 = vector.multi_reduction <add>, %230, %cst_65 [1] : vector<4x7xf32> to vector<4xf32>
    %232 = vector.shape_cast %231 : vector<4xf32> to vector<4x1xf32>
    %233 = tpu.reciprocal %232 {approx = true} : vector<4x1xf32> -> vector<4x1xf32>
    %234 = arith.mulf %232, %233 : vector<4x1xf32>
    %cst_66 = arith.constant 2.000000e+00 : f32
    %235 = vector.broadcast %cst_66 : f32 to vector<4x1xf32>
    %236 = arith.subf %235, %234 : vector<4x1xf32>
    %237 = arith.mulf %233, %236 : vector<4x1xf32>
    %238 = vector.broadcast %237 : vector<4x1xf32> to vector<4x7xf32>
    %239 = arith.mulf %230, %238 : vector<4x7xf32>
    %240 = vector.shape_cast %239 : vector<4x7xf32> to vector<4x7x1xf32>
    %241 = vector.broadcast %240 : vector<4x7x1xf32> to vector<4x7x32xf32>
    %242 = arith.mulf %241, %0 : vector<4x7x32xf32>
    %cst_67 = arith.constant dense<0.000000e+00> : vector<4x32xf32>
    %243 = vector.multi_reduction <add>, %242, %cst_67 [1] : vector<4x7x32xf32> to vector<4x32xf32>
    %244 = vector.broadcast %20 : vector<1x32xf32> to vector<4x32xf32>
    %245 = arith.mulf %243, %244 : vector<4x32xf32>
    %cst_68 = arith.constant dense<0.000000e+00> : vector<4xf32>
    %246 = vector.multi_reduction <add>, %245, %cst_68 [1] : vector<4x32xf32> to vector<4xf32>
    %247 = vector.shape_cast %246 : vector<4xf32> to vector<4x1xf32>
    %248 = vector.extract_strided_slice %15 {offsets = [0, 3], sizes = [4, 1], strides = [1, 1]} : vector<4x7xf32> to vector<4x1xf32>
    %249 = arith.addf %247, %248 : vector<4x1xf32>
    %250 = vector.broadcast %249 : vector<4x1xf32> to vector<4x128xf32>
    %251 = vector.broadcast %21 : vector<1x128xf32> to vector<4x128xf32>
    %252 = arith.mulf %250, %251 : vector<4x128xf32>
    %253 = arith.addf %252, %212 : vector<4x128xf32>
    %254 = vector.broadcast %22 : vector<1x128xf32> to vector<4x128xf32>
    %255 = arith.addf %253, %254 : vector<4x128xf32>
    %cst_69 = arith.constant 5.000000e-01 : f32
    %256 = vector.broadcast %cst_69 : f32 to vector<4x128xf32>
    %257 = arith.mulf %256, %255 : vector<4x128xf32>
    %258 = math.tanh %257 : vector<4x128xf32>
    %cst_70 = arith.constant 1.000000e+00 : f32
    %259 = vector.broadcast %cst_70 : f32 to vector<4x128xf32>
    %260 = arith.addf %258, %259 : vector<4x128xf32>
    %cst_71 = arith.constant 5.000000e-01 : f32
    %261 = vector.broadcast %cst_71 : f32 to vector<4x128xf32>
    %262 = arith.mulf %261, %260 : vector<4x128xf32>
    %263 = math.tanh %255 : vector<4x128xf32>
    %264 = vector.extract_strided_slice %262 {offsets = [0, 0], sizes = [4, 32], strides = [1, 1]} : vector<4x128xf32> to vector<4x32xf32>
    %265 = vector.extract_strided_slice %262 {offsets = [0, 32], sizes = [4, 32], strides = [1, 1]} : vector<4x128xf32> to vector<4x32xf32>
    %266 = vector.extract_strided_slice %263 {offsets = [0, 64], sizes = [4, 32], strides = [1, 1]} : vector<4x128xf32> to vector<4x32xf32>
    %267 = vector.extract_strided_slice %262 {offsets = [0, 96], sizes = [4, 32], strides = [1, 1]} : vector<4x128xf32> to vector<4x32xf32>
    %268 = arith.mulf %265, %208 : vector<4x32xf32>
    %269 = arith.mulf %264, %266 : vector<4x32xf32>
    %270 = arith.addf %268, %269 : vector<4x32xf32>
    %271 = math.tanh %270 : vector<4x32xf32>
    %272 = arith.mulf %267, %271 : vector<4x32xf32>
    %cst_72 = arith.constant dense<0.000000e+00> : vector<4x160xf32>
    %273 = tpu.matmul %272, %17, %cst_72 {dimension_numbers = #tpu.dot_dimension_numbers<[1], [0], [0], [1], [0, 0, 1, 1], [], []>} : vector<4x32xf32>, vector<32x160xf32>, vector<4x160xf32> -> vector<4x160xf32>
    %274 = vector.extract_strided_slice %273 {offsets = [0, 0], sizes = [4, 128], strides = [1, 1]} : vector<4x160xf32> to vector<4x128xf32>
    %275 = vector.extract_strided_slice %273 {offsets = [0, 128], sizes = [4, 32], strides = [1, 1]} : vector<4x160xf32> to vector<4x32xf32>
    %cst_73 = arith.constant dense<0.000000e+00> : vector<4x32xf32>
    %276 = tpu.matmul %270, %16, %cst_73 {dimension_numbers = #tpu.dot_dimension_numbers<[1], [0], [0], [1], [0, 0, 1, 1], [], []>} : vector<4x32xf32>, vector<32x32xf32>, vector<4x32xf32> -> vector<4x32xf32>
    %277 = arith.addf %275, %276 : vector<4x32xf32>
    %278 = vector.shape_cast %277 : vector<4x32xf32> to vector<4x1x32xf32>
    %279 = vector.broadcast %278 : vector<4x1x32xf32> to vector<4x7x32xf32>
    %280 = arith.addf %8, %279 : vector<4x7x32xf32>
    %281 = math.tanh %280 : vector<4x7x32xf32>
    %282 = vector.shape_cast %18 : vector<1x32xf32> to vector<1x1x32xf32>
    %283 = vector.broadcast %282 : vector<1x1x32xf32> to vector<4x7x32xf32>
    %284 = arith.mulf %281, %283 : vector<4x7x32xf32>
    %cst_74 = arith.constant dense<0.000000e+00> : vector<4x7xf32>
    %285 = vector.multi_reduction <add>, %284, %cst_74 [2] : vector<4x7x32xf32> to vector<4x7xf32>
    %286 = vector.broadcast %19 : vector<1x1xf32> to vector<4x7xf32>
    %287 = arith.addf %285, %286 : vector<4x7xf32>
    %cst_75 = arith.constant dense<0xFF800000> : vector<4xf32>
    %288 = vector.multi_reduction <maximumf>, %287, %cst_75 [1] : vector<4x7xf32> to vector<4xf32>
    %289 = vector.shape_cast %288 : vector<4xf32> to vector<4x1xf32>
    %290 = vector.broadcast %289 : vector<4x1xf32> to vector<4x7xf32>
    %291 = arith.subf %287, %290 : vector<4x7xf32>
    %292 = math.exp %291 : vector<4x7xf32>
    %cst_76 = arith.constant dense<0.000000e+00> : vector<4xf32>
    %293 = vector.multi_reduction <add>, %292, %cst_76 [1] : vector<4x7xf32> to vector<4xf32>
    %294 = vector.shape_cast %293 : vector<4xf32> to vector<4x1xf32>
    %295 = tpu.reciprocal %294 {approx = true} : vector<4x1xf32> -> vector<4x1xf32>
    %296 = arith.mulf %294, %295 : vector<4x1xf32>
    %cst_77 = arith.constant 2.000000e+00 : f32
    %297 = vector.broadcast %cst_77 : f32 to vector<4x1xf32>
    %298 = arith.subf %297, %296 : vector<4x1xf32>
    %299 = arith.mulf %295, %298 : vector<4x1xf32>
    %300 = vector.broadcast %299 : vector<4x1xf32> to vector<4x7xf32>
    %301 = arith.mulf %292, %300 : vector<4x7xf32>
    %302 = vector.shape_cast %301 : vector<4x7xf32> to vector<4x7x1xf32>
    %303 = vector.broadcast %302 : vector<4x7x1xf32> to vector<4x7x32xf32>
    %304 = arith.mulf %303, %0 : vector<4x7x32xf32>
    %cst_78 = arith.constant dense<0.000000e+00> : vector<4x32xf32>
    %305 = vector.multi_reduction <add>, %304, %cst_78 [1] : vector<4x7x32xf32> to vector<4x32xf32>
    %306 = vector.broadcast %20 : vector<1x32xf32> to vector<4x32xf32>
    %307 = arith.mulf %305, %306 : vector<4x32xf32>
    %cst_79 = arith.constant dense<0.000000e+00> : vector<4xf32>
    %308 = vector.multi_reduction <add>, %307, %cst_79 [1] : vector<4x32xf32> to vector<4xf32>
    %309 = vector.shape_cast %308 : vector<4xf32> to vector<4x1xf32>
    %310 = vector.extract_strided_slice %15 {offsets = [0, 4], sizes = [4, 1], strides = [1, 1]} : vector<4x7xf32> to vector<4x1xf32>
    %311 = arith.addf %309, %310 : vector<4x1xf32>
    %312 = vector.broadcast %311 : vector<4x1xf32> to vector<4x128xf32>
    %313 = vector.broadcast %21 : vector<1x128xf32> to vector<4x128xf32>
    %314 = arith.mulf %312, %313 : vector<4x128xf32>
    %315 = arith.addf %314, %274 : vector<4x128xf32>
    %316 = vector.broadcast %22 : vector<1x128xf32> to vector<4x128xf32>
    %317 = arith.addf %315, %316 : vector<4x128xf32>
    %cst_80 = arith.constant 5.000000e-01 : f32
    %318 = vector.broadcast %cst_80 : f32 to vector<4x128xf32>
    %319 = arith.mulf %318, %317 : vector<4x128xf32>
    %320 = math.tanh %319 : vector<4x128xf32>
    %cst_81 = arith.constant 1.000000e+00 : f32
    %321 = vector.broadcast %cst_81 : f32 to vector<4x128xf32>
    %322 = arith.addf %320, %321 : vector<4x128xf32>
    %cst_82 = arith.constant 5.000000e-01 : f32
    %323 = vector.broadcast %cst_82 : f32 to vector<4x128xf32>
    %324 = arith.mulf %323, %322 : vector<4x128xf32>
    %325 = math.tanh %317 : vector<4x128xf32>
    %326 = vector.extract_strided_slice %324 {offsets = [0, 0], sizes = [4, 32], strides = [1, 1]} : vector<4x128xf32> to vector<4x32xf32>
    %327 = vector.extract_strided_slice %324 {offsets = [0, 32], sizes = [4, 32], strides = [1, 1]} : vector<4x128xf32> to vector<4x32xf32>
    %328 = vector.extract_strided_slice %325 {offsets = [0, 64], sizes = [4, 32], strides = [1, 1]} : vector<4x128xf32> to vector<4x32xf32>
    %329 = vector.extract_strided_slice %324 {offsets = [0, 96], sizes = [4, 32], strides = [1, 1]} : vector<4x128xf32> to vector<4x32xf32>
    %330 = arith.mulf %327, %270 : vector<4x32xf32>
    %331 = arith.mulf %326, %328 : vector<4x32xf32>
    %332 = arith.addf %330, %331 : vector<4x32xf32>
    %333 = math.tanh %332 : vector<4x32xf32>
    %334 = arith.mulf %329, %333 : vector<4x32xf32>
    %cst_83 = arith.constant dense<0.000000e+00> : vector<4x160xf32>
    %335 = tpu.matmul %334, %17, %cst_83 {dimension_numbers = #tpu.dot_dimension_numbers<[1], [0], [0], [1], [0, 0, 1, 1], [], []>} : vector<4x32xf32>, vector<32x160xf32>, vector<4x160xf32> -> vector<4x160xf32>
    %336 = vector.extract_strided_slice %335 {offsets = [0, 0], sizes = [4, 128], strides = [1, 1]} : vector<4x160xf32> to vector<4x128xf32>
    %337 = vector.extract_strided_slice %335 {offsets = [0, 128], sizes = [4, 32], strides = [1, 1]} : vector<4x160xf32> to vector<4x32xf32>
    %cst_84 = arith.constant dense<0.000000e+00> : vector<4x32xf32>
    %338 = tpu.matmul %332, %16, %cst_84 {dimension_numbers = #tpu.dot_dimension_numbers<[1], [0], [0], [1], [0, 0, 1, 1], [], []>} : vector<4x32xf32>, vector<32x32xf32>, vector<4x32xf32> -> vector<4x32xf32>
    %339 = arith.addf %337, %338 : vector<4x32xf32>
    %340 = vector.shape_cast %339 : vector<4x32xf32> to vector<4x1x32xf32>
    %341 = vector.broadcast %340 : vector<4x1x32xf32> to vector<4x7x32xf32>
    %342 = arith.addf %8, %341 : vector<4x7x32xf32>
    %343 = math.tanh %342 : vector<4x7x32xf32>
    %344 = vector.shape_cast %18 : vector<1x32xf32> to vector<1x1x32xf32>
    %345 = vector.broadcast %344 : vector<1x1x32xf32> to vector<4x7x32xf32>
    %346 = arith.mulf %343, %345 : vector<4x7x32xf32>
    %cst_85 = arith.constant dense<0.000000e+00> : vector<4x7xf32>
    %347 = vector.multi_reduction <add>, %346, %cst_85 [2] : vector<4x7x32xf32> to vector<4x7xf32>
    %348 = vector.broadcast %19 : vector<1x1xf32> to vector<4x7xf32>
    %349 = arith.addf %347, %348 : vector<4x7xf32>
    %cst_86 = arith.constant dense<0xFF800000> : vector<4xf32>
    %350 = vector.multi_reduction <maximumf>, %349, %cst_86 [1] : vector<4x7xf32> to vector<4xf32>
    %351 = vector.shape_cast %350 : vector<4xf32> to vector<4x1xf32>
    %352 = vector.broadcast %351 : vector<4x1xf32> to vector<4x7xf32>
    %353 = arith.subf %349, %352 : vector<4x7xf32>
    %354 = math.exp %353 : vector<4x7xf32>
    %cst_87 = arith.constant dense<0.000000e+00> : vector<4xf32>
    %355 = vector.multi_reduction <add>, %354, %cst_87 [1] : vector<4x7xf32> to vector<4xf32>
    %356 = vector.shape_cast %355 : vector<4xf32> to vector<4x1xf32>
    %357 = tpu.reciprocal %356 {approx = true} : vector<4x1xf32> -> vector<4x1xf32>
    %358 = arith.mulf %356, %357 : vector<4x1xf32>
    %cst_88 = arith.constant 2.000000e+00 : f32
    %359 = vector.broadcast %cst_88 : f32 to vector<4x1xf32>
    %360 = arith.subf %359, %358 : vector<4x1xf32>
    %361 = arith.mulf %357, %360 : vector<4x1xf32>
    %362 = vector.broadcast %361 : vector<4x1xf32> to vector<4x7xf32>
    %363 = arith.mulf %354, %362 : vector<4x7xf32>
    %364 = vector.shape_cast %363 : vector<4x7xf32> to vector<4x7x1xf32>
    %365 = vector.broadcast %364 : vector<4x7x1xf32> to vector<4x7x32xf32>
    %366 = arith.mulf %365, %0 : vector<4x7x32xf32>
    %cst_89 = arith.constant dense<0.000000e+00> : vector<4x32xf32>
    %367 = vector.multi_reduction <add>, %366, %cst_89 [1] : vector<4x7x32xf32> to vector<4x32xf32>
    %368 = vector.broadcast %20 : vector<1x32xf32> to vector<4x32xf32>
    %369 = arith.mulf %367, %368 : vector<4x32xf32>
    %cst_90 = arith.constant dense<0.000000e+00> : vector<4xf32>
    %370 = vector.multi_reduction <add>, %369, %cst_90 [1] : vector<4x32xf32> to vector<4xf32>
    %371 = vector.shape_cast %370 : vector<4xf32> to vector<4x1xf32>
    %372 = vector.extract_strided_slice %15 {offsets = [0, 5], sizes = [4, 1], strides = [1, 1]} : vector<4x7xf32> to vector<4x1xf32>
    %373 = arith.addf %371, %372 : vector<4x1xf32>
    %374 = vector.broadcast %373 : vector<4x1xf32> to vector<4x128xf32>
    %375 = vector.broadcast %21 : vector<1x128xf32> to vector<4x128xf32>
    %376 = arith.mulf %374, %375 : vector<4x128xf32>
    %377 = arith.addf %376, %336 : vector<4x128xf32>
    %378 = vector.broadcast %22 : vector<1x128xf32> to vector<4x128xf32>
    %379 = arith.addf %377, %378 : vector<4x128xf32>
    %cst_91 = arith.constant 5.000000e-01 : f32
    %380 = vector.broadcast %cst_91 : f32 to vector<4x128xf32>
    %381 = arith.mulf %380, %379 : vector<4x128xf32>
    %382 = math.tanh %381 : vector<4x128xf32>
    %cst_92 = arith.constant 1.000000e+00 : f32
    %383 = vector.broadcast %cst_92 : f32 to vector<4x128xf32>
    %384 = arith.addf %382, %383 : vector<4x128xf32>
    %cst_93 = arith.constant 5.000000e-01 : f32
    %385 = vector.broadcast %cst_93 : f32 to vector<4x128xf32>
    %386 = arith.mulf %385, %384 : vector<4x128xf32>
    %387 = math.tanh %379 : vector<4x128xf32>
    %388 = vector.extract_strided_slice %386 {offsets = [0, 0], sizes = [4, 32], strides = [1, 1]} : vector<4x128xf32> to vector<4x32xf32>
    %389 = vector.extract_strided_slice %386 {offsets = [0, 32], sizes = [4, 32], strides = [1, 1]} : vector<4x128xf32> to vector<4x32xf32>
    %390 = vector.extract_strided_slice %387 {offsets = [0, 64], sizes = [4, 32], strides = [1, 1]} : vector<4x128xf32> to vector<4x32xf32>
    %391 = vector.extract_strided_slice %386 {offsets = [0, 96], sizes = [4, 32], strides = [1, 1]} : vector<4x128xf32> to vector<4x32xf32>
    %392 = arith.mulf %389, %332 : vector<4x32xf32>
    %393 = arith.mulf %388, %390 : vector<4x32xf32>
    %394 = arith.addf %392, %393 : vector<4x32xf32>
    %395 = math.tanh %394 : vector<4x32xf32>
    %396 = arith.mulf %391, %395 : vector<4x32xf32>
    %cst_94 = arith.constant dense<0.000000e+00> : vector<4x160xf32>
    %397 = tpu.matmul %396, %17, %cst_94 {dimension_numbers = #tpu.dot_dimension_numbers<[1], [0], [0], [1], [0, 0, 1, 1], [], []>} : vector<4x32xf32>, vector<32x160xf32>, vector<4x160xf32> -> vector<4x160xf32>
    %398 = vector.extract_strided_slice %397 {offsets = [0, 0], sizes = [4, 128], strides = [1, 1]} : vector<4x160xf32> to vector<4x128xf32>
    %399 = vector.extract_strided_slice %397 {offsets = [0, 128], sizes = [4, 32], strides = [1, 1]} : vector<4x160xf32> to vector<4x32xf32>
    %cst_95 = arith.constant dense<0.000000e+00> : vector<4x32xf32>
    %400 = tpu.matmul %394, %16, %cst_95 {dimension_numbers = #tpu.dot_dimension_numbers<[1], [0], [0], [1], [0, 0, 1, 1], [], []>} : vector<4x32xf32>, vector<32x32xf32>, vector<4x32xf32> -> vector<4x32xf32>
    %401 = arith.addf %399, %400 : vector<4x32xf32>
    %402 = vector.shape_cast %401 : vector<4x32xf32> to vector<4x1x32xf32>
    %403 = vector.broadcast %402 : vector<4x1x32xf32> to vector<4x7x32xf32>
    %404 = arith.addf %8, %403 : vector<4x7x32xf32>
    %405 = math.tanh %404 : vector<4x7x32xf32>
    %406 = vector.shape_cast %18 : vector<1x32xf32> to vector<1x1x32xf32>
    %407 = vector.broadcast %406 : vector<1x1x32xf32> to vector<4x7x32xf32>
    %408 = arith.mulf %405, %407 : vector<4x7x32xf32>
    %cst_96 = arith.constant dense<0.000000e+00> : vector<4x7xf32>
    %409 = vector.multi_reduction <add>, %408, %cst_96 [2] : vector<4x7x32xf32> to vector<4x7xf32>
    %410 = vector.broadcast %19 : vector<1x1xf32> to vector<4x7xf32>
    %411 = arith.addf %409, %410 : vector<4x7xf32>
    %cst_97 = arith.constant dense<0xFF800000> : vector<4xf32>
    %412 = vector.multi_reduction <maximumf>, %411, %cst_97 [1] : vector<4x7xf32> to vector<4xf32>
    %413 = vector.shape_cast %412 : vector<4xf32> to vector<4x1xf32>
    %414 = vector.broadcast %413 : vector<4x1xf32> to vector<4x7xf32>
    %415 = arith.subf %411, %414 : vector<4x7xf32>
    %416 = math.exp %415 : vector<4x7xf32>
    %cst_98 = arith.constant dense<0.000000e+00> : vector<4xf32>
    %417 = vector.multi_reduction <add>, %416, %cst_98 [1] : vector<4x7xf32> to vector<4xf32>
    %418 = vector.shape_cast %417 : vector<4xf32> to vector<4x1xf32>
    %419 = tpu.reciprocal %418 {approx = true} : vector<4x1xf32> -> vector<4x1xf32>
    %420 = arith.mulf %418, %419 : vector<4x1xf32>
    %cst_99 = arith.constant 2.000000e+00 : f32
    %421 = vector.broadcast %cst_99 : f32 to vector<4x1xf32>
    %422 = arith.subf %421, %420 : vector<4x1xf32>
    %423 = arith.mulf %419, %422 : vector<4x1xf32>
    %424 = vector.broadcast %423 : vector<4x1xf32> to vector<4x7xf32>
    %425 = arith.mulf %416, %424 : vector<4x7xf32>
    %426 = vector.shape_cast %425 : vector<4x7xf32> to vector<4x7x1xf32>
    %427 = vector.broadcast %426 : vector<4x7x1xf32> to vector<4x7x32xf32>
    %428 = arith.mulf %427, %0 : vector<4x7x32xf32>
    %cst_100 = arith.constant dense<0.000000e+00> : vector<4x32xf32>
    %429 = vector.multi_reduction <add>, %428, %cst_100 [1] : vector<4x7x32xf32> to vector<4x32xf32>
    %430 = vector.broadcast %20 : vector<1x32xf32> to vector<4x32xf32>
    %431 = arith.mulf %429, %430 : vector<4x32xf32>
    %cst_101 = arith.constant dense<0.000000e+00> : vector<4xf32>
    %432 = vector.multi_reduction <add>, %431, %cst_101 [1] : vector<4x32xf32> to vector<4xf32>
    %433 = vector.shape_cast %432 : vector<4xf32> to vector<4x1xf32>
    %434 = vector.extract_strided_slice %15 {offsets = [0, 6], sizes = [4, 1], strides = [1, 1]} : vector<4x7xf32> to vector<4x1xf32>
    %435 = arith.addf %433, %434 : vector<4x1xf32>
    %436 = vector.broadcast %435 : vector<4x1xf32> to vector<4x128xf32>
    %437 = vector.broadcast %21 : vector<1x128xf32> to vector<4x128xf32>
    %438 = arith.mulf %436, %437 : vector<4x128xf32>
    %439 = arith.addf %438, %398 : vector<4x128xf32>
    %440 = vector.broadcast %22 : vector<1x128xf32> to vector<4x128xf32>
    %441 = arith.addf %439, %440 : vector<4x128xf32>
    %cst_102 = arith.constant 5.000000e-01 : f32
    %442 = vector.broadcast %cst_102 : f32 to vector<4x128xf32>
    %443 = arith.mulf %442, %441 : vector<4x128xf32>
    %444 = math.tanh %443 : vector<4x128xf32>
    %cst_103 = arith.constant 1.000000e+00 : f32
    %445 = vector.broadcast %cst_103 : f32 to vector<4x128xf32>
    %446 = arith.addf %444, %445 : vector<4x128xf32>
    %cst_104 = arith.constant 5.000000e-01 : f32
    %447 = vector.broadcast %cst_104 : f32 to vector<4x128xf32>
    %448 = arith.mulf %447, %446 : vector<4x128xf32>
    %449 = math.tanh %441 : vector<4x128xf32>
    %450 = vector.extract_strided_slice %448 {offsets = [0, 0], sizes = [4, 32], strides = [1, 1]} : vector<4x128xf32> to vector<4x32xf32>
    %451 = vector.extract_strided_slice %448 {offsets = [0, 32], sizes = [4, 32], strides = [1, 1]} : vector<4x128xf32> to vector<4x32xf32>
    %452 = vector.extract_strided_slice %449 {offsets = [0, 64], sizes = [4, 32], strides = [1, 1]} : vector<4x128xf32> to vector<4x32xf32>
    %453 = vector.extract_strided_slice %448 {offsets = [0, 96], sizes = [4, 32], strides = [1, 1]} : vector<4x128xf32> to vector<4x32xf32>
    %454 = arith.mulf %451, %394 : vector<4x32xf32>
    %455 = arith.mulf %450, %452 : vector<4x32xf32>
    %456 = arith.addf %454, %455 : vector<4x32xf32>
    %457 = math.tanh %456 : vector<4x32xf32>
    %458 = arith.mulf %453, %457 : vector<4x32xf32>
    %c0_105 = arith.constant 0 : index
    %c0_106 = arith.constant 0 : index
    %459 = vector.load %arg13[%c0_105, %c0_106] : memref<32x7xf32, #tpu.memory_space<vmem>>, vector<32x7xf32>
    %cst_107 = arith.constant dense<0.000000e+00> : vector<4x7xf32>
    %460 = tpu.matmul %458, %459, %cst_107 {dimension_numbers = #tpu.dot_dimension_numbers<[1], [0], [0], [1], [0, 0, 1, 1], [], []>} : vector<4x32xf32>, vector<32x7xf32>, vector<4x7xf32> -> vector<4x7xf32>
    %c0_108 = arith.constant 0 : index
    %c0_109 = arith.constant 0 : index
    %461 = vector.load %arg14[%c0_108, %c0_109] : memref<32x7xf32, #tpu.memory_space<vmem>>, vector<32x7xf32>
    %cst_110 = arith.constant dense<0.000000e+00> : vector<4x7xf32>
    %462 = tpu.matmul %429, %461, %cst_110 {dimension_numbers = #tpu.dot_dimension_numbers<[1], [0], [0], [1], [0, 0, 1, 1], [], []>} : vector<4x32xf32>, vector<32x7xf32>, vector<4x7xf32> -> vector<4x7xf32>
    %463 = arith.addf %460, %462 : vector<4x7xf32>
    %c0_111 = arith.constant 0 : index
    %c0_112 = arith.constant 0 : index
    %464 = vector.load %arg15[%c0_111, %c0_112] : memref<1x7xf32, #tpu.memory_space<vmem>>, vector<1x7xf32>
    %465 = vector.broadcast %464 : vector<1x7xf32> to vector<4x7xf32>
    %466 = arith.addf %463, %465 : vector<4x7xf32>
    %467 = vector.extract_strided_slice %466 {offsets = [0, 0], sizes = [4, 1], strides = [1, 1]} : vector<4x7xf32> to vector<4x1xf32>
    %c0_113 = arith.constant 0 : index
    %c0_114 = arith.constant 0 : index
    %468 = vector.load %arg16[%c0_113, %c0_114] : memref<4x1xf32, #tpu.memory_space<vmem>>, vector<4x1xf32>
    tpu.vector_store %arg16[%c0_113, %c0_114], %467 {strides = array<i32>} : memref<4x1xf32, #tpu.memory_space<vmem>>, vector<4x1xf32>,
    %469 = vector.extract_strided_slice %466 {offsets = [0, 1], sizes = [4, 3], strides = [1, 1]} : vector<4x7xf32> to vector<4x3xf32>
    %cst_115 = arith.constant dense<0xFF800000> : vector<4xf32>
    %470 = vector.multi_reduction <maximumf>, %469, %cst_115 [1] : vector<4x3xf32> to vector<4xf32>
    %471 = vector.shape_cast %470 : vector<4xf32> to vector<4x1xf32>
    %472 = vector.broadcast %471 : vector<4x1xf32> to vector<4x3xf32>
    %473 = arith.subf %469, %472 : vector<4x3xf32>
    %474 = math.exp %473 : vector<4x3xf32>
    %cst_116 = arith.constant dense<0.000000e+00> : vector<4xf32>
    %475 = vector.multi_reduction <add>, %474, %cst_116 [1] : vector<4x3xf32> to vector<4xf32>
    %476 = vector.shape_cast %475 : vector<4xf32> to vector<4x1xf32>
    %477 = vector.broadcast %476 : vector<4x1xf32> to vector<4x3xf32>
    %478 = arith.divf %474, %477 : vector<4x3xf32>
    %c0_117 = arith.constant 0 : index
    %c0_118 = arith.constant 0 : index
    %479 = vector.load %arg17[%c0_117, %c0_118] : memref<4x3xf32, #tpu.memory_space<vmem>>, vector<4x3xf32>
    tpu.vector_store %arg17[%c0_117, %c0_118], %478 {strides = array<i32>} : memref<4x3xf32, #tpu.memory_space<vmem>>, vector<4x3xf32>,
    %480 = vector.extract_strided_slice %466 {offsets = [0, 4], sizes = [4, 3], strides = [1, 1]} : vector<4x7xf32> to vector<4x3xf32>
    %cst_119 = arith.constant dense<0xFF800000> : vector<4xf32>
    %481 = vector.multi_reduction <maximumf>, %480, %cst_119 [1] : vector<4x3xf32> to vector<4xf32>
    %482 = vector.shape_cast %481 : vector<4xf32> to vector<4x1xf32>
    %483 = vector.broadcast %482 : vector<4x1xf32> to vector<4x3xf32>
    %484 = arith.subf %480, %483 : vector<4x3xf32>
    %485 = math.exp %484 : vector<4x3xf32>
    %cst_120 = arith.constant dense<0.000000e+00> : vector<4xf32>
    %486 = vector.multi_reduction <add>, %485, %cst_120 [1] : vector<4x3xf32> to vector<4xf32>
    %487 = vector.shape_cast %486 : vector<4xf32> to vector<4x1xf32>
    %488 = vector.broadcast %487 : vector<4x1xf32> to vector<4x3xf32>
    %489 = arith.divf %485, %488 : vector<4x3xf32>
    %c0_121 = arith.constant 0 : index
    %c0_122 = arith.constant 0 : index
    %490 = vector.load %arg18[%c0_121, %c0_122] : memref<4x3xf32, #tpu.memory_space<vmem>>, vector<4x3xf32>
    tpu.vector_store %arg18[%c0_121, %c0_122], %489 {strides = array<i32>} : memref<4x3xf32, #tpu.memory_space<vmem>>, vector<4x3xf32>,
    return
  }
}

</mosaic_0001>

<bundles_post_ra>
// kernel: decoder_forward.1
= control target key start
LH: loop header
LB: loop body
LE: loop exit
PB: predicated region body
PF: predicated region fallthrough
CT: control target
= control target key end

     0   :  { %s10882_s0 = inlined_call_operand.vmem [shape: f32[4,7,32], index: 0, kind: input, shape index: {}]   ;;  %s10883_s1 = inlined_call_operand.vmem [shape: f32[4,7], index: 1, kind: input, shape index: {}]   ;;  %s10884_s2 = inlined_call_operand.vmem [shape: f32[32,32], index: 2, kind: input, shape index: {}]   ;;  %s10885_s3 = inlined_call_operand.vmem [shape: f32[1,32], index: 3, kind: input, shape index: {}]   ;;  %s10886_s4 = inlined_call_operand.vmem [shape: f32[32,32], index: 4, kind: input, shape index: {}]   ;;  %s10887_s5 = inlined_call_operand.vmem [shape: f32[32,160], index: 5, kind: input, shape index: {}]   ;;  %s10888_s6 = inlined_call_operand.vmem [shape: f32[1,32], index: 6, kind: input, shape index: {}]   ;;  %s10889_s7 = inlined_call_operand.<no memory space> [shape: f32[1,1], index: 7, kind: input, shape index: {}]   ;;  %s10890_s8 = inlined_call_operand.vmem [shape: f32[1,32], index: 8, kind: input, shape index: {}]   ;;  %s10891_s11 = inlined_call_operand.vmem [shape: f32[1,128], index: 11, kind: input, shape index: {}]   ;;  %s10892_s12 = inlined_call_operand.vmem [shape: f32[1,128], index: 12, kind: input, shape index: {}]   ;;  %s10893_s13 = inlined_call_operand.vmem [shape: f32[32,7], index: 13, kind: input, shape index: {}]   ;;  %s10894_s14 = inlined_call_operand.vmem [shape: f32[32,7], index: 14, kind: input, shape index: {}]   ;;  %s10895_s15 = inlined_call_operand.vmem [shape: f32[1,7], index: 15, kind: input, shape index: {}]   ;;  %s10896_s16 = inlined_call_operand.vmem [shape: f32[4,1], index: 16, kind: output, shape index: {0}]   ;;  %s10897_s17 = inlined_call_operand.hbm [shape: f32[4,3], index: 17, kind: output, shape index: {1}]   ;;  %s10898_s18 = inlined_call_operand.hbm [shape: f32[4,3], index: 18, kind: output, shape index: {2}]   ;;  %s10899_s9 = inlined_call_operand.<no memory space> [shape: f32[1,1], index: 9, kind: input, shape index: {}]   ;;  %s10900_s10 = inlined_call_operand.<no memory space> [shape: f32[1,1], index: 10, kind: input, shape index: {}]  }
   0x1   :  { %10978 = sst [smem:[#allocation39_spill]] %s10882_s0  ;;  %v24_v0 = vstv %s10889_s7  ;;  %v26_v1 = vstv %s10899_s9  ;;  %v28_v2 = vstv %s10900_s10 }
   0x2   :  { %10979 = sst [smem:[#allocation40_spill]] %s10883_s1  ;;  %25 = vst [vmem:[#allocation2] sm:$0x1] %v24_v0  ;;  %27 = vst [vmem:[#allocation3] sm:$0x1] %v26_v1 }
   0x3   :  { %10980 = sst [smem:[#allocation41_spill]] %s10884_s2  ;;  %29 = vst [vmem:[#allocation4] sm:$0x1] %v28_v2 }
   0x4   :  { %30 = vsyncpa [#allocation6], 0  ;;  %s10981_s21 = sld [smem:[#allocation41_spill]]  ;;  %v10909_v6 = vlaneseq  ;;  %v853_v9 = vld [vmem:[%s10887_s5 + $0x8] sm:$0xff]  ;;  %v855_v10 = vld [vmem:[%s10887_s5 + $0x18] sm:$0xff]  ;;  %s10983_s30 = sld [smem:[#allocation39_spill]] }
   0x5   :  { %v8896_v11 = vmov 1966171168   ;;  %v9036_v14 = vpack.c.bf16 %v855_v10, %v853_v9  ;;  %v852_v18 = vld [vmem:[%s10887_s5] sm:$0xff]  ;;  %v10907_v19 = vmov 0.0   ;;  %v854_v22 = vld [vmem:[%s10887_s5 + $0x10] sm:$0xff]  ;;  %v849_v27 = vld [vmem:[%s10886_s4 + $0x8] sm:$0xff] }
   0x6   :  { %v74_v12 = vunpack.c.l.s4 %v8896_v11  ;;  %v9045_v17 = vshrl.u32 %v10909_v6, 7  ;;  %932 = vmatprep.mubr.f32.mxu1 %v10907_v19  ;;  %v848_v25 = vld [vmem:[%s10886_s4] sm:$0xff]  ;;  %v9061_v26 = vpack.c.bf16 %v854_v22, %v852_v18  ;;  %v857_v28 = vld [vmem:[%s10887_s5 + $0x28] sm:$0xff]  ;;  %v859_v29 = vld [vmem:[%s10887_s5 + $0x38] sm:$0xff] }
   0x7   :  { %10982 = vst [vmem:[#allocation11_spill] sm:$0xff] %v9036_v14  ;;  %8166 = vmatprep.subr.bf16.mxu1 %v9036_v14  ;;  %v9075_v32 = vpack.c.bf16 %v859_v29, %v857_v28  ;;  %v856_v34 = vld [vmem:[%s10887_s5 + $0x20] sm:$0xff]  ;;  %v858_v35 = vld [vmem:[%s10887_s5 + $0x30] sm:$0xff]  ;;  %v9087_v36 = vpack.c.bf16 %v849_v27, %v848_v25 }
   0x8   :  { %v75_v21 = vunpack.c.0.s8 %v74_v12  ;;  %10984 = vst [vmem:[#allocation12_spill] sm:$0xff] %v9061_v26  ;;  %8168 = vmatpush1.bf16.msra.mxu1 %v9061_v26  ;;  %v9089_v37 = vpack.c.bf16 %v858_v35, %v856_v34 }
   0x9   :  { %10985 = vst [vmem:[#allocation13_spill] sm:$0xff] %v9075_v32  ;;  %10986 = vst [vmem:[#allocation14_spill] sm:$0xff] %v9087_v36 }
   0xa   :  { %v264_v3 = vld [vmem:[%s10981_s21] sm:$0xff]  ;;  %v265_v4 = vld [vmem:[%s10981_s21 + $0x8] sm:$0xff]  ;;  %v266_v5 = vld [vmem:[%s10981_s21 + $0x10] sm:$0xff]  ;;  %v9073_v31 = vsub.s32 %v75_v21, %v9045_v17  ;;  %10987 = vst [vmem:[#allocation15_spill] sm:$0xff] %v9089_v37 }
   0xb   :  { %v8157_v7 = vpack.c.bf16 %v265_v4, %v264_v3  ;;  %v267_v8 = vld [vmem:[%s10981_s21 + $0x18] sm:$0xff]  ;;  %v64_v15 = vld [vmem:[%s10983_s30] sm:$0x7f]  ;;  %v65_v16 = vld [vmem:[%s10983_s30 + $0x8] sm:$0x7f] }
   0xc   :  { %v8161_v13 = vpack.c.bf16 %v267_v8, %v266_v5  ;;  %v72_v20 = vcombine.high %v64_v15, %v64_v15  ;;  %v66_v23 = vld [vmem:[%s10983_s30 + $0x10] sm:$0x7f]  ;;  %v120_v24 = vcombine.high %v65_v16, %v65_v16  ;;  %v67_v33 = vld [vmem:[%s10983_s30 + $0x18] sm:$0x7f] }
   0xd   :  { %8158 = vmatprep.subr.bf16.mxu0 %v8157_v7  ;;  %v168_v30 = vcombine.high %v66_v23, %v66_v23  ;;  %v216_v38 = vcombine.high %v67_v33, %v67_v33 }
   0xe   :  { %8160 = vmatpush3.bf16.msra.mxu0 %v8157_v7 }
   0xf   :  { %8162 = vmatprep.subr.bf16.mxu0 %v8161_v13 }
  0x10   :  { %31 = vsyncpa [#allocation8], 0  ;;  %v79_v39 = vrot.slane %v64_v15, %v9073_v31  ;;  %v86_v40 = vrot.slane %v72_v20, %v9073_v31  ;;  %v127_v41 = vrot.slane %v65_v16, %v9073_v31  ;;  %v134_v42 = vrot.slane %v120_v24, %v9073_v31  ;;  %8170 = vmatprep.subr.bf16.mxu1 %v9075_v32  ;;  %s11007_s21 = sld [smem:[#allocation40_spill]]  ;;  %s8902_s23 = smov 32  }
  0x11   :  { %v175_v43 = vrot.slane %v66_v23, %v9073_v31  ;;  %v182_v44 = vrot.slane %v168_v30, %v9073_v31  ;;  %v223_v45 = vrot.slane %v67_v33, %v9073_v31  ;;  %v9100_v46 = vrot.slane %v216_v38, %v9073_v31  ;;  %8172 = vmatpush1.bf16.msra.mxu1 %v9089_v37  ;;  %s8903_s9 = smov 96   ;;  %s8913_s10 = smov [#allocation5]  }
  0x12   :  { %8164 = vmatpush3.bf16.msra.mxu0 %v8161_v13  ;;  %v87_v47 = vcombine.high %v79_v39, %v79_v39  ;;  %v88_v48 = vcombine.high %v86_v40, %v86_v40  ;;  %v95_v49 = vrot.slane %v79_v39, %v9073_v31  ;;  %v102_v50 = vrot.slane %v86_v40, %v9073_v31 }
  0x13   :  { %v10905_v51 = vmov 0.0|0.0   ;;  %v135_v52 = vcombine.high %v127_v41, %v127_v41  ;;  %v143_v53 = vrot.slane %v127_v41, %v9073_v31  ;;  %v136_v54 = vcombine.high %v134_v42, %v134_v42  ;;  %8180 = vmatprep.subr.bf16.mxu1 %v9036_v14 }
  0x14   :  { %8173 = vmatprep.subr.bf16.mxu0 %v10905_v51  ;;  %v150_v55 = vrot.slane %v134_v42, %v9073_v31  ;;  %v109_v56 = vrot.slane %v87_v47, %v9073_v31  ;;  %v116_v57 = vrot.slane %v88_v48, %v9073_v31  ;;  %v118_v58 = vcombine.high %v102_v50, %v102_v50 }
  0x15   :  { %v183_v59 = vcombine.high %v175_v43, %v175_v43  ;;  %v165_v60 = vcombine.high %v143_v53, %v143_v53  ;;  %vm439_vm0 = vcmask 261120   ;;  %v157_v61 = vrot.slane %v135_v52, %v9073_v31  ;;  %933 = vmatmul.mubr.f32.vlgmr.msra.gmra.mrb[0].mxu1 %v10907_v19 }
  0x16   :  { %v164_v62 = vrot.slane %v136_v54, %v9073_v31  ;;  %v166_v63 = vcombine.high %v150_v55, %v150_v55  ;;  %v268_v0 = vcombine.low %v95_v49, %v109_v56  ;;  %v7962_v1 = vcombine.high %v95_v49, %v109_v56  ;;  %8182 = vmatpush1.bf16.msra.mxu1 %v9061_v26 }
  0x17   :  { %v270_v2 = vcombine.low %v102_v50, %v116_v57  ;;  %v271_v3 = vcombine.low %v118_v58, %v143_v53  ;;  %v167_v4 = vcombine.high %v157_v61, %v157_v61  ;;  %v191_v5 = vrot.slane %v175_v43, %v9073_v31  ;;  %8184 = vmatprep.subr.bf16.mxu1 %v9075_v32 }
  0x18   :  { %v205_v7 = vrot.slane %v183_v59, %v9073_v31  ;;  %v317_v8 = vcombine.low %v157_v61, %v165_v60  ;;  %v278_v9 = vrot.slane %v268_v0, %v9073_v31  ;;  %v285_v10 = vrot.slane %v7962_v1, %v9073_v31  ;;  %1988 = vmatprep.mubr.f32.mxu1 %v10907_v19  ;;  %v850_v59 = vld [vmem:[%s10886_s4 + $0x10] sm:$0xff]  ;;  %v851_v60 = vld [vmem:[%s10886_s4 + $0x18] sm:$0xff]  ;;  %s8901_s4 = smov 64  }
  0x19   :  { %v292_v11 = vrot.slane %v270_v2, %v9073_v31  ;;  %v299_v12 = vrot.slane %v271_v3, %v9073_v31  ;;  %v318_v13 = vcombine.low %v167_v4, %v150_v55  ;;  %v319_v15 = vcombine.low %v164_v62, %v166_v63 }
  0x1a   :  { %v320_v16 = vcombine.low %v191_v5, %v205_v7  ;;  %v327_v18 = vrot.slane %v317_v8, %v9073_v31  ;;  %v300_v20 = vcombine.low %v278_v9, %v285_v10  ;;  %v184_v22 = vcombine.high %v182_v44, %v182_v44  ;;  %8186 = vmatpush1.bf16.msra.mxu1 %v9089_v37 }
  0x1b   :  { %v301_v21 = vcombine.low %v292_v11, %v299_v12  ;;  %v198_v23 = vrot.slane %v182_v44, %v9073_v31  ;;  %v334_v24 = vrot.slane %v318_v13, %v9073_v31  ;;  %v341_v25 = vrot.slane %v319_v15, %v9073_v31  ;;  %8194 = vmatprep.subr.bf16.mxu1 %v9036_v14 }
  0x1c   :  { %v348_v27 = vrot.slane %v320_v16, %v9073_v31  ;;  %v231_v28 = vcombine.high %v223_v45, %v223_v45  ;;  %v308_v29 = vrot.slane %v300_v20, %v9073_v31  ;;  %v212_v33 = vrot.slane %v184_v22, %v9073_v31  ;;  %v7971_v20 = vld [vmem:[%s10888_s6] ss:$0 sm:$0xff] }
  0x1d   :  { %v315_v30 = vrot.slane %v301_v21, %v9073_v31  ;;  %v214_v34 = vcombine.high %v198_v23, %v198_v23  ;;  %v349_v35 = vcombine.low %v327_v18, %v334_v24  ;;  %v239_v39 = vrot.slane %v223_v45, %v9073_v31  ;;  %v7968_v18 = vld [vmem:[%s10885_s3] ss:$0 sm:$0xff]  ;;  %s7938_s3 = sshll.u32 %s8913_s10, 4  ;;  %s10849_s3 = int_to_ptr.vmem [resolvable:$true] %s7938_s3 }
  0x1e   :  { %v350_v38 = vcombine.low %v341_v25, %v348_v27  ;;  %v253_v40 = vrot.slane %v231_v28, %v9073_v31  ;;  %v7963_v42 = vcombine.high %v191_v5, %v205_v7  ;;  %v367_v43 = vcombine.low %v198_v23, %v212_v33 }
  0x1f   :  { %v316_v41 = vcombine.low %v308_v29, %v315_v30  ;;  %v232_v44 = vcombine.high %v9100_v46, %v9100_v46  ;;  %v357_v47 = vrot.slane %v349_v35, %v9073_v31  ;;  %v261_v49 = vcombine.high %v239_v39, %v239_v39 }
  0x20   :  { %v364_v48 = vrot.slane %v350_v38, %v9073_v31  ;;  %v368_v50 = vcombine.low %v214_v34, %v239_v39  ;;  %v376_v52 = vrot.slane %v7963_v42, %v9073_v31  ;;  %v383_v45 = vrot.slane %v367_v43, %v9073_v31 }
  0x21   :  { %8052 = vmatprep.mubr.msk.f32.mxu0 %vm439_vm0, %v316_v41  ;;  %v246_v53 = vrot.slane %v9100_v46, %v9073_v31  ;;  %v260_v54 = vrot.slane %v232_v44, %v9073_v31  ;;  %v369_v56 = vcombine.low %v253_v40, %v261_v49  ;;  %v263_v58 = vcombine.high %v253_v40, %v253_v40 }
  0x22   :  { %v365_v55 = vcombine.low %v357_v47, %v364_v48  ;;  %v390_v57 = vrot.slane %v368_v50, %v9073_v31  ;;  %v398_v61 = vcombine.low %v376_v52, %v383_v45  ;;  %v9155_v1 = vpack.c.bf16 %v851_v60, %v850_v59 }
  0x23   :  { %v262_v62 = vcombine.high %v246_v53, %v246_v53  ;;  %v397_v46 = vrot.slane %v369_v56, %v9073_v31  ;;  %v415_v63 = vcombine.low %v263_v58, %v246_v53  ;;  %vm8899_vm1 = vmmov 0  }
  0x24   :  { %8053 = vmatmul.mubr.msk.f32.vlgmr.msra.gmra.mrb[0].mxu0 %vm439_vm0, %v365_v55  ;;  %10988 = vst [vmem:[#allocation16_spill] sm:$0xff] %v9155_v1  ;;  %v406_v3 = vrot.slane %v398_v61, %v9073_v31  ;;  %v10903_v11 = vmov 0   ;;  %v742_v21 = vcombine.high %v7968_v18, %v7968_v18  ;;  %v749_v22 = vrot.slane %v7968_v18, %v9073_v31 }
  0x25   :  { %8175 = vmatpush3.bf16.msra.mxu0 %v9087_v36  ;;  %v416_v0 = vcombine.low %v260_v54, %v262_v62  ;;  %v399_v2 = vcombine.low %v390_v57, %v397_v46  ;;  %v423_v4 = vrot.slane %v415_v63, %v9073_v31  ;;  %8293 = vset.pattern.permute.xlu0 %v10903_v11  ;;  %vm1639_vm2 = vcmask 260096  }
  0x26   :  { %8176 = vmatprep.subr.bf16.mxu0 %v10905_v51  ;;  %8294 = vset.pattern.permute.xlu1 %v10903_v11  ;;  %v1332_v23 = vcombine.high %v7971_v20, %v7971_v20  ;;  %v1339_v27 = vrot.slane %v7971_v20, %v9073_v31  ;;  %v756_v29 = vrot.slane %v742_v21, %v9073_v31  ;;  %vm1687_vm3 = vcmask 1041409  }
  0x27   :  { %v430_v5 = vrot.slane %v416_v0, %v9073_v31  ;;  %v413_v7 = vrot.slane %v399_v2, %v9073_v31  ;;  %v757_v33 = vcombine.high %v749_v22, %v749_v22  ;;  %v9193_v43 = vrot.slane %v749_v22, %v9073_v31 }
  0x28   :  { %v1346_v35 = vrot.slane %v1332_v23, %v9073_v31  ;;  %v1347_v40 = vcombine.high %v1339_v27, %v1339_v27  ;;  %v758_v42 = vcombine.high %v756_v29, %v756_v29  ;;  %v9196_v48 = vrot.slane %v756_v29, %v9073_v31 }
  0x29   :  { %v431_v8 = vcombine.low %v423_v4, %v430_v5  ;;  %8178 = vmatpush3.bf16.msra.mxu0 %v9155_v1  ;;  %v414_v9 = vcombine.low %v406_v3, %v413_v7  ;;  %v9199_v49 = vrot.slane %v757_v33, %v9073_v31  ;;  %v9204_v53 = vrot.slane %v1339_v27, %v9073_v31 }
  0x2a   :  { %8187 = vmatprep.subr.bf16.mxu0 %v10905_v51  ;;  %v1348_v45 = vcombine.high %v1346_v35, %v1346_v35  ;;  %v9208_v56 = vrot.slane %v1346_v35, %v9073_v31  ;;  %v9211_v57 = vrot.slane %v1347_v40, %v9073_v31  ;;  %v9215_v59 = vrot.slane %v758_v42, %v9073_v31 }
  0x2b   :  { %v438_v10 = vrot.slane %v431_v8, %v9073_v31  ;;  %8055 = vmatprep.mubr.msk.f32.mxu0 %vm439_vm0, %v414_v9  ;;  %v9219_v60 = vcombine.high %v9193_v43, %v9193_v43  ;;  %v9225_v46 = vcombine.high %v9196_v48, %v9196_v48  ;;  %v9229_v63 = vcombine.high %v9199_v49, %v9199_v49 }
  0x2c   :  { %v9232_v0 = vsub.s32 0, %v9045_v17  ;;  %v9235_v4 = vrot.slane %v1348_v45, %v9073_v31  ;;  %v9239_v5 = vcombine.high %v9204_v53, %v9204_v53  ;;  %v9244_v9 = vcombine.high %v9208_v56, %v9208_v56 }
  0x2d   :  { %8056 = vmatmul.mubr.msk.f32.gmra.mrb[2].mxu0 %vm439_vm0, %v438_v10  ;;  %v9248_v10 = vcombine.high %v9211_v57, %v9211_v57  ;;  %vm1689_vm4 = vcmask 1042434   ;;  %vm1691_vm5 = vcmask 1043459   ;;  %vm1694_vm6 = vcmask 52224  }
  0x2e   :  { %8066 = vmatprep.mubr.msk.f32.mxu0 %vm8899_vm1, %v10907_v19  ;;  %vm1872_vm7 = vcmask 257024   ;;  %vm7885_vm8 = vcmask 3072   ;;  %vm7909_vm9 = vcmask 52256   ;;  %vm7887_vm10 = vcmask 27656  }
  0x2f   :  { %vm7898_vm11 = vcmask 19456  }
  0x31   :  { %8067 = vmatmul.mubr.f32.vlgmr.msra.gmra.mrb[4].mxu0 %v10907_v19 }
  0x32   :  { %8189 = vmatpush3.bf16.msra.mxu0 %v9087_v36  ;;  %8077 = vmatprep.mubr.msk.f32.mxu0 %vm8899_vm1, %v10907_v19 }
  0x33   :  { %8190 = vmatprep.subr.bf16.mxu0 %v10905_v51 }
  0x36   :  { %8192 = vmatpush3.bf16.msra.mxu0 %v9155_v1 }
  0x37   :  { %8201 = vmatprep.subr.bf16.mxu0 %v10905_v51 }
  0xe8   :  { %v9178_v12 = vpop.f32.mrb[0].mxu1 }
  0xe9   :  { %v936_v13 = vpop.f32.mrb[1].mxu1 }
  0xf7   :  { %v8054_v15 = vpop.f32.mrb[0].mxu0 }
  0xf8   :  { %v514_v16 = vpop.f32.mrb[1].mxu0  ;;  %v586_v24 = vcombine.high %v8054_v15, %v8054_v15  ;;  %v593_v28 = vrot.slane %v8054_v15, %v9073_v31 }
  0xf9   :  { %v537_v34 = vcombine.high %v514_v16, %v514_v16  ;;  %v544_v50 = vrot.slane %v514_v16, %v9073_v31 }
  0xfa   :  { %v600_v38 = vrot.slane %v586_v24, %v9073_v31  ;;  %v601_v41 = vcombine.high %v593_v28, %v593_v28  ;;  %v609_v55 = vrot.slane %v593_v28, %v9073_v31 }
  0xfb   :  { %v551_v52 = vrot.slane %v537_v34, %v9073_v31  ;;  %v552_v2 = vcombine.high %v544_v50, %v544_v50  ;;  %v560_v15 = vrot.slane %v544_v50, %v9073_v31 }
  0xfc   :  { %v602_v54 = vcombine.high %v600_v38, %v600_v38  ;;  %v623_v58 = vrot.slane %v601_v41, %v9073_v31  ;;  %v616_v62 = vrot.slane %v600_v38, %v9073_v31  ;;  %v631_v8 = vcombine.high %v609_v55, %v609_v55 }
  0xfd   :  { %v553_v3 = vcombine.high %v551_v52, %v551_v52  ;;  %v9254_v21 = vadd.f32 %v9199_v49, %v609_v55  ;;  %v567_v27 = vrot.slane %v551_v52, %v9073_v31  ;;  %v574_v28 = vrot.slane %v552_v2, %v9073_v31 }
  0xfe   :  { %v630_v7 = vrot.slane %v602_v54, %v9073_v31  ;;  %v632_v20 = vcombine.high %v616_v62, %v616_v62  ;;  %v9257_v24 = vadd.f32 %v9219_v60, %v623_v58  ;;  %v582_v40 = vcombine.high %v560_v15, %v560_v15 }
  0xff   :  { %10989 = vst [vmem:[#allocation17_spill] sm:$0xff] %v9254_v21  ;;  %v581_v29 = vrot.slane %v553_v3, %v9073_v31  ;;  %v583_v50 = vcombine.high %v567_v27, %v567_v27  ;;  %v584_v52 = vcombine.high %v574_v28, %v574_v28  ;;  %v9282_v54 = vadd.f32 %v9193_v43, %v560_v15 }
 0x100   :  { %v8057_v25 = vpop.f32.mrb[2].mxu0  ;;  %10990 = vst [vmem:[#allocation18_spill] sm:$0xff] %v9257_v24  ;;  %v634_v33 = vcombine.high %v630_v7, %v630_v7  ;;  %v9274_v42 = vadd.f32 %v9225_v46, %v630_v7  ;;  %v9290_v2 = vadd.f32 %v9199_v49, %v574_v28  ;;  %v9293_v3 = vadd.f32 %v9219_v60, %v582_v40 }
 0x101   :  { %v524_v30 = vpop.f32.mrb[3].mxu0  ;;  %v690_v16 = vrot.slane %v8057_v25, %v9073_v31  ;;  %v9263_v25 = vadd.f32 %v9229_v63, %v631_v8  ;;  %v585_v45 = vcombine.high %v581_v29, %v581_v29  ;;  %10994 = vst [vmem:[#allocation22_spill] sm:$0xff] %v9282_v54  ;;  %v9308_v28 = vadd.f32 %v9225_v46, %v583_v50 }
 0x102   :  { %v635_v22 = vcombine.high %v524_v30, %v524_v30  ;;  %v642_v34 = vrot.slane %v524_v30, %v9073_v31  ;;  %10993 = vst [vmem:[#allocation21_spill] sm:$0xff] %v9274_v42  ;;  %v9285_v55 = vadd.f32 %v9199_v49, %v634_v33  ;;  %10995 = vst [vmem:[#allocation23_spill] sm:$0xff] %v9290_v2 }
 0x103   :  { %v691_v41 = vcombine.high %v690_v16, %v690_v16  ;;  %10996 = vst [vmem:[#allocation24_spill] sm:$0xff] %v9293_v3  ;;  %v9311_v33 = vadd.f32 %v9193_v43, %v585_v45 }
 0x104   :  { %v1005_v39 = vpop.f32.mrb[4].mxu0  ;;  %v658_v8 = vrot.slane %v642_v34, %v9073_v31 }
 0x105   :  { %v1009_v44 = vadd.f32 %v1005_v39, %v936_v13  ;;  %v8068_v47 = vpop.f32.mrb[5].mxu0  ;;  %v633_v13 = vcombine.high %v623_v58, %v623_v58  ;;  %v9271_v39 = vadd.f32 %v9215_v59, %v616_v62  ;;  %v698_v58 = vrot.slane %v690_v16, %v9073_v31  ;;  %11000 = vst [vmem:[#allocation28_spill] sm:$0xff] %v9311_v33 }
 0x106   :  { %v649_v47 = vrot.slane %v635_v22, %v9073_v31  ;;  %v705_v7 = vrot.slane %v691_v41, %v9073_v31  ;;  %v9302_v22 = vadd.f32 %v9229_v63, %v584_v52  ;;  %v680_v51 = vcombine.high %v658_v8, %v658_v8 }
 0x107   :  { %v1017_v61 = vrot.slane %v1009_v44, %v9073_v31  ;;  %v9268_v38 = vadd.f32 %v9196_v48, %v633_v13  ;;  %10992 = vst [vmem:[#allocation20_spill] sm:$0xff] %v9271_v39  ;;  %v9277_v44 = vadd.f32 %v9193_v43, %v632_v20  ;;  %v9298_v13 = vadd.f32 %v9196_v48, %v567_v27 }
 0x108   :  { %v651_v15 = vcombine.high %v649_v47, %v649_v47  ;;  %10998 = vst [vmem:[#allocation26_spill] sm:$0xff] %v9302_v22  ;;  %v707_v11 = vcombine.high %v705_v7, %v705_v7  ;;  %v665_v52 = vrot.slane %v649_v47, %v9073_v31  ;;  %v9320_v50 = vadd.f32 %v9219_v60, %v658_v8 }
 0x109   :  { %v1025_v18 = vrot.slane %v1017_v61, %v9073_v31  ;;  %v1018_v23 = vcombine.high %v1017_v61, %v1017_v61  ;;  %10991 = vst [vmem:[#allocation19_spill] sm:$0xff] %v9268_v38  ;;  %v650_v61 = vcombine.high %v642_v34, %v642_v34  ;;  %10997 = vst [vmem:[#allocation25_spill] sm:$0xff] %v9298_v13 }
 0x10a   :  { %v706_v34 = vcombine.high %v698_v58, %v698_v58  ;;  %v9324_v6 = vadd.f32 %v9196_v48, %v705_v7  ;;  %v9334_v14 = vadd.f32 %v9225_v46, %v707_v11 }
 0x10b   :  { %v1038_v35 = vrot.slane %v1025_v18, %v9232_v0  ;;  %v1032_v30 = vrot.slane %v1018_v23, %v9073_v31  ;;  %v9305_v23 = vadd.f32 %v9215_v59, %v581_v29  ;;  %v672_v27 = vrot.slane %v650_v61, %v9073_v31 }
 0x10c   :  { %v1033_v40 = vcombine.high %v1025_v18, %v1025_v18  ;;  %v679_v29 = vrot.slane %v651_v15, %v9073_v31  ;;  %v9329_v1 = vadd.f32 %v9215_v59, %v706_v34 }
 0x10d   :  { %v1058_v62 = vrot.slane %v1038_v35, %v9073_v31  ;;  %v1042_v20 = vrot.slane %v1032_v30, %v9232_v0  ;;  %v1051_v16 = vcombine.high %v1038_v35, %v1038_v35  ;;  %10999 = vst [vmem:[#allocation27_spill] sm:$0xff] %v9305_v23  ;;  %v9315_v35 = vadd.f32 %v9229_v63, %v698_v58 }
 0x10e   :  { %v1034_v18 = vcombine.high %v1032_v30, %v1032_v30  ;;  %v682_v47 = vcombine.high %v672_v27, %v672_v27  ;;  %v1046_v15 = vrot.slane %v1033_v40, %v9232_v0  ;;  %v9337_v7 = vadd.f32 %v9229_v63, %v672_v27 }
 0x10f   :  { %v1066_v41 = vcombine.high %v1058_v62, %v1058_v62  ;;  %v1065_v45 = vrot.slane %v1051_v16, %v9073_v31  ;;  %v1099_v19 = vcombine.high %v1042_v20, %v1042_v20  ;;  %v1074_v61 = vrot.slane %v1058_v62, %v9073_v31 }
 0x110   :  { %v1106_v58 = vrot.slane %v1042_v20, %v9073_v31  ;;  %v681_v16 = vcombine.high %v665_v52, %v665_v52  ;;  %11001 = vst [vmem:[#allocation29_spill] sm:$0xff] %v9337_v7  ;;  %v9340_v30 = vadd.f32 %v9196_v48, %v680_v51  ;;  %v683_v62 = vcombine.high %v679_v29, %v679_v29 }
 0x111   :  { %v1088_v8 = vrot.slane %v1066_v41, %v9073_v31  ;;  %v9343_v20 = vadd.f32 %v9225_v46, %v665_v52  ;;  %v1067_v34 = vcombine.high %v1065_v45, %v1065_v45  ;;  %v1113_v37 = vrot.slane %v1099_v19, %v9073_v31 }
 0x112   :  { %v1050_v40 = vrot.slane %v1034_v18, %v9232_v0  ;;  %v1081_v41 = vrot.slane %v1065_v45, %v9073_v31  ;;  %v1096_v11 = vcombine.high %v1074_v61, %v1074_v61  ;;  %v1114_v36 = vcombine.high %v1106_v58, %v1106_v58 }
 0x113   :  { %v9349_v32 = vadd.f32 %v9215_v59, %v682_v47  ;;  %v9352_v63 = vadd.f32 %v9193_v43, %v679_v29  ;;  %v1098_v51 = vcombine.high %v1088_v8, %v1088_v8  ;;  %v1147_v48 = vcombine.high %v1046_v15, %v1046_v15 }
 0x114   :  { %v9355_v46 = vadd.f32 %v9199_v49, %v681_v16  ;;  %v1122_v27 = vrot.slane %v1106_v58, %v9073_v31  ;;  %v1154_v19 = vrot.slane %v1046_v15, %v9073_v31  ;;  %v1271_v52 = vadd.f32 %v1074_v61, %v9282_v54 }
 0x115   :  { %v1095_v45 = vrot.slane %v1067_v34, %v9073_v31  ;;  %v1115_v18 = vcombine.high %v1113_v37, %v1113_v37  ;;  %v1129_v59 = vrot.slane %v1113_v37, %v9073_v31  ;;  %v1272_v47 = vadd.f32 %v1088_v8, %v9290_v2 }
 0x116   :  { %v1097_v43 = vcombine.high %v1081_v41, %v1081_v41  ;;  %v1136_v29 = vrot.slane %v1114_v36, %v9073_v31  ;;  %v1195_v26 = vcombine.high %v1050_v40, %v1050_v40  ;;  %v1273_v49 = vadd.f32 %v1096_v11, %v9293_v3 }
 0x117   :  { %v9366_v16 = vadd.f32 %v9219_v60, %v683_v62  ;;  %v1161_v58 = vrot.slane %v1147_v48, %v9073_v31  ;;  %v1202_v61 = vrot.slane %v1050_v40, %v9073_v31  ;;  %v1274_v15 = vadd.f32 %v1098_v51, %v9302_v22 }
 0x118   :  { %v1144_v34 = vcombine.high %v1122_v27, %v1122_v27  ;;  %v1162_v54 = vcombine.high %v1154_v19, %v1154_v19  ;;  %v1275_v37 = vadd.f32 %v1081_v41, %v9298_v13  ;;  %8311 = vtanh.f32 %v1271_v52 }
 0x119   :  { %v1143_v8 = vrot.slane %v1115_v18, %v9073_v31  ;;  %v1145_v36 = vcombine.high %v1129_v59, %v1129_v59  ;;  %v1276_v2 = vadd.f32 %v1095_v45, %v9305_v23  ;;  %8313 = vtanh.f32 %v1272_v47 }
 0x11a   :  { %v1146_v11 = vcombine.high %v1136_v29, %v1136_v29  ;;  %v1209_v60 = vrot.slane %v1195_v26, %v9073_v31  ;;  %v1277_v62 = vadd.f32 %v1097_v43, %v9308_v28  ;;  %8315 = vtanh.f32 %v1273_v49 }
 0x11b   :  { %v1170_v40 = vrot.slane %v1154_v19, %v9073_v31  ;;  %v1210_v51 = vcombine.high %v1202_v61, %v1202_v61  ;;  %v1278_v48 = vadd.f32 %v1122_v27, %v9311_v33  ;;  %8317 = vtanh.f32 %v1274_v15 }
 0x11c   :  { %v1163_v41 = vcombine.high %v1161_v58, %v1161_v58  ;;  %v1184_v52 = vrot.slane %v1162_v54, %v9073_v31  ;;  %v1279_v18 = vadd.f32 %v1136_v29, %v9254_v21  ;;  %8319 = vtanh.f32 %v1275_v37 }
 0x11d   :  { %v1177_v45 = vrot.slane %v1161_v58, %v9073_v31  ;;  %v1218_v47 = vrot.slane %v1202_v61, %v9073_v31  ;;  %v1280_v26 = vadd.f32 %v1144_v34, %v9257_v24  ;;  %8321 = vtanh.f32 %v1276_v2 }
 0x11e   :  { %v1211_v43 = vcombine.high %v1209_v60, %v1209_v60  ;;  %v9384_v19 = vrot.slane %v1209_v60, %v9073_v31  ;;  %v1281_v27 = vadd.f32 %v1146_v11, %v9263_v25  ;;  %8323 = vtanh.f32 %v1277_v62 }
 0x11f   :  { %v1192_v49 = vcombine.high %v1170_v40, %v1170_v40  ;;  %v1232_v54 = vrot.slane %v1210_v51, %v9073_v31  ;;  %v1282_v29 = vadd.f32 %v1129_v59, %v9268_v38  ;;  %8325 = vtanh.f32 %v1278_v48 }
 0x120   :  { %v1191_v58 = vrot.slane %v1163_v41, %v9073_v31  ;;  %v1194_v15 = vcombine.high %v1184_v52, %v1184_v52  ;;  %v1283_v61 = vadd.f32 %v1143_v8, %v9271_v39  ;;  %8327 = vtanh.f32 %v1279_v18 }
 0x121   :  { %v1193_v2 = vcombine.high %v1177_v45, %v1177_v45  ;;  %v1240_v34 = vcombine.high %v1218_v47, %v1218_v47  ;;  %v1284_v37 = vadd.f32 %v1145_v36, %v9274_v42  ;;  %8329 = vtanh.f32 %v1280_v26 }
 0x122   :  { %v8312_v60 = vpop.eup %8311  ;;  %v1239_v11 = vrot.slane %v1211_v43, %v9073_v31  ;;  %v1241_v62 = vcombine.high %v9384_v19, %v9384_v19  ;;  %v1285_v59 = vadd.f32 %v1170_v40, %v9277_v44  ;;  %8331 = vtanh.f32 %v1281_v27 }
 0x123   :  { %v8314_v51 = vpop.eup %8313  ;;  %v1242_v48 = vcombine.high %v1232_v54, %v1232_v54  ;;  %v1286_v41 = vadd.f32 %v1184_v52, %v9285_v55  ;;  %v1287_v8 = vadd.f32 %v1192_v49, %v9320_v50  ;;  %8333 = vtanh.f32 %v1282_v29 }
 0x124   :  { %v8316_v18 = vpop.eup %8315  ;;  %v1288_v36 = vadd.f32 %v1194_v15, %v9337_v7  ;;  %8335 = vtanh.f32 %v1283_v61  ;;  %v1387_v26 = vmul.f32 %v8312_v60, %v9204_v53  ;;  %v1388_v43 = vmul.f32 %v8314_v51, %v9211_v57 }
 0x125   :  { %v8318_v42 = vpop.eup %8317  ;;  %v1289_v39 = vadd.f32 %v1177_v45, %v9340_v30  ;;  %v1290_v40 = vadd.f32 %v1191_v58, %v9349_v32  ;;  %v1291_v27 = vadd.f32 %v1193_v2, %v9343_v20  ;;  %8337 = vtanh.f32 %v1284_v37 }
 0x126   :  { %v8320_v52 = vpop.eup %8319  ;;  %8339 = vtanh.f32 %v1285_v59  ;;  %v1389_v49 = vmul.f32 %v8316_v18, %v9239_v5  ;;  %v1390_v29 = vmul.f32 %v8318_v42, %v9248_v10  ;;  %v1443_v15 = vcombine.low %v1387_v26, %v1388_v43 }
 0x127   :  { %v8322_v61 = vpop.eup %8321  ;;  %v1292_v60 = vadd.f32 %v1218_v47, %v9352_v63  ;;  %v1293_v51 = vadd.f32 %v1232_v54, %v9355_v46  ;;  %v1294_v7 = vadd.f32 %v1240_v34, %v9366_v16  ;;  %8341 = vtanh.f32 %v1286_v41 }
 0x128   :  { %v8324_v45 = vpop.eup %8323  ;;  %8343 = vtanh.f32 %v1287_v8  ;;  %v1391_v58 = vmul.f32 %v8320_v52, %v9208_v56  ;;  %v1392_v2 = vmul.f32 %v8322_v61, %v9235_v4  ;;  %v1444_v37 = vcombine.low %v1389_v49, %v1390_v29 }
 0x129   :  { %v8326_v59 = vpop.eup %8325  ;;  %v1295_v18 = vadd.f32 %v1242_v48, %v9315_v35  ;;  %v1296_v42 = vadd.f32 %v9384_v19, %v9324_v6  ;;  %8345 = vtanh.f32 %v1288_v36  ;;  %v1393_v47 = vmul.f32 %v8324_v45, %v9244_v9 }
 0x12a   :  { %v8328_v54 = vpop.eup %8327  ;;  %8347 = vtanh.f32 %v1289_v39  ;;  %v1445_v34 = vcombine.low %v1391_v58, %v1392_v2  ;;  %v1452_v41 = vrot.slane %v1443_v15, %v9073_v31  ;;  %v1459_v8 = vrot.slane %v1444_v37, %v9073_v31 }
 0x12b   :  { %v8330_v26 = vpop.eup %8329  ;;  %v1297_v43 = vadd.f32 %v1239_v11, %v9329_v1  ;;  %8349 = vtanh.f32 %v1290_v40  ;;  %v1394_v52 = vmul.f32 %v8326_v59, %v9204_v53  ;;  %v1395_v48 = vmul.f32 %v8328_v54, %v9211_v57 }
 0x12c   :  { %v8332_v49 = vpop.eup %8331  ;;  %8351 = vtanh.f32 %v1291_v27  ;;  %v1466_v19 = vrot.slane %v1445_v34, %v9073_v31  ;;  %v1473_v36 = vrot.slane %v1393_v47, %v9073_v31  ;;  %v1474_v39 = vcombine.low %v1452_v41, %v1459_v8 }
 0x12d   :  { %v8334_v29 = vpop.eup %8333  ;;  %8353 = vtanh.f32 %v1292_v60  ;;  %v1396_v15 = vmul.f32 %v8330_v26, %v9239_v5  ;;  %v1397_v61 = vmul.f32 %v8332_v49, %v9248_v10  ;;  %v1491_v45 = vcombine.low %v1394_v52, %v1395_v48 }
 0x12e   :  { %v8336_v11 = vpop.eup %8335  ;;  %v1298_v40 = vadd.f32 %v1241_v62, %v9334_v14  ;;  %8355 = vtanh.f32 %v1293_v51  ;;  %v1475_v58 = vcombine.low %v1466_v19, %v1473_v36  ;;  %v1482_v2 = vrot.slane %v1474_v39, %v9073_v31 }
 0x12f   :  { %v8338_v27 = vpop.eup %8337  ;;  %8357 = vtanh.f32 %v1294_v7  ;;  %v1398_v37 = vmul.f32 %v8334_v29, %v9208_v56  ;;  %v1399_v59 = vmul.f32 %v8336_v11, %v9235_v4  ;;  %v1492_v47 = vcombine.low %v1396_v15, %v1397_v61 }
 0x130   :  { %v8340_v60 = vpop.eup %8339  ;;  %8359 = vtanh.f32 %v1295_v18  ;;  %v1489_v54 = vrot.slane %v1475_v58, %v9073_v31  ;;  %v1400_v34 = vmul.f32 %v8338_v27, %v9244_v9  ;;  %v1500_v51 = vrot.slane %v1491_v45, %v9073_v31 }
 0x131   :  { %v8342_v41 = vpop.eup %8341  ;;  %8361 = vtanh.f32 %v1296_v42  ;;  %v1493_v62 = vcombine.low %v1398_v37, %v1399_v59  ;;  %v1507_v8 = vrot.slane %v1492_v47, %v9073_v31  ;;  %v1401_v52 = vmul.f32 %v8340_v60, %v9204_v53 }
 0x132   :  { %v8344_v7 = vpop.eup %8343  ;;  %8363 = vtanh.f32 %v1297_v43  ;;  %v1490_v26 = vcombine.low %v1482_v2, %v1489_v54  ;;  %v1402_v48 = vmul.f32 %v8342_v41, %v9211_v57  ;;  %v1521_v19 = vrot.slane %v1400_v34, %v9073_v31 }
 0x133   :  { %v8346_v18 = vpop.eup %8345  ;;  %8365 = vtanh.f32 %v1298_v40  ;;  %v1514_v49 = vrot.slane %v1493_v62, %v9073_v31  ;;  %v1522_v36 = vcombine.low %v1500_v51, %v1507_v8  ;;  %v1403_v29 = vmul.f32 %v8344_v7, %v9239_v5 }
 0x134   :  { %v8348_v42 = vpop.eup %8347  ;;  %v1640_v39 = vsel %vm1639_vm2, %v1490_v26, 0.0  ;;  %v1404_v15 = vmul.f32 %v8346_v18, %v9248_v10  ;;  %v1539_v43 = vcombine.low %v1401_v52, %v1402_v48 }
 0x135   :  { %v8350_v61 = vpop.eup %8349  ;;  %1641 = vadd.xlane.f32.xlu0 %v1640_v39  ;;  %v1523_v45 = vcombine.low %v1514_v49, %v1521_v19  ;;  %v1530_v11 = vrot.slane %v1522_v36, %v9073_v31  ;;  %v1405_v40 = vmul.f32 %v8348_v42, %v9208_v56 }
 0x136   :  { %v8352_v58 = vpop.eup %8351  ;;  %v1406_v2 = vmul.f32 %v8350_v61, %v9235_v4  ;;  %v1540_v27 = vcombine.low %v1403_v29, %v1404_v15  ;;  %v1548_v34 = vrot.slane %v1539_v43, %v9073_v31 }
 0x137   :  { %v8354_v37 = vpop.eup %8353  ;;  %v1407_v59 = vmul.f32 %v8352_v58, %v9244_v9  ;;  %v1537_v47 = vrot.slane %v1523_v45, %v9073_v31 }
 0x138   :  { %v8356_v60 = vpop.eup %8355  ;;  %v1541_v54 = vcombine.low %v1405_v40, %v1406_v2  ;;  %v1555_v41 = vrot.slane %v1540_v27, %v9073_v31  ;;  %v1408_v8 = vmul.f32 %v8354_v37, %v9204_v53 }
 0x139   :  { %v8358_v62 = vpop.eup %8357  ;;  %v1538_v51 = vcombine.low %v1530_v11, %v1537_v47  ;;  %v1409_v7 = vmul.f32 %v8356_v60, %v9211_v57  ;;  %v1569_v48 = vrot.slane %v1407_v59, %v9073_v31 }
 0x13a   :  { %v8360_v26 = vpop.eup %8359  ;;  %v1562_v52 = vrot.slane %v1541_v54, %v9073_v31  ;;  %v1570_v18 = vcombine.low %v1548_v34, %v1555_v41  ;;  %v1410_v36 = vmul.f32 %v8358_v62, %v9239_v5 }
 0x13b   :  { %v8362_v49 = vpop.eup %8361  ;;  %v1643_v19 = vsel %vm1639_vm2, %v1538_v51, 0.0  ;;  %v1411_v42 = vmul.f32 %v8360_v26, %v9248_v10  ;;  %v1587_v39 = vcombine.low %v1408_v8, %v1409_v7 }
 0x13c   :  { %v8364_v29 = vpop.eup %8363  ;;  %v1571_v15 = vcombine.low %v1562_v52, %v1569_v48  ;;  %v1578_v43 = vrot.slane %v1570_v18, %v9073_v31  ;;  %1644 = vadd.xlane.f32.xlu0 %v1643_v19  ;;  %v1412_v45 = vmul.f32 %v8362_v49, %v9208_v56  ;;  %v7972_v52 = vld [vmem:[#allocation2] ss:$0 sm:$0xff]  ;;  %v11002_v18 = vlaneseq }
 0x13d   :  { %v8366_v61 = vpop.eup %8365  ;;  %v1413_v11 = vmul.f32 %v8364_v29, %v9235_v4  ;;  %v1588_v58 = vcombine.low %v1410_v36, %v1411_v42  ;;  %v1596_v37 = vrot.slane %v1587_v39, %v9073_v31 }
 0x13e   :  { %v1585_v40 = vrot.slane %v1571_v15, %v9073_v31  ;;  %v1414_v2 = vmul.f32 %v8366_v61, %v9244_v9  ;;  %v1670_v49 = vand.u32 127, %v11002_v18 }
 0x13f   :  { %v1589_v27 = vcombine.low %v1412_v45, %v1413_v11  ;;  %v1603_v59 = vrot.slane %v1588_v58, %v9073_v31 }
 0x140   :  { %v1586_v47 = vcombine.low %v1578_v43, %v1585_v40  ;;  %v1617_v54 = vrot.slane %v1414_v2, %v9073_v31  ;;  %v9468_v36 = vsub.s32 %v1670_v49, %v9045_v17 }
 0x141   :  { %v1610_v60 = vrot.slane %v1589_v27, %v9073_v31  ;;  %v1618_v34 = vcombine.low %v1596_v37, %v1603_v59 }
 0x142   :  { %v1646_v41 = vsel %vm1639_vm2, %v1586_v47, 0.0 }
 0x143   :  { %1647 = vadd.xlane.f32.xlu1 %v1646_v41  ;;  %v1619_v62 = vcombine.low %v1610_v60, %v1617_v54  ;;  %v1626_v51 = vrot.slane %v1618_v34, %v9073_v31  ;;  %v9485_v60 = vsub.s32 1, %v9045_v17  ;;  %v9488_v54 = vsub.s32 2, %v9045_v17 }
 0x145   :  { %v1633_v8 = vrot.slane %v1619_v62, %v9073_v31 }
 0x147   :  { %v1634_v7 = vcombine.low %v1626_v51, %v1633_v8  ;;  %v9493_v51 = vsub.s32 3, %v9045_v17 }
 0x149   :  { %v1649_v26 = vsel %vm1639_vm2, %v1634_v7, 0.0 }
 0x14a   :  { %1650 = vadd.xlane.f32.xlu1 %v1649_v26 }
 0x152   :  { %1658 = vperm.xlu0 %8293, %v7972_v52  }
 0x1c2   :  { %v1642_v48 = vpop.xlane.xlu0 %1641 }
 0x1c9   :  { %v1645_v19 = vpop.xlane.xlu0 %1644 }
 0x1d0   :  { %v1648_v42 = vpop.xlane.xlu1 %1647 }
 0x1d1   :  { %v9470_v39 = vpop.permute.xlu0 %1658 }
 0x1d2   :  { %v1661_v29 = vadd.f32 %v9470_v39, %v1642_v48  ;;  %v1662_v15 = vadd.f32 %v9470_v39, %v1645_v19  ;;  %v1663_v43 = vadd.f32 %v9470_v39, %v1648_v42 }
 0x1d4   :  { %v1674_v61 = vrot.slane %v1661_v29, %v9468_v36  ;;  %v1678_v45 = vrot.slane %v1662_v15, %v9468_v36  ;;  %v1682_v11 = vrot.slane %v1663_v43, %v9468_v36 }
 0x1d6   :  { %v1688_v58 = vsel %vm1687_vm3, %v1678_v45, %v1674_v61 }
 0x1d7   :  { %v1651_v40 = vpop.xlane.xlu1 %1650  ;;  %v1690_v27 = vsel %vm1689_vm4, %v1682_v11, %v1688_v58 }
 0x1d8   :  { %v1664_v2 = vadd.f32 %v9470_v39, %v1651_v40 }
 0x1da   :  { %v1686_v37 = vrot.slane %v1664_v2, %v9468_v36 }
 0x1dc   :  { %v1692_v59 = vsel %vm1691_vm5, %v1686_v37, %v1690_v27 }
 0x1dd   :  { %v1695_v47 = vsel %vm1694_vm6, %v1692_v59, -inf }
 0x1de   :  { %1696 = vmax.xlane.f32.xlu1 %v1695_v47 }
 0x26b   :  { %v1697_v34 = vpop.xlane.xlu1 %1696 }
 0x26c   :  { %v1702_v41 = vrot.slane %v1697_v34, %v9232_v0  ;;  %v1706_v62 = vrot.slane %v1697_v34, %v9485_v60  ;;  %v1710_v8 = vrot.slane %v1697_v34, %v9488_v54  ;;  %v1714_v48 = vrot.slane %v1697_v34, %v9493_v51 }
 0x26e   :  { %v1719_v7 = vsub.f32 %v1661_v29, %v1702_v41  ;;  %v1720_v26 = vsub.f32 %v1662_v15, %v1706_v62  ;;  %v1721_v18 = vsub.f32 %v1663_v43, %v1710_v8  ;;  %v1722_v19 = vsub.f32 %v1664_v2, %v1714_v48  ;;  %v7969_v8 = vld [vmem:[#allocation3] ss:$0 sm:$0xff] }
 0x270   :  { %v1723_v52 = vmul.f32 1.442695, %v1719_v7  ;;  %v1725_v49 = vmul.f32 1.442695, %v1720_v26  ;;  %v1727_v42 = vmul.f32 1.442695, %v1721_v18 }
 0x271   :  { %v1729_v61 = vmul.f32 1.442695, %v1722_v19  ;;  %v7970_v7 = vld [vmem:[#allocation4] ss:$0 sm:$0xff] }
 0x272   :  { %8367 = vpow2.f32 %v1723_v52 }
 0x273   :  { %8369 = vpow2.f32 %v1725_v49 }
 0x274   :  { %8371 = vpow2.f32 %v1727_v42 }
 0x275   :  { %8373 = vpow2.f32 %v1729_v61 }
 0x27c   :  { %v8368_v45 = vpop.eup %8367 }
 0x27d   :  { %1736 = vperm.xlu1 %8294, %v8368_v45   ;;  %v8370_v17 = vpop.eup %8369 }
 0x27e   :  { %v8372_v11 = vpop.eup %8371 }
 0x27f   :  { %v8374_v29 = vpop.eup %8373 }
 0x281   :  { %1739 = vperm.xlu1 %8294, %v8370_v17  }
 0x285   :  { %1742 = vperm.xlu1 %8294, %v8372_v11  }
 0x289   :  { %1745 = vperm.xlu1 %8294, %v8374_v29  }
 0x2fc   :  { %v1737_v15 = vpop.permute.xlu1 %1736 }
 0x2fd   :  { %v1750_v27 = vrot.slane %v1737_v15, %v9468_v36 }
 0x300   :  { %v1740_v58 = vpop.permute.xlu1 %1739 }
 0x301   :  { %v1754_v43 = vrot.slane %v1740_v58, %v9468_v36 }
 0x303   :  { %v1763_v47 = vsel %vm1687_vm3, %v1754_v43, %v1750_v27 }
 0x304   :  { %v1743_v40 = vpop.permute.xlu1 %1742 }
 0x305   :  { %v1758_v2 = vrot.slane %v1743_v40, %v9468_v36 }
 0x307   :  { %v1764_v34 = vsel %vm1689_vm4, %v1758_v2, %v1763_v47 }
 0x308   :  { %v1746_v37 = vpop.permute.xlu1 %1745 }
 0x309   :  { %v1762_v59 = vrot.slane %v1746_v37, %v9468_v36  ;;  %v9512_v37 = vld [vmem:[%s10983_s30 + $0x8] sm:$0x7f] }
 0x30b   :  { %v1765_v41 = vsel %vm1691_vm5, %v1762_v59, %v1764_v34 }
 0x30c   :  { %v1767_v62 = vsel %vm1694_vm6, %v1765_v41, 0.0 }
 0x30d   :  { %1768 = vadd.xlane.f32.xlu1 %v1767_v62 }
 0x31e   :  { %833 = vperm.xlu1 %8294, %v7969_v8  }
 0x322   :  { %844 = vperm.xlu1 %8294, %v7970_v7  }
 0x39a   :  { %v1769_v26 = vpop.xlane.xlu1 %1768 }
 0x39b   :  { %8375 = vrcp.f32 %v1769_v26 }
 0x3a5   :  { %v8376_v52 = vpop.eup %8375 }
 0x3a6   :  { %v1771_v48 = vmul.f32 %v8376_v52, %v1769_v26  ;;  %v9526_v26 = vld [vmem:[%s10983_s30] sm:$0x7f] }
 0x3a7   :  { %11004 = vst [vmem:[#allocation31_spill] sm:$0xff] %v9526_v26 }
 0x3a8   :  { %v1772_v18 = vsub.f32 2.0, %v1771_v48 }
 0x3aa   :  { %v1773_v49 = vmul.f32 %v8376_v52, %v1772_v18 }
 0x3ac   :  { %v1782_v19 = vrot.slane %v1773_v49, %v9485_v60  ;;  %v1786_v61 = vrot.slane %v1773_v49, %v9488_v54  ;;  %v1778_v58 = vrot.slane %v1773_v49, %v9232_v0  ;;  %v1790_v43 = vrot.slane %v1773_v49, %v9493_v51 }
 0x3ae   :  { %v1796_v42 = vmul.f32 %v8370_v17, %v1782_v19  ;;  %v1797_v15 = vmul.f32 %v8372_v11, %v1786_v61  ;;  %v1795_v40 = vmul.f32 %v8368_v45, %v1778_v58  ;;  %v1798_v2 = vmul.f32 %v8374_v29, %v1790_v43  ;;  %v9519_v45 = vld [vmem:[%s10983_s30 + $0x10] sm:$0x7f] }
 0x3af   :  { %11003 = vst [vmem:[#allocation30_spill] sm:$0xff] %v9519_v45 }
 0x3b0   :  { %1806 = vperm.xlu0 %8293, %v1796_v42  }
 0x3b4   :  { %1811 = vperm.xlu0 %8293, %v1797_v15   ;;  %v9533_v15 = vld [vmem:[%s10983_s30 + $0x18] sm:$0x7f] }
 0x3b5   :  { %11005 = vst [vmem:[#allocation32_spill] sm:$0xff] %v9533_v15 }
 0x3b8   :  { %1801 = vperm.xlu0 %8293, %v1795_v40  }
 0x3bc   :  { %1816 = vperm.xlu0 %8293, %v1798_v2  }
 0x42f   :  { %v1807_v27 = vpop.permute.xlu0 %1806 }
 0x430   :  { %v1820_v17 = vmul.f32 %v9512_v37, %v1807_v27 }
 0x432   :  { %v1830_v59 = vsel %vm1639_vm2, %v1820_v17, 0.0 }
 0x433   :  { %v1831_v11 = vrot.slane %v1830_v59, 4  ;;  %v1812_v47 = vpop.permute.xlu0 %1811 }
 0x434   :  { %v1821_v29 = vmul.f32 %v9519_v45, %v1812_v47 }
 0x435   :  { %v1832_v34 = vadd.f32 %v1831_v11, %v1830_v59 }
 0x436   :  { %v1837_v41 = vsel %vm1639_vm2, %v1821_v29, 0.0 }
 0x437   :  { %v1833_v62 = vrot.slane %v1832_v34, 2  ;;  %v1838_v8 = vrot.slane %v1837_v41, 4  ;;  %v1802_v7 = vpop.permute.xlu0 %1801 }
 0x438   :  { %v1819_v52 = vmul.f32 %v9526_v26, %v1802_v7 }
 0x439   :  { %v1834_v48 = vadd.f32 %v1833_v62, %v1832_v34  ;;  %v1839_v18 = vadd.f32 %v1838_v8, %v1837_v41  ;;  %v9540_v41 = vld [vmem:[%s10890_s8] ss:$0 sm:$0xff] }
 0x43a   :  { %v1823_v49 = vsel %vm1639_vm2, %v1819_v52, 0.0  ;;  %11006 = vst [vmem:[#allocation33_spill] sm:$0xff] %v9540_v41 }
 0x43b   :  { %v1840_v19 = vrot.slane %v1839_v18, 2  ;;  %v1824_v42 = vrot.slane %v1823_v49, 4  ;;  %v1817_v61 = vpop.permute.xlu0 %1816  ;;  %v1835_v40 = vrot.slane %v1834_v48, 1 }
 0x43c   :  { %v1822_v58 = vmul.f32 %v9533_v15, %v1817_v61 }
 0x43d   :  { %v1841_v43 = vadd.f32 %v1840_v19, %v1839_v18  ;;  %v1825_v2 = vadd.f32 %v1824_v42, %v1823_v49  ;;  %v1836_v47 = vadd.f32 %v1835_v40, %v1834_v48 }
 0x43e   :  { %v1844_v27 = vsel %vm1639_vm2, %v1822_v58, 0.0 }
 0x43f   :  { %v1826_v17 = vrot.slane %v1825_v2, 2  ;;  %v1845_v59 = vrot.slane %v1844_v27, 4  ;;  %v1842_v11 = vrot.slane %v1841_v43, 1  ;;  %v1858_v52 = vmul.f32 %v9540_v41, %v1836_v47  ;;  %v834_v47 = vpop.permute.xlu1 %833 }
 0x441   :  { %v1827_v29 = vadd.f32 %v1826_v17, %v1825_v2  ;;  %v1846_v34 = vadd.f32 %v1845_v59, %v1844_v27  ;;  %v1843_v7 = vadd.f32 %v1842_v11, %v1841_v43  ;;  %v1865_v58 = vrot.slane %v1858_v52, 7 }
 0x443   :  { %v1828_v62 = vrot.slane %v1827_v29, 1  ;;  %v1847_v8 = vrot.slane %v1846_v34, 2  ;;  %v1859_v61 = vmul.f32 %v9540_v41, %v1843_v7 }
 0x445   :  { %v1829_v18 = vadd.f32 %v1828_v62, %v1827_v29  ;;  %v1848_v49 = vadd.f32 %v1847_v8, %v1846_v34  ;;  %v1867_v27 = vrot.slane %v1859_v61, 6  ;;  %v825_v29 = vld [vmem:[%s11007_s21] sm:$0xf]  ;;  %v845_v34 = vpop.permute.xlu1 %844 }
 0x446   :  { %v836_v62 = vmul.f32 %v834_v47, %v825_v29 }
 0x447   :  { %v1849_v19 = vrot.slane %v1848_v49, 1  ;;  %v1857_v42 = vmul.f32 %v9540_v41, %v1829_v18  ;;  %v9559_v18 = vld [vmem:[%s10891_s11] ss:$0 sm:$0xff] }
 0x448   :  { %v9553_v8 = vadd.f32 %v845_v34, %v836_v62  ;;  %11009 = vst [vmem:[#allocation35_spill] sm:$0xff] %v9559_v18 }
 0x449   :  { %v1850_v48 = vadd.f32 %v1849_v19, %v1848_v49  ;;  %v1866_v2 = vsel %vm1687_vm3, %v1865_v58, %v1857_v42  ;;  %v9565_v42 = vld [vmem:[%s10892_s12] ss:$0 sm:$0xff] }
 0x44a   :  { %v1868_v43 = vsel %vm1689_vm4, %v1867_v27, %v1866_v2  ;;  %11008 = vst [vmem:[#allocation34_spill] sm:$0xff] %v9553_v8  ;;  %11010 = vst [vmem:[#allocation36_spill] sm:$0xff] %v9565_v42 }
 0x44b   :  { %v1860_v40 = vmul.f32 %v9540_v41, %v1850_v48 }
 0x44d   :  { %v1869_v17 = vrot.slane %v1860_v40, 5 }
 0x44f   :  { %v1870_v59 = vsel %vm1691_vm5, %v1869_v17, %v1868_v43 }
 0x450   :  { %v1873_v11 = vsel %vm1872_vm7, %v1870_v59, 0.0 }
 0x451   :  { %1874 = vadd.xlane.f32.xlu0 %v1873_v11 }
 0x4de   :  { %v1875_v7 = vpop.xlane.xlu0 %1874 }
 0x4df   :  { %v1876_v52 = vadd.f32 %v1875_v7, %v9553_v8 }
 0x4e1   :  { %1879 = vperm.xlu1 %8294, %v1876_v52   ;;  %v11012_v52 = vld [vmem:[#allocation12_spill] sm:$0xff] }
 0x560   :  { %v1880_v49 = vpop.permute.xlu1 %1879 }
 0x561   :  { %v1888_v19 = vmul.f32 %v9559_v18, %v1880_v49  ;;  %v11013_v49 = vmov 0.0  }
 0x563   :  { %v1889_v61 = vadd.f32 %v1888_v19, %v9178_v12  ;;  %v11014_v19 = vld [vmem:[#allocation13_spill] sm:$0xff] }
 0x565   :  { %v1896_v48 = vadd.f32 %v9565_v42, %v1889_v61 }
 0x567   :  { %8377 = vtanh.f32 %v1896_v48  ;;  %v1897_v40 = vmul.f32 0.5, %v1896_v48  ;;  %v11015_v48 = vld [vmem:[#allocation14_spill] sm:$0xff] }
 0x569   :  { %8379 = vtanh.f32 %v1897_v40  ;;  %v11017_v40 = vld [vmem:[#allocation15_spill] sm:$0xff] }
 0x571   :  { %v8378_v58 = vpop.eup %8377 }
 0x572   :  { %1904 = vrot.lane.b32.xlu0 %v8378_v58, %s8901_s4  ;;  %v11016_v58 = vmov 0.0|0.0  }
 0x573   :  { %v8380_v2 = vpop.eup %8379 }
 0x574   :  { %v1899_v27 = vadd.f32 1.0, %v8380_v2  ;;  %v11018_v2 = vld [vmem:[#allocation11_spill] sm:$0xff] }
 0x576   :  { %v1900_v17 = vmul.f32 0.5, %v1899_v27  ;;  %v11019_v27 = vld [vmem:[#allocation16_spill] sm:$0xff] }
 0x578   :  { %v1902_v11 = vmul.f32 0.0, %v1900_v17 }
 0x5e4   :  { %v1905_v43 = vpop.permute.xlu0 %1904 }
 0x5e5   :  { %v1907_v59 = vmul.f32 %v1905_v43, %v1900_v17 }
 0x5e7   :  { %1909 = vrot.lane.b32.xlu1 %v1907_v59, %s8902_s23 }
 0x659   :  { %v1910_v47 = vpop.permute.xlu1 %1909 }
 0x65a   :  { %v9571_v12 = vadd.f32 %v1910_v47, %v1902_v11 }
 0x65c   :  { %11011 = vst [vmem:[#allocation37_spill] sm:$0xff] %v9571_v12  ;;  %8381 = vtanh.f32 %v9571_v12 }
 0x666   :  { %v8382_v29 = vpop.eup %8381 }
 0x667   :  { %1915 = vrot.lane.b32.xlu1 %v8382_v29, %s8901_s4 }
 0x6d9   :  { %v1916_v34 = vpop.permute.xlu1 %1915 }
 0x6da   :  { %v1918_v62 = vmul.f32 %v1916_v34, %v1900_v17 }
 0x6dc   :  { %1920 = vrot.lane.b32.xlu1 %v1918_v62, %s8902_s23 }
 0x6e0   :  { %1996 = vrot.lane.b32.xlu1 %v9571_v12, %s8903_s9 }
 0x74e   :  { %v1921_v7 = vpop.permute.xlu1 %1920 }
 0x74f   :  { %7976 = vmatmul.mubr.msk.f32.vlgmr.msra.gmra.mrb[2].mxu1 %vm439_vm0, %v1921_v7 }
 0x750   :  { %8196 = vmatpush1.bf16.msra.mxu1 %v11012_v52  ;;  %2954 = vmatprep.mubr.f32.mxu1 %v11013_v49 }
 0x751   :  { %8198 = vmatprep.subr.bf16.mxu1 %v11014_v19 }
 0x752   :  { %v1997_v61 = vpop.permute.xlu1 %1996 }
 0x753   :  { %8078 = vmatmul.mubr.msk.f32.vlgmr.msra.gmra.mrb[6].mxu0 %vm439_vm0, %v1997_v61 }
 0x754   :  { %8203 = vmatpush3.bf16.msra.mxu0 %v11015_v48  ;;  %8088 = vmatprep.mubr.msk.f32.mxu0 %vm8899_vm1, %v11013_v49 }
 0x755   :  { %8204 = vmatprep.subr.bf16.mxu0 %v11016_v58  ;;  %8200 = vmatpush1.bf16.msra.mxu1 %v11017_v40 }
 0x756   :  { %8208 = vmatprep.subr.bf16.mxu1 %v11018_v2 }
 0x758   :  { %8206 = vmatpush3.bf16.msra.mxu0 %v11019_v27 }
 0x759   :  { %8215 = vmatprep.subr.bf16.mxu0 %v11016_v58 }
 0x822   :  { %v9591_v17 = vpop.f32.mrb[2].mxu1 }
 0x823   :  { %11020 = vst [vmem:[#allocation38_spill] sm:$0xff] %v9591_v17  ;;  %v1992_v43 = vpop.f32.mrb[3].mxu1 }
 0x826   :  { %v2066_v59 = vpop.f32.mrb[6].mxu0 }
 0x827   :  { %v2070_v11 = vadd.f32 %v2066_v59, %v1992_v43  ;;  %v8079_v47 = vpop.f32.mrb[7].mxu0 }
 0x829   :  { %v2078_v29 = vrot.slane %v2070_v11, %v9073_v31 }
 0x82b   :  { %v2086_v34 = vrot.slane %v2078_v29, %v9073_v31  ;;  %v2079_v62 = vcombine.high %v2078_v29, %v2078_v29 }
 0x82d   :  { %v2099_v7 = vrot.slane %v2086_v34, %v9232_v0  ;;  %v2093_v61 = vrot.slane %v2079_v62, %v9073_v31  ;;  %v2094_v52 = vcombine.high %v2086_v34, %v2086_v34 }
 0x82f   :  { %v2119_v2 = vrot.slane %v2099_v7, %v9073_v31  ;;  %v2103_v40 = vrot.slane %v2093_v61, %v9232_v0  ;;  %v2112_v19 = vcombine.high %v2099_v7, %v2099_v7  ;;  %v2095_v59 = vcombine.high %v2093_v61, %v2093_v61 }
 0x830   :  { %v2107_v29 = vrot.slane %v2094_v52, %v9232_v0 }
 0x831   :  { %v2127_v27 = vcombine.high %v2119_v2, %v2119_v2  ;;  %v2126_v58 = vrot.slane %v2112_v19, %v9073_v31  ;;  %v2160_v43 = vcombine.high %v2103_v40, %v2103_v40  ;;  %v2135_v11 = vrot.slane %v2119_v2, %v9073_v31 }
 0x832   :  { %v2167_v47 = vrot.slane %v2103_v40, %v9073_v31  ;;  %v2111_v12 = vrot.slane %v2095_v59, %v9232_v0  ;;  %v2208_v17 = vcombine.high %v2107_v29, %v2107_v29  ;;  %v2215_v2 = vrot.slane %v2107_v29, %v9073_v31  ;;  %v11021_v40 = vld [vmem:[#allocation22_spill] sm:$0xff] }
 0x833   :  { %v2149_v49 = vrot.slane %v2127_v27, %v9073_v31  ;;  %v2128_v62 = vcombine.high %v2126_v58, %v2126_v58  ;;  %v2174_v48 = vrot.slane %v2160_v43, %v9073_v31  ;;  %v2142_v34 = vrot.slane %v2126_v58, %v9073_v31  ;;  %v11022_v43 = vld [vmem:[#allocation23_spill] sm:$0xff] }
 0x834   :  { %v2157_v7 = vcombine.high %v2135_v11, %v2135_v11  ;;  %v2175_v42 = vcombine.high %v2167_v47, %v2167_v47  ;;  %v2183_v61 = vrot.slane %v2167_v47, %v9073_v31  ;;  %v2332_v18 = vadd.f32 %v2135_v11, %v11021_v40 }
 0x835   :  { %v2159_v19 = vcombine.high %v2149_v49, %v2149_v49  ;;  %v2156_v52 = vrot.slane %v2128_v62, %v9073_v31  ;;  %v2176_v27 = vcombine.high %v2174_v48, %v2174_v48  ;;  %v2190_v8 = vrot.slane %v2174_v48, %v9073_v31 }
 0x836   :  { %v2333_v41 = vadd.f32 %v2149_v49, %v11022_v43  ;;  %v2158_v59 = vcombine.high %v2142_v34, %v2142_v34  ;;  %v2197_v58 = vrot.slane %v2175_v42, %v9073_v31  ;;  %v2256_v15 = vcombine.high %v2111_v12, %v2111_v12 }
 0x837   :  { %v2334_v26 = vadd.f32 %v2157_v7, %v9293_v3  ;;  %v2222_v45 = vrot.slane %v2208_v17, %v9073_v31  ;;  %v2263_v47 = vrot.slane %v2111_v12, %v9073_v31  ;;  %v2335_v29 = vadd.f32 %v2159_v19, %v9302_v22 }
 0x838   :  { %v2205_v11 = vcombine.high %v2183_v61, %v2183_v61  ;;  %v2223_v40 = vcombine.high %v2215_v2, %v2215_v2  ;;  %v2336_v62 = vadd.f32 %v2142_v34, %v9298_v13  ;;  %8383 = vtanh.f32 %v2332_v18 }
 0x839   :  { %v2204_v48 = vrot.slane %v2176_v27, %v9073_v31  ;;  %v2206_v49 = vcombine.high %v2190_v8, %v2190_v8  ;;  %v2337_v43 = vadd.f32 %v2156_v52, %v9305_v23  ;;  %8385 = vtanh.f32 %v2333_v41 }
 0x83a   :  { %v2207_v42 = vcombine.high %v2197_v58, %v2197_v58  ;;  %v2270_v7 = vrot.slane %v2256_v15, %v9073_v31  ;;  %v2338_v17 = vadd.f32 %v2158_v59, %v9308_v28  ;;  %8387 = vtanh.f32 %v2334_v26 }
 0x83b   :  { %v2231_v12 = vrot.slane %v2215_v2, %v9073_v31  ;;  %v2271_v19 = vcombine.high %v2263_v47, %v2263_v47  ;;  %v2339_v22 = vadd.f32 %v2183_v61, %v9311_v33  ;;  %8389 = vtanh.f32 %v2335_v29 }
 0x83c   :  { %v2224_v34 = vcombine.high %v2222_v45, %v2222_v45  ;;  %v2245_v18 = vrot.slane %v2223_v40, %v9073_v31  ;;  %v2340_v27 = vadd.f32 %v2197_v58, %v9254_v21  ;;  %8391 = vtanh.f32 %v2336_v62 }
 0x83d   :  { %v2238_v41 = vrot.slane %v2222_v45, %v9073_v31  ;;  %v2279_v52 = vrot.slane %v2263_v47, %v9073_v31  ;;  %v2341_v15 = vadd.f32 %v2205_v11, %v9257_v24  ;;  %8393 = vtanh.f32 %v2337_v43  ;;  %v11023_v47 = vld [vmem:[#allocation20_spill] sm:$0xff]  ;;  %v11024_v24 = vld [vmem:[#allocation21_spill] sm:$0xff] }
 0x83e   :  { %v2272_v26 = vcombine.high %v2270_v7, %v2270_v7  ;;  %v9631_v2 = vrot.slane %v2270_v7, %v9073_v31  ;;  %v2342_v61 = vadd.f32 %v2207_v42, %v9263_v25  ;;  %8395 = vtanh.f32 %v2338_v17 }
 0x83f   :  { %v2253_v59 = vcombine.high %v2231_v12, %v2231_v12  ;;  %v2293_v40 = vrot.slane %v2271_v19, %v9073_v31  ;;  %v2343_v58 = vadd.f32 %v2190_v8, %v9268_v38  ;;  %8397 = vtanh.f32 %v2339_v22 }
 0x840   :  { %v2252_v45 = vrot.slane %v2224_v34, %v9073_v31  ;;  %v2255_v29 = vcombine.high %v2245_v18, %v2245_v18  ;;  %v2344_v62 = vadd.f32 %v2204_v48, %v11023_v47  ;;  %8399 = vtanh.f32 %v2340_v27  ;;  %v11025_v47 = vld [vmem:[#allocation29_spill] sm:$0xff] }
 0x841   :  { %v2254_v43 = vcombine.high %v2238_v41, %v2238_v41  ;;  %v2301_v11 = vcombine.high %v2279_v52, %v2279_v52  ;;  %v2345_v7 = vadd.f32 %v2206_v49, %v11024_v24  ;;  %8401 = vtanh.f32 %v2341_v15 }
 0x842   :  { %v8384_v21 = vpop.eup %8383  ;;  %v2300_v42 = vrot.slane %v2272_v26, %v9073_v31  ;;  %v2302_v17 = vcombine.high %v9631_v2, %v9631_v2  ;;  %v2346_v8 = vadd.f32 %v2231_v12, %v9277_v44  ;;  %8403 = vtanh.f32 %v2342_v61 }
 0x843   :  { %v8386_v22 = vpop.eup %8385  ;;  %v2303_v19 = vcombine.high %v2293_v40, %v2293_v40  ;;  %v2347_v34 = vadd.f32 %v2245_v18, %v9285_v55  ;;  %v2348_v48 = vadd.f32 %v2253_v59, %v9320_v50  ;;  %8405 = vtanh.f32 %v2343_v58 }
 0x844   :  { %v8388_v27 = vpop.eup %8387  ;;  %v2349_v49 = vadd.f32 %v2255_v29, %v11025_v47  ;;  %8407 = vtanh.f32 %v2344_v62  ;;  %v2388_v15 = vmul.f32 %v8384_v21, %v9204_v53  ;;  %v2389_v26 = vmul.f32 %v8386_v22, %v9211_v57 }
 0x845   :  { %v8390_v24 = vpop.eup %8389  ;;  %v2350_v38 = vadd.f32 %v2238_v41, %v9340_v30  ;;  %v2351_v12 = vadd.f32 %v2252_v45, %v9349_v32  ;;  %v2352_v61 = vadd.f32 %v2254_v43, %v9343_v20  ;;  %8409 = vtanh.f32 %v2345_v7 }
 0x846   :  { %v8392_v18 = vpop.eup %8391  ;;  %8411 = vtanh.f32 %v2346_v8  ;;  %v2390_v59 = vmul.f32 %v8388_v27, %v9239_v5  ;;  %v2391_v58 = vmul.f32 %v8390_v24, %v9248_v10  ;;  %v2444_v29 = vcombine.low %v2388_v15, %v2389_v26 }
 0x847   :  { %v8394_v62 = vpop.eup %8393  ;;  %v2353_v21 = vadd.f32 %v2279_v52, %v9352_v63  ;;  %v2354_v22 = vadd.f32 %v2293_v40, %v9355_v46  ;;  %v2355_v47 = vadd.f32 %v2301_v11, %v9366_v16  ;;  %8413 = vtanh.f32 %v2347_v34 }
 0x848   :  { %v8396_v41 = vpop.eup %8395  ;;  %8415 = vtanh.f32 %v2348_v48  ;;  %v2392_v45 = vmul.f32 %v8392_v18, %v9208_v56  ;;  %v2393_v43 = vmul.f32 %v8394_v62, %v9235_v4  ;;  %v2445_v7 = vcombine.low %v2390_v59, %v2391_v58 }
 0x849   :  { %v8398_v8 = vpop.eup %8397  ;;  %v2356_v27 = vadd.f32 %v2303_v19, %v9315_v35  ;;  %v2357_v24 = vadd.f32 %v9631_v2, %v9324_v6  ;;  %8417 = vtanh.f32 %v2349_v49  ;;  %v2394_v52 = vmul.f32 %v8396_v41, %v9244_v9 }
 0x84a   :  { %v8400_v40 = vpop.eup %8399  ;;  %8419 = vtanh.f32 %v2350_v38  ;;  %v2446_v11 = vcombine.low %v2392_v45, %v2393_v43  ;;  %v2453_v34 = vrot.slane %v2444_v29, %v9073_v31  ;;  %v2460_v48 = vrot.slane %v2445_v7, %v9073_v31 }
 0x84b   :  { %v8402_v15 = vpop.eup %8401  ;;  %v2358_v26 = vadd.f32 %v2300_v42, %v9329_v1  ;;  %8421 = vtanh.f32 %v2351_v12  ;;  %v2395_v18 = vmul.f32 %v8398_v8, %v9204_v53  ;;  %v2396_v19 = vmul.f32 %v8400_v40, %v9211_v57 }
 0x84c   :  { %v8404_v59 = vpop.eup %8403  ;;  %8423 = vtanh.f32 %v2352_v61  ;;  %v2467_v2 = vrot.slane %v2446_v11, %v9073_v31  ;;  %v2474_v49 = vrot.slane %v2394_v52, %v9073_v31  ;;  %v2475_v38 = vcombine.low %v2453_v34, %v2460_v48 }
 0x84d   :  { %v8406_v58 = vpop.eup %8405  ;;  %8425 = vtanh.f32 %v2353_v21  ;;  %v2397_v29 = vmul.f32 %v8402_v15, %v9239_v5  ;;  %v2398_v62 = vmul.f32 %v8404_v59, %v9248_v10  ;;  %v2492_v41 = vcombine.low %v2395_v18, %v2396_v19 }
 0x84e   :  { %v8408_v42 = vpop.eup %8407  ;;  %v2359_v12 = vadd.f32 %v2302_v17, %v9334_v14  ;;  %8427 = vtanh.f32 %v2354_v22  ;;  %v2476_v45 = vcombine.low %v2467_v2, %v2474_v49  ;;  %v2483_v43 = vrot.slane %v2475_v38, %v9073_v31 }
 0x84f   :  { %v8410_v61 = vpop.eup %8409  ;;  %8429 = vtanh.f32 %v2355_v47  ;;  %v2399_v7 = vmul.f32 %v8406_v58, %v9208_v56  ;;  %v2400_v8 = vmul.f32 %v8408_v42, %v9235_v4  ;;  %v2493_v52 = vcombine.low %v2397_v29, %v2398_v62 }
 0x850   :  { %v8412_v21 = vpop.eup %8411  ;;  %8431 = vtanh.f32 %v2356_v27  ;;  %v2490_v40 = vrot.slane %v2476_v45, %v9073_v31  ;;  %v2401_v11 = vmul.f32 %v8410_v61, %v9244_v9  ;;  %v2501_v22 = vrot.slane %v2492_v41, %v9073_v31 }
 0x851   :  { %v8414_v34 = vpop.eup %8413  ;;  %8433 = vtanh.f32 %v2357_v24  ;;  %v2494_v17 = vcombine.low %v2399_v7, %v2400_v8  ;;  %v2508_v48 = vrot.slane %v2493_v52, %v9073_v31  ;;  %v2402_v18 = vmul.f32 %v8412_v21, %v9204_v53 }
 0x852   :  { %v8416_v15 = vpop.eup %8415  ;;  %8435 = vtanh.f32 %v2358_v26  ;;  %v2491_v47 = vcombine.low %v2483_v43, %v2490_v40  ;;  %v2403_v19 = vmul.f32 %v8414_v34, %v9211_v57  ;;  %v2522_v2 = vrot.slane %v2401_v11, %v9073_v31 }
 0x853   :  { %v8418_v59 = vpop.eup %8417  ;;  %8437 = vtanh.f32 %v2359_v12  ;;  %v2515_v27 = vrot.slane %v2494_v17, %v9073_v31  ;;  %v2523_v49 = vcombine.low %v2501_v22, %v2508_v48  ;;  %v2404_v58 = vmul.f32 %v8416_v15, %v9239_v5 }
 0x854   :  { %v8420_v24 = vpop.eup %8419  ;;  %v2640_v38 = vsel %vm1639_vm2, %v2491_v47, 0.0  ;;  %v2405_v29 = vmul.f32 %v8418_v59, %v9248_v10  ;;  %v2540_v26 = vcombine.low %v2402_v18, %v2403_v19 }
 0x855   :  { %v8422_v62 = vpop.eup %8421  ;;  %2641 = vadd.xlane.f32.xlu1 %v2640_v38  ;;  %v2524_v41 = vcombine.low %v2515_v27, %v2522_v2  ;;  %v2531_v42 = vrot.slane %v2523_v49, %v9073_v31  ;;  %v2406_v12 = vmul.f32 %v8420_v24, %v9208_v56 }
 0x856   :  { %v8424_v45 = vpop.eup %8423  ;;  %v2407_v43 = vmul.f32 %v8422_v62, %v9235_v4  ;;  %v2541_v61 = vcombine.low %v2404_v58, %v2405_v29  ;;  %v2549_v11 = vrot.slane %v2540_v26, %v9073_v31 }
 0x857   :  { %v8426_v7 = vpop.eup %8425  ;;  %v2538_v8 = vrot.slane %v2524_v41, %v9073_v31  ;;  %v2408_v52 = vmul.f32 %v8424_v45, %v9244_v9 }
 0x858   :  { %v8428_v21 = vpop.eup %8427  ;;  %v2542_v40 = vcombine.low %v2406_v12, %v2407_v43  ;;  %v2556_v34 = vrot.slane %v2541_v61, %v9073_v31  ;;  %v2409_v48 = vmul.f32 %v8426_v7, %v9204_v53 }
 0x859   :  { %v8430_v17 = vpop.eup %8429  ;;  %v2539_v22 = vcombine.low %v2531_v42, %v2538_v8  ;;  %v2410_v15 = vmul.f32 %v8428_v21, %v9211_v57  ;;  %v2570_v19 = vrot.slane %v2408_v52, %v9073_v31 }
 0x85a   :  { %v8432_v47 = vpop.eup %8431  ;;  %v2563_v18 = vrot.slane %v2542_v40, %v9073_v31  ;;  %v2571_v59 = vcombine.low %v2549_v11, %v2556_v34  ;;  %v2411_v49 = vmul.f32 %v8430_v17, %v9239_v5 }
 0x85b   :  { %v8434_v27 = vpop.eup %8433  ;;  %v2643_v2 = vsel %vm1639_vm2, %v2539_v22, 0.0  ;;  %v2412_v24 = vmul.f32 %v8432_v47, %v9248_v10  ;;  %v2588_v38 = vcombine.low %v2409_v48, %v2410_v15 }
 0x85c   :  { %v8436_v58 = vpop.eup %8435  ;;  %2644 = vadd.xlane.f32.xlu0 %v2643_v2  ;;  %v2572_v29 = vcombine.low %v2563_v18, %v2570_v19  ;;  %v2579_v26 = vrot.slane %v2571_v59, %v9073_v31  ;;  %v2413_v41 = vmul.f32 %v8434_v27, %v9208_v56 }
 0x85d   :  { %v8438_v62 = vpop.eup %8437  ;;  %v2414_v42 = vmul.f32 %v8436_v58, %v9235_v4  ;;  %v2589_v45 = vcombine.low %v2411_v49, %v2412_v24  ;;  %v2597_v7 = vrot.slane %v2588_v38, %v9073_v31 }
 0x85e   :  { %v2415_v12 = vmul.f32 %v8438_v62, %v9244_v9  ;;  %v2586_v43 = vrot.slane %v2572_v29, %v9073_v31 }
 0x85f   :  { %v2590_v61 = vcombine.low %v2413_v41, %v2414_v42  ;;  %v2604_v8 = vrot.slane %v2589_v45, %v9073_v31 }
 0x860   :  { %v2587_v52 = vcombine.low %v2579_v26, %v2586_v43  ;;  %v2618_v40 = vrot.slane %v2415_v12, %v9073_v31 }
 0x861   :  { %v2611_v21 = vrot.slane %v2590_v61, %v9073_v31  ;;  %v2619_v11 = vcombine.low %v2597_v7, %v2604_v8 }
 0x862   :  { %v2646_v34 = vsel %vm1639_vm2, %v2587_v52, 0.0 }
 0x863   :  { %v2620_v17 = vcombine.low %v2611_v21, %v2618_v40  ;;  %v2627_v22 = vrot.slane %v2619_v11, %v9073_v31  ;;  %2647 = vadd.xlane.f32.xlu0 %v2646_v34 }
 0x865   :  { %v2634_v48 = vrot.slane %v2620_v17, %v9073_v31 }
 0x867   :  { %v2635_v15 = vcombine.low %v2627_v22, %v2634_v48 }
 0x869   :  { %v2649_v47 = vsel %vm1639_vm2, %v2635_v15, 0.0 }
 0x86a   :  { %2650 = vadd.xlane.f32.xlu1 %v2649_v47 }
 0x8e2   :  { %v2642_v19 = vpop.xlane.xlu1 %2641 }
 0x8e3   :  { %v2652_v49 = vadd.f32 %v2642_v19, %v9470_v39 }
 0x8e5   :  { %v2663_v58 = vrot.slane %v2652_v49, %v9468_v36 }
 0x8e9   :  { %v2645_v18 = vpop.xlane.xlu0 %2644 }
 0x8ea   :  { %v2653_v59 = vadd.f32 %v2645_v18, %v9470_v39 }
 0x8ec   :  { %v2667_v24 = vrot.slane %v2653_v59, %v9468_v36 }
 0x8ee   :  { %v2676_v62 = vsel %vm1687_vm3, %v2667_v24, %v2663_v58 }
 0x8f0   :  { %v2648_v27 = vpop.xlane.xlu0 %2647 }
 0x8f1   :  { %v2654_v2 = vadd.f32 %v2648_v27, %v9470_v39 }
 0x8f3   :  { %v2671_v38 = vrot.slane %v2654_v2, %v9468_v36 }
 0x8f5   :  { %v2677_v41 = vsel %vm1689_vm4, %v2671_v38, %v2676_v62 }
 0x8f7   :  { %v2651_v29 = vpop.xlane.xlu1 %2650 }
 0x8f8   :  { %v2655_v26 = vadd.f32 %v2651_v29, %v9470_v39 }
 0x8fa   :  { %v2675_v42 = vrot.slane %v2655_v26, %v9468_v36 }
 0x8fc   :  { %v2678_v45 = vsel %vm1691_vm5, %v2675_v42, %v2677_v41 }
 0x8fd   :  { %v2680_v12 = vsel %vm1694_vm6, %v2678_v45, -inf }
 0x8fe   :  { %2681 = vmax.xlane.f32.xlu0 %v2680_v12 }
 0x98b   :  { %v2682_v43 = vpop.xlane.xlu0 %2681 }
 0x98c   :  { %v2687_v61 = vrot.slane %v2682_v43, %v9232_v0  ;;  %v2691_v7 = vrot.slane %v2682_v43, %v9485_v60  ;;  %v2695_v8 = vrot.slane %v2682_v43, %v9488_v54  ;;  %v2699_v52 = vrot.slane %v2682_v43, %v9493_v51 }
 0x98e   :  { %v2704_v21 = vsub.f32 %v2652_v49, %v2687_v61  ;;  %v2705_v40 = vsub.f32 %v2653_v59, %v2691_v7  ;;  %v2706_v11 = vsub.f32 %v2654_v2, %v2695_v8  ;;  %v2707_v22 = vsub.f32 %v2655_v26, %v2699_v52 }
 0x990   :  { %v2708_v34 = vmul.f32 1.442695, %v2704_v21  ;;  %v2710_v17 = vmul.f32 1.442695, %v2705_v40  ;;  %v2712_v48 = vmul.f32 1.442695, %v2706_v11 }
 0x991   :  { %v2714_v15 = vmul.f32 1.442695, %v2707_v22 }
 0x992   :  { %8439 = vpow2.f32 %v2708_v34 }
 0x993   :  { %8441 = vpow2.f32 %v2710_v17 }
 0x994   :  { %8443 = vpow2.f32 %v2712_v48 }
 0x995   :  { %8445 = vpow2.f32 %v2714_v15 }
 0x99c   :  { %v8440_v47 = vpop.eup %8439 }
 0x99d   :  { %v8442_v18 = vpop.eup %8441  ;;  %2721 = vperm.xlu1 %8294, %v8440_v47  }
 0x99e   :  { %2724 = vperm.xlu0 %8293, %v8442_v18   ;;  %v8444_v19 = vpop.eup %8443 }
 0x99f   :  { %v8446_v27 = vpop.eup %8445 }
 0x9a1   :  { %2727 = vperm.xlu1 %8294, %v8444_v19  }
 0x9a5   :  { %2730 = vperm.xlu1 %8294, %v8446_v27  }
 0xa1c   :  { %v2722_v49 = vpop.permute.xlu1 %2721 }
 0xa1d   :  { %v2725_v59 = vpop.permute.xlu0 %2724  ;;  %v2735_v38 = vrot.slane %v2722_v49, %v9468_v36 }
 0xa1e   :  { %v2739_v24 = vrot.slane %v2725_v59, %v9468_v36 }
 0xa20   :  { %v2728_v2 = vpop.permute.xlu1 %2727  ;;  %v2748_v62 = vsel %vm1687_vm3, %v2739_v24, %v2735_v38  ;;  %v11026_v24 = vld [vmem:[#allocation30_spill] sm:$0xff] }
 0xa21   :  { %v2743_v58 = vrot.slane %v2728_v2, %v9468_v36 }
 0xa23   :  { %v2749_v41 = vsel %vm1689_vm4, %v2743_v58, %v2748_v62  ;;  %v11027_v62 = vld [vmem:[#allocation31_spill] sm:$0xff] }
 0xa24   :  { %v2731_v29 = vpop.permute.xlu1 %2730 }
 0xa25   :  { %v2747_v26 = vrot.slane %v2731_v29, %v9468_v36 }
 0xa27   :  { %v2750_v42 = vsel %vm1691_vm5, %v2747_v26, %v2749_v41 }
 0xa28   :  { %v2752_v45 = vsel %vm1694_vm6, %v2750_v42, 0.0 }
 0xa29   :  { %2753 = vadd.xlane.f32.xlu0 %v2752_v45 }
 0xab6   :  { %v2754_v12 = vpop.xlane.xlu0 %2753 }
 0xab7   :  { %8447 = vrcp.f32 %v2754_v12 }
 0xac1   :  { %v8448_v43 = vpop.eup %8447 }
 0xac2   :  { %v2756_v61 = vmul.f32 %v8448_v43, %v2754_v12 }
 0xac4   :  { %v2757_v7 = vsub.f32 2.0, %v2756_v61  ;;  %v11028_v61 = vld [vmem:[#allocation32_spill] sm:$0xff] }
 0xac6   :  { %v2758_v8 = vmul.f32 %v8448_v43, %v2757_v7 }
 0xac8   :  { %v2767_v52 = vrot.slane %v2758_v8, %v9485_v60  ;;  %v2771_v40 = vrot.slane %v2758_v8, %v9488_v54  ;;  %v2763_v34 = vrot.slane %v2758_v8, %v9232_v0  ;;  %v2775_v22 = vrot.slane %v2758_v8, %v9493_v51 }
 0xaca   :  { %v2781_v21 = vmul.f32 %v8442_v18, %v2767_v52  ;;  %v2782_v11 = vmul.f32 %v8444_v19, %v2771_v40  ;;  %v2780_v17 = vmul.f32 %v8440_v47, %v2763_v34  ;;  %v2783_v48 = vmul.f32 %v8446_v27, %v2775_v22 }
 0xacc   :  { %2791 = vperm.xlu1 %8294, %v2781_v21  }
 0xad0   :  { %2796 = vperm.xlu1 %8294, %v2782_v11  }
 0xad4   :  { %2786 = vperm.xlu1 %8294, %v2780_v17  }
 0xad8   :  { %2801 = vperm.xlu1 %8294, %v2783_v48  }
 0xb4b   :  { %v2792_v15 = vpop.permute.xlu1 %2791 }
 0xb4c   :  { %v2805_v49 = vmul.f32 %v9512_v37, %v2792_v15 }
 0xb4e   :  { %v2815_v59 = vsel %vm1639_vm2, %v2805_v49, 0.0 }
 0xb4f   :  { %v2816_v2 = vrot.slane %v2815_v59, 4  ;;  %v2797_v18 = vpop.permute.xlu1 %2796 }
 0xb50   :  { %v2806_v38 = vmul.f32 %v11026_v24, %v2797_v18  ;;  %v11029_v18 = vld [vmem:[#allocation33_spill] sm:$0xff] }
 0xb51   :  { %v2817_v58 = vadd.f32 %v2816_v2, %v2815_v59 }
 0xb52   :  { %v2822_v19 = vsel %vm1639_vm2, %v2806_v38, 0.0 }
 0xb53   :  { %v2818_v29 = vrot.slane %v2817_v58, 2  ;;  %v2823_v26 = vrot.slane %v2822_v19, 4  ;;  %v2787_v47 = vpop.permute.xlu1 %2786 }
 0xb54   :  { %v2804_v41 = vmul.f32 %v11027_v62, %v2787_v47 }
 0xb55   :  { %v2819_v42 = vadd.f32 %v2818_v29, %v2817_v58  ;;  %v2824_v27 = vadd.f32 %v2823_v26, %v2822_v19 }
 0xb56   :  { %v2808_v45 = vsel %vm1639_vm2, %v2804_v41, 0.0 }
 0xb57   :  { %v2825_v12 = vrot.slane %v2824_v27, 2  ;;  %v2809_v37 = vrot.slane %v2808_v45, 4  ;;  %v2802_v43 = vpop.permute.xlu1 %2801  ;;  %v2820_v8 = vrot.slane %v2819_v42, 1 }
 0xb58   :  { %v2807_v7 = vmul.f32 %v11028_v61, %v2802_v43  ;;  %v8904_v61 = vmov 1  }
 0xb59   :  { %v2826_v52 = vadd.f32 %v2825_v12, %v2824_v27  ;;  %v2810_v21 = vadd.f32 %v2809_v37, %v2808_v45  ;;  %v2821_v22 = vadd.f32 %v2820_v8, %v2819_v42  ;;  %8295 = vset.pattern.permute.xlu0 %v8904_v61  ;;  %v11030_v8 = vld [vmem:[#allocation34_spill] sm:$0xff] }
 0xb5a   :  { %v2829_v40 = vsel %vm1639_vm2, %v2807_v7, 0.0 }
 0xb5b   :  { %v2811_v11 = vrot.slane %v2810_v21, 2  ;;  %v2830_v34 = vrot.slane %v2829_v40, 4  ;;  %v2827_v17 = vrot.slane %v2826_v52, 1  ;;  %v2837_v24 = vmul.f32 %v11029_v18, %v2821_v22 }
 0xb5d   :  { %v2812_v48 = vadd.f32 %v2811_v11, %v2810_v21  ;;  %v2831_v15 = vadd.f32 %v2830_v34, %v2829_v40  ;;  %v2828_v2 = vadd.f32 %v2827_v17, %v2826_v52  ;;  %v2844_v62 = vrot.slane %v2837_v24, 7  ;;  %v11032_v11 = vld [vmem:[#allocation35_spill] sm:$0xff]  ;;  %v11033_v17 = vld [vmem:[#allocation38_spill] sm:$0xff] }
 0xb5e   :  { %v11031_v21 = vmov 0  }
 0xb5f   :  { %v2813_v49 = vrot.slane %v2812_v48, 1  ;;  %v2832_v59 = vrot.slane %v2831_v15, 2  ;;  %v2838_v26 = vmul.f32 %v11029_v18, %v2828_v2 }
 0xb61   :  { %v2814_v38 = vadd.f32 %v2813_v49, %v2812_v48  ;;  %v2833_v58 = vadd.f32 %v2832_v59, %v2831_v15  ;;  %v2846_v27 = vrot.slane %v2838_v26, 6  ;;  %v11034_v48 = vld [vmem:[#allocation36_spill] sm:$0xff] }
 0xb63   :  { %v2834_v19 = vrot.slane %v2833_v58, 1  ;;  %v2836_v29 = vmul.f32 %v11029_v18, %v2814_v38 }
 0xb65   :  { %v2835_v47 = vadd.f32 %v2834_v19, %v2833_v58  ;;  %v2845_v42 = vsel %vm1687_vm3, %v2844_v62, %v2836_v29  ;;  %v11035_v19 = vld [vmem:[#allocation37_spill] sm:$0xff] }
 0xb66   :  { %v2847_v12 = vsel %vm1689_vm4, %v2846_v27, %v2845_v42 }
 0xb67   :  { %v2839_v41 = vmul.f32 %v11029_v18, %v2835_v47 }
 0xb69   :  { %v2848_v45 = vrot.slane %v2839_v41, 5 }
 0xb6b   :  { %v2849_v37 = vsel %vm1691_vm5, %v2848_v45, %v2847_v12  ;;  %v11036_v45 = vld [vmem:[#allocation14_spill] sm:$0xff]  ;;  %v11037_v12 = vmov 0.0  }
 0xb6c   :  { %v2851_v43 = vsel %vm1872_vm7, %v2849_v37, 0.0  ;;  %v11038_v37 = vmov 0.0|0.0  }
 0xb6d   :  { %2852 = vadd.xlane.f32.xlu1 %v2851_v43  ;;  %v11039_v43 = vld [vmem:[#allocation16_spill] sm:$0xff] }
 0xbfa   :  { %v2853_v7 = vpop.xlane.xlu1 %2852 }
 0xbfb   :  { %v2854_v52 = vadd.f32 %v2853_v7, %v11030_v8  ;;  %v11040_v7 = vld [vmem:[#allocation12_spill] sm:$0xff] }
 0xbfd   :  { %2857 = vperm.xlu0 %8295, %v2854_v52   ;;  %v11041_v52 = vld [vmem:[#allocation13_spill] sm:$0xff] }
 0xc01   :  { %8296 = vset.pattern.permute.xlu0 %v11031_v21 }
 0xc7c   :  { %v2858_v40 = vpop.permute.xlu0 %2857 }
 0xc7d   :  { %v2860_v34 = vmul.f32 %v11032_v11, %v2858_v40  ;;  %v11042_v40 = vld [vmem:[#allocation15_spill] sm:$0xff] }
 0xc7e   :  { %v11043_v11 = vld [vmem:[#allocation11_spill] sm:$0xff] }
 0xc7f   :  { %v2861_v22 = vadd.f32 %v2860_v34, %v11033_v17 }
 0xc81   :  { %v2862_v15 = vadd.f32 %v11034_v48, %v2861_v22 }
 0xc83   :  { %8449 = vtanh.f32 %v2862_v15  ;;  %v2863_v59 = vmul.f32 0.5, %v2862_v15 }
 0xc85   :  { %8451 = vtanh.f32 %v2863_v59 }
 0xc8d   :  { %v8450_v49 = vpop.eup %8449 }
 0xc8e   :  { %2870 = vrot.lane.b32.xlu1 %v8450_v49, %s8901_s4 }
 0xc8f   :  { %v8452_v2 = vpop.eup %8451 }
 0xc90   :  { %v2865_v18 = vadd.f32 1.0, %v8452_v2 }
 0xc92   :  { %v2866_v24 = vmul.f32 0.5, %v2865_v18 }
 0xc94   :  { %v2868_v29 = vmul.f32 %v2866_v24, %v11035_v19 }
 0xd00   :  { %v2871_v38 = vpop.permute.xlu1 %2870 }
 0xd01   :  { %v2873_v58 = vmul.f32 %v2871_v38, %v2866_v24 }
 0xd03   :  { %2875 = vrot.lane.b32.xlu1 %v2873_v58, %s8902_s23 }
 0xd75   :  { %v2876_v26 = vpop.permute.xlu1 %2875 }
 0xd76   :  { %v9765_v47 = vadd.f32 %v2876_v26, %v2868_v29 }
 0xd78   :  { %8453 = vtanh.f32 %v9765_v47 }
 0xd82   :  { %v8454_v62 = vpop.eup %8453 }
 0xd83   :  { %2881 = vrot.lane.b32.xlu1 %v8454_v62, %s8901_s4 }
 0xd87   :  { %2962 = vrot.lane.b32.xlu1 %v9765_v47, %s8903_s9 }
 0xdf5   :  { %v2882_v41 = vpop.permute.xlu1 %2881 }
 0xdf6   :  { %v2884_v42 = vmul.f32 %v2882_v41, %v2866_v24 }
 0xdf8   :  { %2886 = vrot.lane.b32.xlu0 %v2884_v42, %s8902_s23 }
 0xdf9   :  { %v2963_v27 = vpop.permute.xlu1 %2962 }
 0xdfa   :  { %8089 = vmatmul.mubr.msk.f32.vlgmr.msra.gmra.mrb[8].mxu0 %vm439_vm0, %v2963_v27 }
 0xdfb   :  { %8217 = vmatpush3.bf16.msra.mxu0 %v11036_v45  ;;  %8099 = vmatprep.mubr.msk.f32.mxu0 %vm8899_vm1, %v11037_v12 }
 0xdfc   :  { %8218 = vmatprep.subr.bf16.mxu0 %v11038_v37 }
 0xdff   :  { %8220 = vmatpush3.bf16.msra.mxu0 %v11039_v43 }
 0xe00   :  { %8229 = vmatprep.subr.bf16.mxu0 %v11038_v37 }
 0xe6a   :  { %v2887_v61 = vpop.permute.xlu0 %2886 }
 0xe6b   :  { %7978 = vmatmul.mubr.msk.f32.vlgmr.msra.gmra.mrb[4].mxu1 %vm439_vm0, %v2887_v61 }
 0xe6c   :  { %8210 = vmatpush1.bf16.msra.mxu1 %v11040_v7  ;;  %3920 = vmatprep.mubr.f32.mxu1 %v11037_v12 }
 0xe6d   :  { %8212 = vmatprep.subr.bf16.mxu1 %v11041_v52 }
 0xe70   :  { %8214 = vmatpush1.bf16.msra.mxu1 %v11042_v40 }
 0xe71   :  { %8222 = vmatprep.subr.bf16.mxu1 %v11043_v11 }
 0xecd   :  { %v3032_v34 = vpop.f32.mrb[8].mxu0 }
 0xece   :  { %v8090_v17 = vpop.f32.mrb[9].mxu0 }
 0xf3e   :  { %v9785_v22 = vpop.f32.mrb[4].mxu1 }
 0xf3f   :  { %v2958_v48 = vpop.f32.mrb[5].mxu1 }
 0xf40   :  { %v3036_v15 = vadd.f32 %v3032_v34, %v2958_v48 }
 0xf42   :  { %v3044_v49 = vrot.slane %v3036_v15, %v9073_v31 }
 0xf44   :  { %v3052_v59 = vrot.slane %v3044_v49, %v9073_v31  ;;  %v3045_v2 = vcombine.high %v3044_v49, %v3044_v49 }
 0xf46   :  { %v3065_v18 = vrot.slane %v3052_v59, %v9232_v0  ;;  %v3059_v24 = vrot.slane %v3045_v2, %v9073_v31  ;;  %v3060_v29 = vcombine.high %v3052_v59, %v3052_v59 }
 0xf48   :  { %v3085_v38 = vrot.slane %v3065_v18, %v9073_v31  ;;  %v3069_v58 = vrot.slane %v3059_v24, %v9232_v0  ;;  %v3078_v19 = vcombine.high %v3065_v18, %v3065_v18  ;;  %v3061_v42 = vcombine.high %v3059_v24, %v3059_v24 }
 0xf49   :  { %v3073_v34 = vrot.slane %v3060_v29, %v9232_v0 }
 0xf4a   :  { %v3093_v26 = vcombine.high %v3085_v38, %v3085_v38  ;;  %v3092_v62 = vrot.slane %v3078_v19, %v9073_v31  ;;  %v3126_v41 = vcombine.high %v3069_v58, %v3069_v58  ;;  %v3101_v27 = vrot.slane %v3085_v38, %v9073_v31 }
 0xf4b   :  { %v3133_v61 = vrot.slane %v3069_v58, %v9073_v31  ;;  %v3077_v49 = vrot.slane %v3061_v42, %v9232_v0  ;;  %v3174_v11 = vcombine.high %v3073_v34, %v3073_v34  ;;  %v3181_v38 = vrot.slane %v3073_v34, %v9073_v31  ;;  %v11044_v58 = vld [vmem:[#allocation22_spill] sm:$0xff] }
 0xf4c   :  { %v3115_v17 = vrot.slane %v3093_v26, %v9073_v31  ;;  %v3094_v48 = vcombine.high %v3092_v62, %v3092_v62  ;;  %v3140_v15 = vrot.slane %v3126_v41, %v9073_v31  ;;  %v3108_v59 = vrot.slane %v3092_v62, %v9073_v31  ;;  %v11045_v41 = vld [vmem:[#allocation23_spill] sm:$0xff]  ;;  %v11046_v34 = vld [vmem:[#allocation26_spill] sm:$0xff] }
 0xf4d   :  { %v3123_v2 = vcombine.high %v3101_v27, %v3101_v27  ;;  %v3141_v18 = vcombine.high %v3133_v61, %v3133_v61  ;;  %v3149_v24 = vrot.slane %v3133_v61, %v9073_v31  ;;  %v3298_v40 = vadd.f32 %v3101_v27, %v11044_v58 }
 0xf4e   :  { %v3125_v19 = vcombine.high %v3115_v17, %v3115_v17  ;;  %v3122_v29 = vrot.slane %v3094_v48, %v9073_v31  ;;  %v3142_v26 = vcombine.high %v3140_v15, %v3140_v15  ;;  %v3156_v52 = vrot.slane %v3140_v15, %v9073_v31 }
 0xf4f   :  { %v3299_v7 = vadd.f32 %v3115_v17, %v11045_v41  ;;  %v3124_v42 = vcombine.high %v3108_v59, %v3108_v59  ;;  %v3163_v62 = vrot.slane %v3141_v18, %v9073_v31  ;;  %v3222_v43 = vcombine.high %v3077_v49, %v3077_v49 }
 0xf50   :  { %v3300_v37 = vadd.f32 %v3123_v2, %v9293_v3  ;;  %v3188_v12 = vrot.slane %v3174_v11, %v9073_v31  ;;  %v3229_v61 = vrot.slane %v3077_v49, %v9073_v31  ;;  %v3301_v45 = vadd.f32 %v3125_v19, %v11046_v34 }
 0xf51   :  { %v3171_v27 = vcombine.high %v3149_v24, %v3149_v24  ;;  %v3189_v58 = vcombine.high %v3181_v38, %v3181_v38  ;;  %v3302_v48 = vadd.f32 %v3108_v59, %v9298_v13  ;;  %8455 = vtanh.f32 %v3298_v40 }
 0xf52   :  { %v3170_v15 = vrot.slane %v3142_v26, %v9073_v31  ;;  %v3172_v17 = vcombine.high %v3156_v52, %v3156_v52  ;;  %v3303_v41 = vadd.f32 %v3122_v29, %v9305_v23  ;;  %8457 = vtanh.f32 %v3299_v7  ;;  %v11047_v26 = vld [vmem:[#allocation17_spill] sm:$0xff] }
 0xf53   :  { %v3173_v18 = vcombine.high %v3163_v62, %v3163_v62  ;;  %v3236_v2 = vrot.slane %v3222_v43, %v9073_v31  ;;  %v3304_v11 = vadd.f32 %v3124_v42, %v9308_v28  ;;  %8459 = vtanh.f32 %v3300_v37  ;;  %v11048_v43 = vld [vmem:[#allocation18_spill] sm:$0xff]  ;;  %v11049_v42 = vld [vmem:[#allocation19_spill] sm:$0xff] }
 0xf54   :  { %v3197_v49 = vrot.slane %v3181_v38, %v9073_v31  ;;  %v3237_v19 = vcombine.high %v3229_v61, %v3229_v61  ;;  %v3305_v34 = vadd.f32 %v3149_v24, %v9311_v33  ;;  %8461 = vtanh.f32 %v3301_v45 }
 0xf55   :  { %v3190_v59 = vcombine.high %v3188_v12, %v3188_v12  ;;  %v3211_v40 = vrot.slane %v3189_v58, %v9073_v31  ;;  %v3306_v13 = vadd.f32 %v3163_v62, %v11047_v26  ;;  %8463 = vtanh.f32 %v3302_v48 }
 0xf56   :  { %v3204_v7 = vrot.slane %v3188_v12, %v9073_v31  ;;  %v3245_v29 = vrot.slane %v3229_v61, %v9073_v31  ;;  %v3307_v23 = vadd.f32 %v3171_v27, %v11048_v43  ;;  %8465 = vtanh.f32 %v3303_v41  ;;  %v11050_v61 = vld [vmem:[#allocation20_spill] sm:$0xff]  ;;  %v11051_v43 = vld [vmem:[#allocation21_spill] sm:$0xff] }
 0xf57   :  { %v3238_v37 = vcombine.high %v3236_v2, %v3236_v2  ;;  %v9825_v38 = vrot.slane %v3236_v2, %v9073_v31  ;;  %v3308_v24 = vadd.f32 %v3173_v18, %v9263_v25  ;;  %8467 = vtanh.f32 %v3304_v11 }
 0xf58   :  { %v3219_v45 = vcombine.high %v3197_v49, %v3197_v49  ;;  %v3259_v58 = vrot.slane %v3237_v19, %v9073_v31  ;;  %v3309_v62 = vadd.f32 %v3156_v52, %v11049_v42  ;;  %8469 = vtanh.f32 %v3305_v34 }
 0xf59   :  { %v3218_v12 = vrot.slane %v3190_v59, %v9073_v31  ;;  %v3221_v48 = vcombine.high %v3211_v40, %v3211_v40  ;;  %v3310_v26 = vadd.f32 %v3170_v15, %v11050_v61  ;;  %8471 = vtanh.f32 %v3306_v13  ;;  %v11052_v61 = vld [vmem:[#allocation29_spill] sm:$0xff] }
 0xf5a   :  { %v3220_v41 = vcombine.high %v3204_v7, %v3204_v7  ;;  %v3267_v27 = vcombine.high %v3245_v29, %v3245_v29  ;;  %v3311_v2 = vadd.f32 %v3172_v17, %v11051_v43  ;;  %8473 = vtanh.f32 %v3307_v23 }
 0xf5b   :  { %v8456_v33 = vpop.eup %8455  ;;  %v3266_v18 = vrot.slane %v3238_v37, %v9073_v31  ;;  %v3268_v11 = vcombine.high %v9825_v38, %v9825_v38  ;;  %v3312_v52 = vadd.f32 %v3197_v49, %v9277_v44  ;;  %8475 = vtanh.f32 %v3308_v24 }
 0xf5c   :  { %v8458_v34 = vpop.eup %8457  ;;  %v3269_v19 = vcombine.high %v3259_v58, %v3259_v58  ;;  %v3313_v59 = vadd.f32 %v3211_v40, %v9285_v55  ;;  %v3314_v13 = vadd.f32 %v3219_v45, %v9320_v50  ;;  %8477 = vtanh.f32 %v3309_v62 }
 0xf5d   :  { %v8460_v15 = vpop.eup %8459  ;;  %v3315_v17 = vadd.f32 %v3221_v48, %v11052_v61  ;;  %8479 = vtanh.f32 %v3310_v26  ;;  %v3354_v23 = vmul.f32 %v8456_v33, %v9204_v53  ;;  %v3355_v37 = vmul.f32 %v8458_v34, %v9211_v57 }
 0xf5e   :  { %v8462_v43 = vpop.eup %8461  ;;  %v3316_v42 = vadd.f32 %v3204_v7, %v9340_v30  ;;  %v3317_v49 = vadd.f32 %v3218_v12, %v9349_v32  ;;  %v3318_v24 = vadd.f32 %v3220_v41, %v9343_v20  ;;  %8481 = vtanh.f32 %v3311_v2 }
 0xf5f   :  { %v8464_v40 = vpop.eup %8463  ;;  %8483 = vtanh.f32 %v3312_v52  ;;  %v3356_v45 = vmul.f32 %v8460_v15, %v9239_v5  ;;  %v3357_v62 = vmul.f32 %v8462_v43, %v9248_v10  ;;  %v3410_v48 = vcombine.low %v3354_v23, %v3355_v37 }
 0xf60   :  { %v8466_v26 = vpop.eup %8465  ;;  %v3319_v33 = vadd.f32 %v3245_v29, %v9352_v63  ;;  %v3320_v34 = vadd.f32 %v3259_v58, %v9355_v46  ;;  %v3321_v61 = vadd.f32 %v3267_v27, %v9366_v16  ;;  %8485 = vtanh.f32 %v3313_v59 }
 0xf61   :  { %v8468_v7 = vpop.eup %8467  ;;  %8487 = vtanh.f32 %v3314_v13  ;;  %v3358_v12 = vmul.f32 %v8464_v40, %v9208_v56  ;;  %v3359_v41 = vmul.f32 %v8466_v26, %v9235_v4  ;;  %v3411_v2 = vcombine.low %v3356_v45, %v3357_v62 }
 0xf62   :  { %v8470_v52 = vpop.eup %8469  ;;  %v3322_v15 = vadd.f32 %v3269_v19, %v9315_v35  ;;  %v3323_v43 = vadd.f32 %v9825_v38, %v9324_v6  ;;  %8489 = vtanh.f32 %v3315_v17  ;;  %v3360_v29 = vmul.f32 %v8468_v7, %v9244_v9 }
 0xf63   :  { %v8472_v58 = vpop.eup %8471  ;;  %8491 = vtanh.f32 %v3316_v42  ;;  %v3412_v27 = vcombine.low %v3358_v12, %v3359_v41  ;;  %v3419_v59 = vrot.slane %v3410_v48, %v9073_v31  ;;  %v3426_v13 = vrot.slane %v3411_v2, %v9073_v31 }
 0xf64   :  { %v8474_v23 = vpop.eup %8473  ;;  %v3324_v37 = vadd.f32 %v3266_v18, %v9329_v1  ;;  %8493 = vtanh.f32 %v3317_v49  ;;  %v3361_v40 = vmul.f32 %v8470_v52, %v9204_v53  ;;  %v3362_v19 = vmul.f32 %v8472_v58, %v9211_v57 }
 0xf65   :  { %v8476_v45 = vpop.eup %8475  ;;  %8495 = vtanh.f32 %v3318_v24  ;;  %v3433_v38 = vrot.slane %v3412_v27, %v9073_v31  ;;  %v3440_v17 = vrot.slane %v3360_v29, %v9073_v31  ;;  %v3441_v42 = vcombine.low %v3419_v59, %v3426_v13 }
 0xf66   :  { %v8478_v62 = vpop.eup %8477  ;;  %8497 = vtanh.f32 %v3319_v33  ;;  %v3363_v48 = vmul.f32 %v8474_v23, %v9239_v5  ;;  %v3364_v26 = vmul.f32 %v8476_v45, %v9248_v10  ;;  %v3458_v7 = vcombine.low %v3361_v40, %v3362_v19 }
 0xf67   :  { %v8480_v18 = vpop.eup %8479  ;;  %v3325_v49 = vadd.f32 %v3268_v11, %v9334_v14  ;;  %8499 = vtanh.f32 %v3320_v34  ;;  %v3442_v12 = vcombine.low %v3433_v38, %v3440_v17  ;;  %v3449_v41 = vrot.slane %v3441_v42, %v9073_v31 }
 0xf68   :  { %v8482_v24 = vpop.eup %8481  ;;  %8501 = vtanh.f32 %v3321_v61  ;;  %v3365_v2 = vmul.f32 %v8478_v62, %v9208_v56  ;;  %v3366_v52 = vmul.f32 %v8480_v18, %v9235_v4  ;;  %v3459_v29 = vcombine.low %v3363_v48, %v3364_v26 }
 0xf69   :  { %v8484_v33 = vpop.eup %8483  ;;  %8503 = vtanh.f32 %v3322_v15  ;;  %v3456_v58 = vrot.slane %v3442_v12, %v9073_v31  ;;  %v3367_v27 = vmul.f32 %v8482_v24, %v9244_v9  ;;  %v3467_v34 = vrot.slane %v3458_v7, %v9073_v31 }
 0xf6a   :  { %v8486_v59 = vpop.eup %8485  ;;  %8505 = vtanh.f32 %v3323_v43  ;;  %v3460_v11 = vcombine.low %v3365_v2, %v3366_v52  ;;  %v3474_v13 = vrot.slane %v3459_v29, %v9073_v31  ;;  %v3368_v40 = vmul.f32 %v8484_v33, %v9204_v53 }
 0xf6b   :  { %v8488_v23 = vpop.eup %8487  ;;  %8507 = vtanh.f32 %v3324_v37  ;;  %v3457_v61 = vcombine.low %v3449_v41, %v3456_v58  ;;  %v3369_v19 = vmul.f32 %v8486_v59, %v9211_v57  ;;  %v3488_v38 = vrot.slane %v3367_v27, %v9073_v31 }
 0xf6c   :  { %v8490_v45 = vpop.eup %8489  ;;  %8509 = vtanh.f32 %v3325_v49  ;;  %v3481_v15 = vrot.slane %v3460_v11, %v9073_v31  ;;  %v3489_v17 = vcombine.low %v3467_v34, %v3474_v13  ;;  %v3370_v62 = vmul.f32 %v8488_v23, %v9239_v5 }
 0xf6d   :  { %v8492_v43 = vpop.eup %8491  ;;  %v3606_v42 = vsel %vm1639_vm2, %v3457_v61, 0.0  ;;  %v3371_v48 = vmul.f32 %v8490_v45, %v9248_v10  ;;  %v3506_v37 = vcombine.low %v3368_v40, %v3369_v19 }
 0xf6e   :  { %v8494_v26 = vpop.eup %8493  ;;  %3607 = vadd.xlane.f32.xlu0 %v3606_v42  ;;  %v3490_v7 = vcombine.low %v3481_v15, %v3488_v38  ;;  %v3497_v18 = vrot.slane %v3489_v17, %v9073_v31  ;;  %v3372_v49 = vmul.f32 %v8492_v43, %v9208_v56 }
 0xf6f   :  { %v8496_v12 = vpop.eup %8495  ;;  %v3373_v41 = vmul.f32 %v8494_v26, %v9235_v4  ;;  %v3507_v24 = vcombine.low %v3370_v62, %v3371_v48  ;;  %v3515_v27 = vrot.slane %v3506_v37, %v9073_v31 }
 0xf70   :  { %v8498_v2 = vpop.eup %8497  ;;  %v3504_v52 = vrot.slane %v3490_v7, %v9073_v31  ;;  %v3374_v29 = vmul.f32 %v8496_v12, %v9244_v9 }
 0xf71   :  { %v8500_v33 = vpop.eup %8499  ;;  %v3508_v58 = vcombine.low %v3372_v49, %v3373_v41  ;;  %v3522_v59 = vrot.slane %v3507_v24, %v9073_v31  ;;  %v3375_v13 = vmul.f32 %v8498_v2, %v9204_v53 }
 0xf72   :  { %v8502_v11 = vpop.eup %8501  ;;  %v3505_v34 = vcombine.low %v3497_v18, %v3504_v52  ;;  %v3376_v23 = vmul.f32 %v8500_v33, %v9211_v57  ;;  %v3536_v19 = vrot.slane %v3374_v29, %v9073_v31 }
 0xf73   :  { %v8504_v61 = vpop.eup %8503  ;;  %v3529_v40 = vrot.slane %v3508_v58, %v9073_v31  ;;  %v3537_v45 = vcombine.low %v3515_v27, %v3522_v59  ;;  %v3377_v17 = vmul.f32 %v8502_v11, %v9239_v5 }
 0xf74   :  { %v8506_v15 = vpop.eup %8505  ;;  %v3609_v38 = vsel %vm1639_vm2, %v3505_v34, 0.0  ;;  %v3378_v43 = vmul.f32 %v8504_v61, %v9248_v10  ;;  %v3554_v42 = vcombine.low %v3375_v13, %v3376_v23 }
 0xf75   :  { %v8508_v62 = vpop.eup %8507  ;;  %3610 = vadd.xlane.f32.xlu1 %v3609_v38  ;;  %v3538_v48 = vcombine.low %v3529_v40, %v3536_v19  ;;  %v3545_v37 = vrot.slane %v3537_v45, %v9073_v31  ;;  %v3379_v7 = vmul.f32 %v8506_v15, %v9208_v56 }
 0xf76   :  { %v8510_v26 = vpop.eup %8509  ;;  %v3380_v18 = vmul.f32 %v8508_v62, %v9235_v4  ;;  %v3555_v12 = vcombine.low %v3377_v17, %v3378_v43  ;;  %v3563_v2 = vrot.slane %v3554_v42, %v9073_v31 }
 0xf77   :  { %v3552_v49 = vrot.slane %v3538_v48, %v9073_v31  ;;  %v3381_v41 = vmul.f32 %v8510_v26, %v9244_v9 }
 0xf78   :  { %v3556_v24 = vcombine.low %v3379_v7, %v3380_v18  ;;  %v3570_v52 = vrot.slane %v3555_v12, %v9073_v31 }
 0xf79   :  { %v3553_v29 = vcombine.low %v3545_v37, %v3552_v49  ;;  %v3584_v58 = vrot.slane %v3381_v41, %v9073_v31 }
 0xf7a   :  { %v3577_v33 = vrot.slane %v3556_v24, %v9073_v31  ;;  %v3585_v27 = vcombine.low %v3563_v2, %v3570_v52 }
 0xf7b   :  { %v3612_v59 = vsel %vm1639_vm2, %v3553_v29, 0.0 }
 0xf7c   :  { %3613 = vadd.xlane.f32.xlu0 %v3612_v59  ;;  %v3586_v11 = vcombine.low %v3577_v33, %v3584_v58  ;;  %v3593_v34 = vrot.slane %v3585_v27, %v9073_v31 }
 0xf7e   :  { %v3600_v13 = vrot.slane %v3586_v11, %v9073_v31 }
 0xf80   :  { %v3601_v23 = vcombine.low %v3593_v34, %v3600_v13 }
 0xf82   :  { %v3615_v61 = vsel %vm1639_vm2, %v3601_v23, 0.0 }
 0xf83   :  { %3616 = vadd.xlane.f32.xlu0 %v3615_v61 }
 0xffb   :  { %v3608_v40 = vpop.xlane.xlu0 %3607 }
 0xffc   :  { %v3618_v38 = vadd.f32 %v3608_v40, %v9470_v39 }
 0xffe   :  { %v3629_v42 = vrot.slane %v3618_v38, %v9468_v36 }
0x1002   :  { %v3611_v19 = vpop.xlane.xlu1 %3610 }
0x1003   :  { %v3619_v45 = vadd.f32 %v3611_v19, %v9470_v39 }
0x1005   :  { %v3633_v43 = vrot.slane %v3619_v45, %v9468_v36 }
0x1007   :  { %v3642_v26 = vsel %vm1687_vm3, %v3633_v43, %v3629_v42 }
0x1009   :  { %v3614_v15 = vpop.xlane.xlu0 %3613 }
0x100a   :  { %v3620_v17 = vadd.f32 %v3614_v15, %v9470_v39 }
0x100c   :  { %v3637_v62 = vrot.slane %v3620_v17, %v9468_v36 }
0x100e   :  { %v3643_v18 = vsel %vm1689_vm4, %v3637_v62, %v3642_v26 }
0x1010   :  { %v3617_v48 = vpop.xlane.xlu0 %3616 }
0x1011   :  { %v3621_v37 = vadd.f32 %v3617_v48, %v9470_v39 }
0x1013   :  { %v3641_v7 = vrot.slane %v3621_v37, %v9468_v36 }
0x1015   :  { %v3644_v12 = vsel %vm1691_vm5, %v3641_v7, %v3643_v18 }
0x1016   :  { %v3646_v49 = vsel %vm1694_vm6, %v3644_v12, -inf }
0x1017   :  { %3647 = vmax.xlane.f32.xlu0 %v3646_v49 }
0x10a4   :  { %v3648_v41 = vpop.xlane.xlu0 %3647 }
0x10a5   :  { %v3653_v24 = vrot.slane %v3648_v41, %v9232_v0  ;;  %v3657_v2 = vrot.slane %v3648_v41, %v9485_v60  ;;  %v3661_v52 = vrot.slane %v3648_v41, %v9488_v54  ;;  %v3665_v29 = vrot.slane %v3648_v41, %v9493_v51 }
0x10a7   :  { %v3670_v33 = vsub.f32 %v3618_v38, %v3653_v24  ;;  %v3671_v58 = vsub.f32 %v3619_v45, %v3657_v2  ;;  %v3672_v27 = vsub.f32 %v3620_v17, %v3661_v52  ;;  %v3673_v34 = vsub.f32 %v3621_v37, %v3665_v29 }
0x10a9   :  { %v3674_v59 = vmul.f32 1.442695, %v3670_v33  ;;  %v3676_v11 = vmul.f32 1.442695, %v3671_v58  ;;  %v3678_v13 = vmul.f32 1.442695, %v3672_v27 }
0x10aa   :  { %v3680_v23 = vmul.f32 1.442695, %v3673_v34 }
0x10ab   :  { %8511 = vpow2.f32 %v3674_v59 }
0x10ac   :  { %8513 = vpow2.f32 %v3676_v11 }
0x10ad   :  { %8515 = vpow2.f32 %v3678_v13 }
0x10ae   :  { %8517 = vpow2.f32 %v3680_v23 }
0x10b5   :  { %v8512_v61 = vpop.eup %8511 }
0x10b6   :  { %v8514_v40 = vpop.eup %8513  ;;  %3687 = vperm.xlu1 %8294, %v8512_v61  }
0x10b7   :  { %3690 = vperm.xlu0 %8296, %v8514_v40   ;;  %v8516_v19 = vpop.eup %8515 }
0x10b8   :  { %v8518_v15 = vpop.eup %8517 }
0x10ba   :  { %3693 = vperm.xlu1 %8294, %v8516_v19  }
0x10be   :  { %3696 = vperm.xlu1 %8294, %v8518_v15  }
0x1135   :  { %v3688_v38 = vpop.permute.xlu1 %3687 }
0x1136   :  { %v3691_v45 = vpop.permute.xlu0 %3690  ;;  %v3701_v42 = vrot.slane %v3688_v38, %v9468_v36  ;;  %v9938_v38 = vld [vmem:[%s10983_s30 + $0x8] sm:$0x7f] }
0x1137   :  { %v3705_v43 = vrot.slane %v3691_v45, %v9468_v36 }
0x1139   :  { %v3694_v17 = vpop.permute.xlu1 %3693  ;;  %v3714_v26 = vsel %vm1687_vm3, %v3705_v43, %v3701_v42 }
0x113a   :  { %v3709_v62 = vrot.slane %v3694_v17, %v9468_v36 }
0x113c   :  { %v3715_v7 = vsel %vm1689_vm4, %v3709_v62, %v3714_v26  ;;  %v9952_v26 = vld [vmem:[%s10983_s30] sm:$0x7f] }
0x113d   :  { %v3697_v48 = vpop.permute.xlu1 %3696 }
0x113e   :  { %v3713_v37 = vrot.slane %v3697_v48, %v9468_v36 }
0x1140   :  { %v3716_v18 = vsel %vm1691_vm5, %v3713_v37, %v3715_v7 }
0x1141   :  { %v3718_v12 = vsel %vm1694_vm6, %v3716_v18, 0.0 }
0x1142   :  { %3719 = vadd.xlane.f32.xlu1 %v3718_v12 }
0x11cf   :  { %v3720_v49 = vpop.xlane.xlu1 %3719 }
0x11d0   :  { %8519 = vrcp.f32 %v3720_v49 }
0x11da   :  { %v8520_v41 = vpop.eup %8519 }
0x11db   :  { %v3722_v24 = vmul.f32 %v8520_v41, %v3720_v49 }
0x11dd   :  { %v3723_v2 = vsub.f32 2.0, %v3722_v24 }
0x11df   :  { %v3724_v52 = vmul.f32 %v8520_v41, %v3723_v2 }
0x11e1   :  { %v3733_v29 = vrot.slane %v3724_v52, %v9485_v60  ;;  %v3737_v58 = vrot.slane %v3724_v52, %v9488_v54  ;;  %v3729_v59 = vrot.slane %v3724_v52, %v9232_v0  ;;  %v3741_v34 = vrot.slane %v3724_v52, %v9493_v51  ;;  %v9959_v52 = vld [vmem:[%s10983_s30 + $0x18] sm:$0x7f] }
0x11e3   :  { %v3747_v33 = vmul.f32 %v8514_v40, %v3733_v29  ;;  %v3748_v27 = vmul.f32 %v8516_v19, %v3737_v58  ;;  %v3746_v11 = vmul.f32 %v8512_v61, %v3729_v59  ;;  %v3749_v13 = vmul.f32 %v8518_v15, %v3741_v34  ;;  %v9945_v61 = vld [vmem:[%s10983_s30 + $0x10] sm:$0x7f] }
0x11e5   :  { %3757 = vperm.xlu0 %8296, %v3747_v33  }
0x11e9   :  { %3762 = vperm.xlu0 %8296, %v3748_v27  }
0x11ed   :  { %3752 = vperm.xlu0 %8296, %v3746_v11  }
0x11f1   :  { %3767 = vperm.xlu0 %8296, %v3749_v13  }
0x1264   :  { %v3758_v23 = vpop.permute.xlu0 %3757 }
0x1265   :  { %v3771_v40 = vmul.f32 %v9938_v38, %v3758_v23 }
0x1267   :  { %v3781_v45 = vsel %vm1639_vm2, %v3771_v40, 0.0 }
0x1268   :  { %v3782_v19 = vrot.slane %v3781_v45, 4  ;;  %v3763_v17 = vpop.permute.xlu0 %3762 }
0x1269   :  { %v3772_v15 = vmul.f32 %v9945_v61, %v3763_v17 }
0x126a   :  { %v3783_v43 = vadd.f32 %v3782_v19, %v3781_v45 }
0x126b   :  { %v3788_v42 = vsel %vm1639_vm2, %v3772_v15, 0.0 }
0x126c   :  { %v3784_v62 = vrot.slane %v3783_v43, 2  ;;  %v3789_v48 = vrot.slane %v3788_v42, 4  ;;  %v3753_v37 = vpop.permute.xlu0 %3752 }
0x126d   :  { %v3770_v7 = vmul.f32 %v9952_v26, %v3753_v37 }
0x126e   :  { %v3785_v18 = vadd.f32 %v3784_v62, %v3783_v43  ;;  %v3790_v12 = vadd.f32 %v3789_v48, %v3788_v42  ;;  %v9966_v43 = vld [vmem:[%s10890_s8] ss:$0 sm:$0xff] }
0x126f   :  { %v3774_v49 = vsel %vm1639_vm2, %v3770_v7, 0.0 }
0x1270   :  { %v3791_v41 = vrot.slane %v3790_v12, 2  ;;  %v3775_v24 = vrot.slane %v3774_v49, 4  ;;  %v3768_v2 = vpop.permute.xlu0 %3767  ;;  %v3786_v33 = vrot.slane %v3785_v18, 1 }
0x1271   :  { %v3773_v29 = vmul.f32 %v9959_v52, %v3768_v2 }
0x1272   :  { %v3792_v58 = vadd.f32 %v3791_v41, %v3790_v12  ;;  %v3776_v27 = vadd.f32 %v3775_v24, %v3774_v49  ;;  %v3787_v23 = vadd.f32 %v3786_v33, %v3785_v18 }
0x1273   :  { %v3795_v59 = vsel %vm1639_vm2, %v3773_v29, 0.0 }
0x1274   :  { %v3777_v11 = vrot.slane %v3776_v27, 2  ;;  %v3796_v34 = vrot.slane %v3795_v59, 4  ;;  %v3793_v13 = vrot.slane %v3792_v58, 1  ;;  %v3803_v42 = vmul.f32 %v9966_v43, %v3787_v23  ;;  %v9981_v23 = vld [vmem:[%s10891_s11] ss:$0 sm:$0xff] }
0x1275   :  { %11053 = vst [vmem:[#allocation30_spill] sm:$0xff] %v9981_v23 }
0x1276   :  { %v3778_v40 = vadd.f32 %v3777_v11, %v3776_v27  ;;  %v3797_v45 = vadd.f32 %v3796_v34, %v3795_v59  ;;  %v3794_v15 = vadd.f32 %v3793_v13, %v3792_v58  ;;  %v3810_v18 = vrot.slane %v3803_v42, 7 }
0x1277   :  { %v8905_v59 = vmov 2  }
0x1278   :  { %v3779_v19 = vrot.slane %v3778_v40, 1  ;;  %v3798_v17 = vrot.slane %v3797_v45, 2  ;;  %v3804_v12 = vmul.f32 %v9966_v43, %v3794_v15  ;;  %8297 = vset.pattern.permute.xlu0 %v8905_v59 }
0x127a   :  { %v3780_v62 = vadd.f32 %v3779_v19, %v3778_v40  ;;  %v3799_v48 = vadd.f32 %v3798_v17, %v3797_v45  ;;  %v3812_v2 = vrot.slane %v3804_v12, 6  ;;  %v9988_v19 = vld [vmem:[%s10892_s12] ss:$0 sm:$0xff] }
0x127b   :  { %11054 = vst [vmem:[#allocation31_spill] sm:$0xff] %v9988_v19 }
0x127c   :  { %v3802_v37 = vmul.f32 %v9966_v43, %v3780_v62  ;;  %v3800_v7 = vrot.slane %v3799_v48, 1 }
0x127e   :  { %v3801_v49 = vadd.f32 %v3800_v7, %v3799_v48  ;;  %v3811_v24 = vsel %vm1687_vm3, %v3810_v18, %v3802_v37 }
0x127f   :  { %v3813_v33 = vsel %vm1689_vm4, %v3812_v2, %v3811_v24  ;;  %v11056_v2 = vld [vmem:[#allocation14_spill] sm:$0xff] }
0x1280   :  { %v3805_v41 = vmul.f32 %v9966_v43, %v3801_v49 }
0x1282   :  { %v3814_v29 = vrot.slane %v3805_v41, 5 }
0x1284   :  { %v3815_v58 = vsel %vm1691_vm5, %v3814_v29, %v3813_v33  ;;  %v11057_v29 = vmov 0.0   ;;  %v11059_v33 = vld [vmem:[#allocation16_spill] sm:$0xff] }
0x1285   :  { %v3817_v27 = vsel %vm1872_vm7, %v3815_v58, 0.0 }
0x1286   :  { %3818 = vadd.xlane.f32.xlu1 %v3817_v27 }
0x1313   :  { %v3819_v11 = vpop.xlane.xlu1 %3818 }
0x1314   :  { %v3820_v34 = vadd.f32 %v3819_v11, %v11030_v8  ;;  %v11060_v11 = vld [vmem:[#allocation12_spill] sm:$0xff] }
0x1316   :  { %3823 = vperm.xlu0 %8297, %v3820_v34   ;;  %v11061_v34 = vld [vmem:[#allocation13_spill] sm:$0xff] }
0x131a   :  { %8298 = vset.pattern.permute.xlu0 %v11031_v21 }
0x1395   :  { %v3824_v13 = vpop.permute.xlu0 %3823 }
0x1396   :  { %v3826_v40 = vmul.f32 %v9981_v23, %v3824_v13  ;;  %v11062_v13 = vld [vmem:[#allocation15_spill] sm:$0xff] }
0x1398   :  { %v3827_v45 = vadd.f32 %v3826_v40, %v9785_v22  ;;  %v11063_v40 = vld [vmem:[#allocation11_spill] sm:$0xff] }
0x139a   :  { %v3828_v17 = vadd.f32 %v9988_v19, %v3827_v45 }
0x139c   :  { %8521 = vtanh.f32 %v3828_v17  ;;  %v3829_v42 = vmul.f32 0.5, %v3828_v17 }
0x139e   :  { %8523 = vtanh.f32 %v3829_v42 }
0x13a6   :  { %v8522_v15 = vpop.eup %8521 }
0x13a7   :  { %3836 = vrot.lane.b32.xlu1 %v8522_v15, %s8901_s4 }
0x13a8   :  { %v8524_v62 = vpop.eup %8523 }
0x13a9   :  { %v3831_v48 = vadd.f32 1.0, %v8524_v62 }
0x13ab   :  { %v3832_v37 = vmul.f32 0.5, %v3831_v48 }
0x13ad   :  { %v3834_v22 = vmul.f32 %v3832_v37, %v9765_v47  ;;  %v11058_v47 = vmov 0.0|0.0  }
0x1419   :  { %v3837_v7 = vpop.permute.xlu1 %3836 }
0x141a   :  { %v3839_v12 = vmul.f32 %v3837_v7, %v3832_v37 }
0x141c   :  { %3841 = vrot.lane.b32.xlu0 %v3839_v12, %s8902_s23 }
0x148e   :  { %v3842_v18 = vpop.permute.xlu0 %3841 }
0x148f   :  { %v9994_v49 = vadd.f32 %v3842_v18, %v3834_v22 }
0x1491   :  { %11055 = vst [vmem:[#allocation32_spill] sm:$0xff] %v9994_v49  ;;  %8525 = vtanh.f32 %v9994_v49  ;;  %3928 = vrot.lane.b32.xlu1 %v9994_v49, %s8903_s9 }
0x149b   :  { %v8526_v41 = vpop.eup %8525 }
0x149c   :  { %3847 = vrot.lane.b32.xlu0 %v8526_v41, %s8901_s4 }
0x1503   :  { %v3929_v24 = vpop.permute.xlu1 %3928 }
0x1504   :  { %8100 = vmatmul.mubr.msk.f32.vlgmr.msra.gmra.mrb[10].mxu0 %vm439_vm0, %v3929_v24 }
0x1505   :  { %8231 = vmatpush3.bf16.msra.mxu0 %v11056_v2  ;;  %8110 = vmatprep.mubr.msk.f32.mxu0 %vm8899_vm1, %v11057_v29 }
0x1506   :  { %8232 = vmatprep.subr.bf16.mxu0 %v11058_v47 }
0x1509   :  { %8234 = vmatpush3.bf16.msra.mxu0 %v11059_v33 }
0x150a   :  { %8243 = vmatprep.subr.bf16.mxu0 %v11058_v47 }
0x150e   :  { %v3848_v58 = vpop.permute.xlu0 %3847 }
0x150f   :  { %v3850_v27 = vmul.f32 %v3848_v58, %v3832_v37 }
0x1511   :  { %3852 = vrot.lane.b32.xlu0 %v3850_v27, %s8902_s23 }
0x1583   :  { %v3853_v59 = vpop.permute.xlu0 %3852 }
0x1584   :  { %7980 = vmatmul.mubr.msk.f32.vlgmr.msra.gmra.mrb[6].mxu1 %vm439_vm0, %v3853_v59 }
0x1585   :  { %8224 = vmatpush1.bf16.msra.mxu1 %v11060_v11  ;;  %4886 = vmatprep.mubr.f32.mxu1 %v11057_v29 }
0x1586   :  { %8226 = vmatprep.subr.bf16.mxu1 %v11061_v34 }
0x1589   :  { %8228 = vmatpush1.bf16.msra.mxu1 %v11062_v13 }
0x158a   :  { %8236 = vmatprep.subr.bf16.mxu1 %v11063_v40 }
0x15d7   :  { %v3998_v45 = vpop.f32.mrb[10].mxu0 }
0x15d8   :  { %v8101_v17 = vpop.f32.mrb[11].mxu0 }
0x1657   :  { %v10014_v15 = vpop.f32.mrb[6].mxu1 }
0x1658   :  { %11064 = vst [vmem:[#allocation33_spill] sm:$0xff] %v10014_v15  ;;  %v3924_v42 = vpop.f32.mrb[7].mxu1 }
0x1659   :  { %v4002_v62 = vadd.f32 %v3998_v45, %v3924_v42 }
0x165b   :  { %v4010_v48 = vrot.slane %v4002_v62, %v9073_v31 }
0x165d   :  { %v4018_v37 = vrot.slane %v4010_v48, %v9073_v31  ;;  %v4011_v7 = vcombine.high %v4010_v48, %v4010_v48 }
0x165f   :  { %v4031_v12 = vrot.slane %v4018_v37, %v9232_v0  ;;  %v4025_v22 = vrot.slane %v4011_v7, %v9073_v31  ;;  %v4026_v58 = vcombine.high %v4018_v37, %v4018_v37 }
0x1661   :  { %v4051_v18 = vrot.slane %v4031_v12, %v9073_v31  ;;  %v4035_v41 = vrot.slane %v4025_v22, %v9232_v0  ;;  %v4044_v24 = vcombine.high %v4031_v12, %v4031_v12  ;;  %v4027_v45 = vcombine.high %v4025_v22, %v4025_v22 }
0x1662   :  { %v4039_v48 = vrot.slane %v4026_v58, %v9232_v0 }
0x1663   :  { %v4059_v27 = vcombine.high %v4051_v18, %v4051_v18  ;;  %v4058_v59 = vrot.slane %v4044_v24, %v9073_v31  ;;  %v4092_v17 = vcombine.high %v4035_v41, %v4035_v41  ;;  %v4067_v42 = vrot.slane %v4051_v18, %v9073_v31 }
0x1664   :  { %v4099_v62 = vrot.slane %v4035_v41, %v9073_v31  ;;  %v4043_v34 = vrot.slane %v4027_v45, %v9232_v0  ;;  %v4140_v33 = vcombine.high %v4039_v48, %v4039_v48  ;;  %v4147_v18 = vrot.slane %v4039_v48, %v9073_v31  ;;  %v11065_v41 = vld [vmem:[#allocation22_spill] sm:$0xff] }
0x1665   :  { %v4081_v40 = vrot.slane %v4059_v27, %v9073_v31  ;;  %v4060_v7 = vcombine.high %v4058_v59, %v4058_v59  ;;  %v4106_v13 = vrot.slane %v4092_v17, %v9073_v31  ;;  %v4074_v37 = vrot.slane %v4058_v59, %v9073_v31  ;;  %v11066_v17 = vld [vmem:[#allocation23_spill] sm:$0xff]  ;;  %v11067_v48 = vld [vmem:[#allocation26_spill] sm:$0xff] }
0x1666   :  { %v4089_v12 = vcombine.high %v4067_v42, %v4067_v42  ;;  %v4107_v11 = vcombine.high %v4099_v62, %v4099_v62  ;;  %v4115_v22 = vrot.slane %v4099_v62, %v9073_v31  ;;  %v4264_v47 = vadd.f32 %v4067_v42, %v11065_v41 }
0x1667   :  { %v4091_v24 = vcombine.high %v4081_v40, %v4081_v40  ;;  %v4088_v58 = vrot.slane %v4060_v7, %v9073_v31  ;;  %v4108_v27 = vcombine.high %v4106_v13, %v4106_v13  ;;  %v4122_v29 = vrot.slane %v4106_v13, %v9073_v31  ;;  %v11068_v7 = vld [vmem:[#allocation25_spill] sm:$0xff] }
0x1668   :  { %v4265_v2 = vadd.f32 %v4081_v40, %v11066_v17  ;;  %v4090_v45 = vcombine.high %v4074_v37, %v4074_v37  ;;  %v4129_v59 = vrot.slane %v4107_v11, %v9073_v31  ;;  %v4188_v49 = vcombine.high %v4043_v34, %v4043_v34  ;;  %v11069_v17 = vld [vmem:[#allocation27_spill] sm:$0xff] }
0x1669   :  { %v4266_v19 = vadd.f32 %v4089_v12, %v9293_v3  ;;  %v4154_v15 = vrot.slane %v4140_v33, %v9073_v31  ;;  %v4195_v62 = vrot.slane %v4043_v34, %v9073_v31  ;;  %v4267_v23 = vadd.f32 %v4091_v24, %v11067_v48  ;;  %v11070_v48 = vld [vmem:[#allocation28_spill] sm:$0xff] }
0x166a   :  { %v4137_v42 = vcombine.high %v4115_v22, %v4115_v22  ;;  %v4155_v41 = vcombine.high %v4147_v18, %v4147_v18  ;;  %v4268_v21 = vadd.f32 %v4074_v37, %v11068_v7  ;;  %8527 = vtanh.f32 %v4264_v47 }
0x166b   :  { %v4136_v13 = vrot.slane %v4108_v27, %v9073_v31  ;;  %v4138_v40 = vcombine.high %v4122_v29, %v4122_v29  ;;  %v4269_v8 = vadd.f32 %v4088_v58, %v11069_v17  ;;  %8529 = vtanh.f32 %v4265_v2  ;;  %v11071_v27 = vld [vmem:[#allocation17_spill] sm:$0xff] }
0x166c   :  { %v4139_v11 = vcombine.high %v4129_v59, %v4129_v59  ;;  %v4202_v12 = vrot.slane %v4188_v49, %v9073_v31  ;;  %v4270_v33 = vadd.f32 %v4090_v45, %v9308_v28  ;;  %8531 = vtanh.f32 %v4266_v19  ;;  %v11072_v49 = vld [vmem:[#allocation18_spill] sm:$0xff]  ;;  %v11073_v45 = vld [vmem:[#allocation19_spill] sm:$0xff] }
0x166d   :  { %v4163_v34 = vrot.slane %v4147_v18, %v9073_v31  ;;  %v4203_v24 = vcombine.high %v4195_v62, %v4195_v62  ;;  %v4271_v3 = vadd.f32 %v4115_v22, %v11070_v48  ;;  %8533 = vtanh.f32 %v4267_v23 }
0x166e   :  { %v4156_v37 = vcombine.high %v4154_v15, %v4154_v15  ;;  %v4177_v47 = vrot.slane %v4155_v41, %v9073_v31  ;;  %v4272_v7 = vadd.f32 %v4129_v59, %v11071_v27  ;;  %8535 = vtanh.f32 %v4268_v21 }
0x166f   :  { %v4170_v2 = vrot.slane %v4154_v15, %v9073_v31  ;;  %v4211_v58 = vrot.slane %v4195_v62, %v9073_v31  ;;  %v4273_v17 = vadd.f32 %v4137_v42, %v11072_v49  ;;  %8537 = vtanh.f32 %v4269_v8  ;;  %v11074_v62 = vld [vmem:[#allocation20_spill] sm:$0xff]  ;;  %v11075_v49 = vld [vmem:[#allocation21_spill] sm:$0xff] }
0x1670   :  { %v4204_v19 = vcombine.high %v4202_v12, %v4202_v12  ;;  %v10054_v18 = vrot.slane %v4202_v12, %v9073_v31  ;;  %v4274_v22 = vadd.f32 %v4139_v11, %v9263_v25  ;;  %8539 = vtanh.f32 %v4270_v33 }
0x1671   :  { %v4185_v23 = vcombine.high %v4163_v34, %v4163_v34  ;;  %v4225_v41 = vrot.slane %v4203_v24, %v9073_v31  ;;  %v4275_v59 = vadd.f32 %v4122_v29, %v11073_v45  ;;  %8541 = vtanh.f32 %v4271_v3 }
0x1672   :  { %v4184_v21 = vrot.slane %v4156_v37, %v9073_v31  ;;  %v4187_v15 = vcombine.high %v4177_v47, %v4177_v47  ;;  %v4276_v27 = vadd.f32 %v4136_v13, %v11074_v62  ;;  %8543 = vtanh.f32 %v4272_v7  ;;  %v11076_v62 = vld [vmem:[#allocation29_spill] sm:$0xff] }
0x1673   :  { %v4186_v8 = vcombine.high %v4170_v2, %v4170_v2  ;;  %v4233_v42 = vcombine.high %v4211_v58, %v4211_v58  ;;  %v4277_v12 = vadd.f32 %v4138_v40, %v11075_v49  ;;  %8545 = vtanh.f32 %v4273_v17 }
0x1674   :  { %v8528_v48 = vpop.eup %8527  ;;  %v4232_v11 = vrot.slane %v4204_v19, %v9073_v31  ;;  %v4234_v33 = vcombine.high %v10054_v18, %v10054_v18  ;;  %v4278_v29 = vadd.f32 %v4163_v34, %v9277_v44  ;;  %8547 = vtanh.f32 %v4274_v22 }
0x1675   :  { %v8530_v3 = vpop.eup %8529  ;;  %v4235_v24 = vcombine.high %v4225_v41, %v4225_v41  ;;  %v4279_v37 = vadd.f32 %v4177_v47, %v9285_v55  ;;  %v4280_v7 = vadd.f32 %v4185_v23, %v9320_v50  ;;  %8549 = vtanh.f32 %v4275_v59 }
0x1676   :  { %v8532_v13 = vpop.eup %8531  ;;  %v4281_v40 = vadd.f32 %v4187_v15, %v11076_v62  ;;  %8551 = vtanh.f32 %v4276_v27  ;;  %v4320_v17 = vmul.f32 %v8528_v48, %v9204_v53  ;;  %v4321_v19 = vmul.f32 %v8530_v3, %v9211_v57 }
0x1677   :  { %v8534_v49 = vpop.eup %8533  ;;  %v4282_v45 = vadd.f32 %v4170_v2, %v9340_v30  ;;  %v4283_v34 = vadd.f32 %v4184_v21, %v9349_v32  ;;  %v4284_v22 = vadd.f32 %v4186_v8, %v9343_v20  ;;  %8553 = vtanh.f32 %v4277_v12 }
0x1678   :  { %v8536_v47 = vpop.eup %8535  ;;  %8555 = vtanh.f32 %v4278_v29  ;;  %v4322_v23 = vmul.f32 %v8532_v13, %v9239_v5  ;;  %v4323_v59 = vmul.f32 %v8534_v49, %v9248_v10  ;;  %v4376_v15 = vcombine.low %v4320_v17, %v4321_v19 }
0x1679   :  { %v8538_v27 = vpop.eup %8537  ;;  %v4285_v48 = vadd.f32 %v4211_v58, %v9352_v63  ;;  %v4286_v3 = vadd.f32 %v4225_v41, %v9355_v46  ;;  %v4287_v62 = vadd.f32 %v4233_v42, %v9366_v16  ;;  %8557 = vtanh.f32 %v4279_v37 }
0x167a   :  { %v8540_v2 = vpop.eup %8539  ;;  %8559 = vtanh.f32 %v4280_v7  ;;  %v4324_v21 = vmul.f32 %v8536_v47, %v9208_v56  ;;  %v4325_v8 = vmul.f32 %v8538_v27, %v9235_v4  ;;  %v4377_v12 = vcombine.low %v4322_v23, %v4323_v59 }
0x167b   :  { %v8542_v29 = vpop.eup %8541  ;;  %v4288_v13 = vadd.f32 %v4235_v24, %v9315_v35  ;;  %v4289_v49 = vadd.f32 %v10054_v18, %v9324_v6  ;;  %8561 = vtanh.f32 %v4281_v40  ;;  %v4326_v58 = vmul.f32 %v8540_v2, %v9244_v9 }
0x167c   :  { %v8544_v41 = vpop.eup %8543  ;;  %8563 = vtanh.f32 %v4282_v45  ;;  %v4378_v42 = vcombine.low %v4324_v21, %v4325_v8  ;;  %v4385_v37 = vrot.slane %v4376_v15, %v9073_v31  ;;  %v4392_v7 = vrot.slane %v4377_v12, %v9073_v31 }
0x167d   :  { %v8546_v17 = vpop.eup %8545  ;;  %v4290_v19 = vadd.f32 %v4232_v11, %v9329_v1  ;;  %8565 = vtanh.f32 %v4283_v34  ;;  %v4327_v47 = vmul.f32 %v8542_v29, %v9204_v53  ;;  %v4328_v24 = vmul.f32 %v8544_v41, %v9211_v57 }
0x167e   :  { %v8548_v23 = vpop.eup %8547  ;;  %8567 = vtanh.f32 %v4284_v22  ;;  %v4399_v18 = vrot.slane %v4378_v42, %v9073_v31  ;;  %v4406_v40 = vrot.slane %v4326_v58, %v9073_v31  ;;  %v4407_v45 = vcombine.low %v4385_v37, %v4392_v7 }
0x167f   :  { %v8550_v59 = vpop.eup %8549  ;;  %8569 = vtanh.f32 %v4285_v48  ;;  %v4329_v15 = vmul.f32 %v8546_v17, %v9239_v5  ;;  %v4330_v27 = vmul.f32 %v8548_v23, %v9248_v10  ;;  %v4424_v2 = vcombine.low %v4327_v47, %v4328_v24 }
0x1680   :  { %v8552_v11 = vpop.eup %8551  ;;  %v4291_v34 = vadd.f32 %v4234_v33, %v9334_v14  ;;  %8571 = vtanh.f32 %v4286_v3  ;;  %v4408_v21 = vcombine.low %v4399_v18, %v4406_v40  ;;  %v4415_v8 = vrot.slane %v4407_v45, %v9073_v31 }
0x1681   :  { %v8554_v22 = vpop.eup %8553  ;;  %8573 = vtanh.f32 %v4287_v62  ;;  %v4331_v12 = vmul.f32 %v8550_v59, %v9208_v56  ;;  %v4332_v29 = vmul.f32 %v8552_v11, %v9235_v4  ;;  %v4425_v58 = vcombine.low %v4329_v15, %v4330_v27 }
0x1682   :  { %v8556_v48 = vpop.eup %8555  ;;  %8575 = vtanh.f32 %v4288_v13  ;;  %v4422_v41 = vrot.slane %v4408_v21, %v9073_v31  ;;  %v4333_v42 = vmul.f32 %v8554_v22, %v9244_v9  ;;  %v4433_v3 = vrot.slane %v4424_v2, %v9073_v31 }
0x1683   :  { %v8558_v37 = vpop.eup %8557  ;;  %8577 = vtanh.f32 %v4289_v49  ;;  %v4426_v33 = vcombine.low %v4331_v12, %v4332_v29  ;;  %v4440_v7 = vrot.slane %v4425_v58, %v9073_v31  ;;  %v4334_v47 = vmul.f32 %v8556_v48, %v9204_v53 }
0x1684   :  { %v8560_v17 = vpop.eup %8559  ;;  %8579 = vtanh.f32 %v4290_v19  ;;  %v4423_v62 = vcombine.low %v4415_v8, %v4422_v41  ;;  %v4335_v24 = vmul.f32 %v8558_v37, %v9211_v57  ;;  %v4454_v18 = vrot.slane %v4333_v42, %v9073_v31 }
0x1685   :  { %v8562_v23 = vpop.eup %8561  ;;  %8581 = vtanh.f32 %v4291_v34  ;;  %v4447_v13 = vrot.slane %v4426_v33, %v9073_v31  ;;  %v4455_v40 = vcombine.low %v4433_v3, %v4440_v7  ;;  %v4336_v59 = vmul.f32 %v8560_v17, %v9239_v5 }
0x1686   :  { %v8564_v49 = vpop.eup %8563  ;;  %v4572_v45 = vsel %vm1639_vm2, %v4423_v62, 0.0  ;;  %v4337_v15 = vmul.f32 %v8562_v23, %v9248_v10  ;;  %v4472_v19 = vcombine.low %v4334_v47, %v4335_v24 }
0x1687   :  { %v8566_v27 = vpop.eup %8565  ;;  %4573 = vadd.xlane.f32.xlu0 %v4572_v45  ;;  %v4456_v2 = vcombine.low %v4447_v13, %v4454_v18  ;;  %v4463_v11 = vrot.slane %v4455_v40, %v9073_v31  ;;  %v4338_v34 = vmul.f32 %v8564_v49, %v9208_v56 }
0x1688   :  { %v8568_v21 = vpop.eup %8567  ;;  %v4339_v8 = vmul.f32 %v8566_v27, %v9235_v4  ;;  %v4473_v22 = vcombine.low %v4336_v59, %v4337_v15  ;;  %v4481_v42 = vrot.slane %v4472_v19, %v9073_v31 }
0x1689   :  { %v8570_v12 = vpop.eup %8569  ;;  %v4470_v29 = vrot.slane %v4456_v2, %v9073_v31  ;;  %v4340_v58 = vmul.f32 %v8568_v21, %v9244_v9 }
0x168a   :  { %v8572_v48 = vpop.eup %8571  ;;  %v4474_v41 = vcombine.low %v4338_v34, %v4339_v8  ;;  %v4488_v37 = vrot.slane %v4473_v22, %v9073_v31  ;;  %v4341_v7 = vmul.f32 %v8570_v12, %v9204_v53 }
0x168b   :  { %v8574_v33 = vpop.eup %8573  ;;  %v4471_v3 = vcombine.low %v4463_v11, %v4470_v29  ;;  %v4342_v17 = vmul.f32 %v8572_v48, %v9211_v57  ;;  %v4502_v24 = vrot.slane %v4340_v58, %v9073_v31 }
0x168c   :  { %v8576_v62 = vpop.eup %8575  ;;  %v4495_v47 = vrot.slane %v4474_v41, %v9073_v31  ;;  %v4503_v23 = vcombine.low %v4481_v42, %v4488_v37  ;;  %v4343_v40 = vmul.f32 %v8574_v33, %v9239_v5 }
0x168d   :  { %v8578_v13 = vpop.eup %8577  ;;  %v4575_v18 = vsel %vm1639_vm2, %v4471_v3, 0.0  ;;  %v4344_v49 = vmul.f32 %v8576_v62, %v9248_v10  ;;  %v4520_v45 = vcombine.low %v4341_v7, %v4342_v17 }
0x168e   :  { %v8580_v59 = vpop.eup %8579  ;;  %4576 = vadd.xlane.f32.xlu1 %v4575_v18  ;;  %v4504_v15 = vcombine.low %v4495_v47, %v4502_v24  ;;  %v4511_v19 = vrot.slane %v4503_v23, %v9073_v31  ;;  %v4345_v2 = vmul.f32 %v8578_v13, %v9208_v56 }
0x168f   :  { %v8582_v27 = vpop.eup %8581  ;;  %v4346_v11 = vmul.f32 %v8580_v59, %v9235_v4  ;;  %v4521_v21 = vcombine.low %v4343_v40, %v4344_v49  ;;  %v4529_v12 = vrot.slane %v4520_v45, %v9073_v31 }
0x1690   :  { %v4518_v34 = vrot.slane %v4504_v15, %v9073_v31  ;;  %v4347_v8 = vmul.f32 %v8582_v27, %v9244_v9 }
0x1691   :  { %v4522_v22 = vcombine.low %v4345_v2, %v4346_v11  ;;  %v4536_v29 = vrot.slane %v4521_v21, %v9073_v31 }
0x1692   :  { %v4519_v58 = vcombine.low %v4511_v19, %v4518_v34  ;;  %v4550_v41 = vrot.slane %v4347_v8, %v9073_v31 }
0x1693   :  { %v4543_v48 = vrot.slane %v4522_v22, %v9073_v31  ;;  %v4551_v42 = vcombine.low %v4529_v12, %v4536_v29 }
0x1694   :  { %v4578_v37 = vsel %vm1639_vm2, %v4519_v58, 0.0 }
0x1695   :  { %4579 = vadd.xlane.f32.xlu0 %v4578_v37  ;;  %v4552_v33 = vcombine.low %v4543_v48, %v4550_v41  ;;  %v4559_v3 = vrot.slane %v4551_v42, %v9073_v31 }
0x1697   :  { %v4566_v7 = vrot.slane %v4552_v33, %v9073_v31 }
0x1699   :  { %v4567_v17 = vcombine.low %v4559_v3, %v4566_v7 }
0x169b   :  { %v4581_v62 = vsel %vm1639_vm2, %v4567_v17, 0.0 }
0x169c   :  { %4582 = vadd.xlane.f32.xlu0 %v4581_v62 }
0x1714   :  { %v4574_v47 = vpop.xlane.xlu0 %4573 }
0x1715   :  { %v4584_v18 = vadd.f32 %v4574_v47, %v9470_v39 }
0x1717   :  { %v4595_v45 = vrot.slane %v4584_v18, %v9468_v36 }
0x171b   :  { %v4577_v24 = vpop.xlane.xlu1 %4576 }
0x171c   :  { %v4585_v23 = vadd.f32 %v4577_v24, %v9470_v39 }
0x171e   :  { %v4599_v49 = vrot.slane %v4585_v23, %v9468_v36 }
0x1720   :  { %v4608_v27 = vsel %vm1687_vm3, %v4599_v49, %v4595_v45 }
0x1722   :  { %v4580_v13 = vpop.xlane.xlu0 %4579 }
0x1723   :  { %v4586_v40 = vadd.f32 %v4580_v13, %v9470_v39 }
0x1725   :  { %v4603_v59 = vrot.slane %v4586_v40, %v9468_v36 }
0x1727   :  { %v4609_v11 = vsel %vm1689_vm4, %v4603_v59, %v4608_v27 }
0x1729   :  { %v4583_v15 = vpop.xlane.xlu0 %4582 }
0x172a   :  { %v4587_v19 = vadd.f32 %v4583_v15, %v9470_v39 }
0x172c   :  { %v4607_v2 = vrot.slane %v4587_v19, %v9468_v36 }
0x172e   :  { %v4610_v21 = vsel %vm1691_vm5, %v4607_v2, %v4609_v11 }
0x172f   :  { %v4612_v34 = vsel %vm1694_vm6, %v4610_v21, -inf }
0x1730   :  { %4613 = vmax.xlane.f32.xlu1 %v4612_v34 }
0x17bd   :  { %v4614_v8 = vpop.xlane.xlu1 %4613 }
0x17be   :  { %v4619_v22 = vrot.slane %v4614_v8, %v9232_v0  ;;  %v4623_v12 = vrot.slane %v4614_v8, %v9485_v60  ;;  %v4627_v29 = vrot.slane %v4614_v8, %v9488_v54  ;;  %v4631_v41 = vrot.slane %v4614_v8, %v9493_v51 }
0x17c0   :  { %v4636_v58 = vsub.f32 %v4584_v18, %v4619_v22  ;;  %v4637_v48 = vsub.f32 %v4585_v23, %v4623_v12  ;;  %v4638_v42 = vsub.f32 %v4586_v40, %v4627_v29  ;;  %v4639_v3 = vsub.f32 %v4587_v19, %v4631_v41 }
0x17c2   :  { %v4640_v37 = vmul.f32 1.442695, %v4636_v58  ;;  %v4642_v33 = vmul.f32 1.442695, %v4637_v48  ;;  %v4644_v7 = vmul.f32 1.442695, %v4638_v42 }
0x17c3   :  { %v4646_v17 = vmul.f32 1.442695, %v4639_v3 }
0x17c4   :  { %8583 = vpow2.f32 %v4640_v37 }
0x17c5   :  { %8585 = vpow2.f32 %v4642_v33 }
0x17c6   :  { %8587 = vpow2.f32 %v4644_v7 }
0x17c7   :  { %8589 = vpow2.f32 %v4646_v17 }
0x17ce   :  { %v8584_v62 = vpop.eup %8583 }
0x17cf   :  { %v8586_v47 = vpop.eup %8585  ;;  %4653 = vperm.xlu0 %8298, %v8584_v62  }
0x17d0   :  { %4656 = vperm.xlu1 %8294, %v8586_v47   ;;  %v8588_v24 = vpop.eup %8587 }
0x17d1   :  { %v8590_v13 = vpop.eup %8589 }
0x17d4   :  { %4659 = vperm.xlu1 %8294, %v8588_v24  }
0x17d8   :  { %4662 = vperm.xlu1 %8294, %v8590_v13  }
0x184e   :  { %v4654_v18 = vpop.permute.xlu0 %4653 }
0x184f   :  { %v4657_v23 = vpop.permute.xlu1 %4656  ;;  %v4667_v45 = vrot.slane %v4654_v18, %v9468_v36 }
0x1850   :  { %v4671_v49 = vrot.slane %v4657_v23, %v9468_v36 }
0x1852   :  { %v4680_v19 = vsel %vm1687_vm3, %v4671_v49, %v4667_v45 }
0x1853   :  { %v4660_v40 = vpop.permute.xlu1 %4659 }
0x1854   :  { %v4675_v59 = vrot.slane %v4660_v40, %v9468_v36 }
0x1856   :  { %v4681_v2 = vsel %vm1689_vm4, %v4675_v59, %v4680_v19 }
0x1857   :  { %v4663_v15 = vpop.permute.xlu1 %4662 }
0x1858   :  { %v4679_v27 = vrot.slane %v4663_v15, %v9468_v36 }
0x185a   :  { %v4682_v11 = vsel %vm1691_vm5, %v4679_v27, %v4681_v2 }
0x185b   :  { %v4684_v21 = vsel %vm1694_vm6, %v4682_v11, 0.0 }
0x185c   :  { %4685 = vadd.xlane.f32.xlu1 %v4684_v21 }
0x18e9   :  { %v4686_v34 = vpop.xlane.xlu1 %4685 }
0x18ea   :  { %8591 = vrcp.f32 %v4686_v34 }
0x18f4   :  { %v8592_v8 = vpop.eup %8591 }
0x18f5   :  { %v4688_v22 = vmul.f32 %v8592_v8, %v4686_v34 }
0x18f7   :  { %v4689_v12 = vsub.f32 2.0, %v4688_v22 }
0x18f9   :  { %v4690_v29 = vmul.f32 %v8592_v8, %v4689_v12 }
0x18fb   :  { %v4699_v58 = vrot.slane %v4690_v29, %v9485_v60  ;;  %v4703_v41 = vrot.slane %v4690_v29, %v9488_v54  ;;  %v4695_v37 = vrot.slane %v4690_v29, %v9232_v0  ;;  %v4707_v3 = vrot.slane %v4690_v29, %v9493_v51 }
0x18fd   :  { %v4713_v48 = vmul.f32 %v8586_v47, %v4699_v58  ;;  %v4714_v42 = vmul.f32 %v8588_v24, %v4703_v41  ;;  %v4712_v33 = vmul.f32 %v8584_v62, %v4695_v37  ;;  %v4715_v7 = vmul.f32 %v8590_v13, %v4707_v3 }
0x18ff   :  { %4723 = vperm.xlu0 %8298, %v4713_v48  }
0x1903   :  { %4728 = vperm.xlu0 %8298, %v4714_v42  }
0x1907   :  { %4718 = vperm.xlu0 %8298, %v4712_v33  }
0x190b   :  { %4733 = vperm.xlu0 %8298, %v4715_v7  }
0x197e   :  { %v4724_v17 = vpop.permute.xlu0 %4723 }
0x197f   :  { %v4737_v23 = vmul.f32 %v9938_v38, %v4724_v17 }
0x1981   :  { %v4747_v18 = vsel %vm1639_vm2, %v4737_v23, 0.0 }
0x1982   :  { %v4748_v40 = vrot.slane %v4747_v18, 4  ;;  %v4729_v47 = vpop.permute.xlu0 %4728 }
0x1983   :  { %v4738_v49 = vmul.f32 %v9945_v61, %v4729_v47 }
0x1984   :  { %v4749_v45 = vadd.f32 %v4748_v40, %v4747_v18 }
0x1985   :  { %v4754_v24 = vsel %vm1639_vm2, %v4738_v49, 0.0 }
0x1986   :  { %v4750_v59 = vrot.slane %v4749_v45, 2  ;;  %v4755_v15 = vrot.slane %v4754_v24, 4  ;;  %v4719_v62 = vpop.permute.xlu0 %4718 }
0x1987   :  { %v4736_v19 = vmul.f32 %v9952_v26, %v4719_v62 }
0x1988   :  { %v4751_v27 = vadd.f32 %v4750_v59, %v4749_v45  ;;  %v4756_v13 = vadd.f32 %v4755_v15, %v4754_v24 }
0x1989   :  { %v4740_v2 = vsel %vm1639_vm2, %v4736_v19, 0.0 }
0x198a   :  { %v4757_v11 = vrot.slane %v4756_v13, 2  ;;  %v4741_v38 = vrot.slane %v4740_v2, 4  ;;  %v4734_v21 = vpop.permute.xlu0 %4733  ;;  %v4752_v8 = vrot.slane %v4751_v27, 1 }
0x198b   :  { %v4739_v34 = vmul.f32 %v9959_v52, %v4734_v21  ;;  %v11078_v21 = vmov 0  }
0x198c   :  { %v4758_v22 = vadd.f32 %v4757_v11, %v4756_v13  ;;  %v4742_v61 = vadd.f32 %v4741_v38, %v4740_v2  ;;  %v4753_v41 = vadd.f32 %v4752_v8, %v4751_v27  ;;  %v8906_v13 = vmov 3   ;;  %v11077_v11 = vld [vmem:[#allocation34_spill] sm:$0xff] }
0x198d   :  { %v4761_v12 = vsel %vm1639_vm2, %v4739_v34, 0.0  ;;  %8299 = vset.pattern.permute.xlu1 %v8906_v13  ;;  %v11079_v34 = vld [vmem:[#allocation30_spill] sm:$0xff]  ;;  %v11090_v13 = vld [vmem:[#allocation11_spill] sm:$0xff] }
0x198e   :  { %v4743_v29 = vrot.slane %v4742_v61, 2  ;;  %v4762_v58 = vrot.slane %v4761_v12, 4  ;;  %v4759_v48 = vrot.slane %v4758_v22, 1  ;;  %v4769_v7 = vmul.f32 %v9966_v43, %v4753_v41 }
0x1990   :  { %v4744_v42 = vadd.f32 %v4743_v29, %v4742_v61  ;;  %v4763_v26 = vadd.f32 %v4762_v58, %v4761_v12  ;;  %v4760_v3 = vadd.f32 %v4759_v48, %v4758_v22  ;;  %v4776_v47 = vrot.slane %v4769_v7, 7  ;;  %v11080_v22 = vld [vmem:[#allocation33_spill] sm:$0xff]  ;;  %v11081_v12 = vld [vmem:[#allocation31_spill] sm:$0xff] }
0x1992   :  { %v4745_v37 = vrot.slane %v4744_v42, 1  ;;  %v4764_v33 = vrot.slane %v4763_v26, 2  ;;  %v4770_v40 = vmul.f32 %v9966_v43, %v4760_v3  ;;  %v11082_v3 = vld [vmem:[#allocation32_spill] sm:$0xff] }
0x1994   :  { %v4746_v17 = vadd.f32 %v4745_v37, %v4744_v42  ;;  %v4765_v23 = vadd.f32 %v4764_v33, %v4763_v26  ;;  %v4778_v59 = vrot.slane %v4770_v40, 6 }
0x1996   :  { %v4768_v52 = vmul.f32 %v9966_v43, %v4746_v17  ;;  %v4766_v18 = vrot.slane %v4765_v23, 1 }
0x1998   :  { %v4767_v49 = vadd.f32 %v4766_v18, %v4765_v23  ;;  %v4777_v24 = vsel %vm1687_vm3, %v4776_v47, %v4768_v52 }
0x1999   :  { %v4779_v62 = vsel %vm1689_vm4, %v4778_v59, %v4777_v24  ;;  %v11085_v24 = vmov 0.0|0.0   ;;  %v11086_v59 = vld [vmem:[#allocation16_spill] sm:$0xff] }
0x199a   :  { %v4771_v45 = vmul.f32 %v9966_v43, %v4767_v49  ;;  %v11083_v49 = vld [vmem:[#allocation14_spill] sm:$0xff] }
0x199c   :  { %v4780_v15 = vrot.slane %v4771_v45, 5  ;;  %v11084_v45 = vmov 0.0  }
0x199e   :  { %v4781_v19 = vsel %vm1691_vm5, %v4780_v15, %v4779_v62  ;;  %v11087_v62 = vld [vmem:[#allocation12_spill] sm:$0xff] }
0x199f   :  { %v4783_v27 = vsel %vm1872_vm7, %v4781_v19, 0.0  ;;  %v11088_v19 = vld [vmem:[#allocation13_spill] sm:$0xff] }
0x19a0   :  { %4784 = vadd.xlane.f32.xlu0 %v4783_v27  ;;  %v11089_v27 = vld [vmem:[#allocation15_spill] sm:$0xff] }
0x1a2d   :  { %v4785_v2 = vpop.xlane.xlu0 %4784 }
0x1a2e   :  { %v4786_v38 = vadd.f32 %v4785_v2, %v11077_v11 }
0x1a30   :  { %4789 = vperm.xlu1 %8299, %v4786_v38  }
0x1a34   :  { %8300 = vset.pattern.permute.xlu1 %v11078_v21 }
0x1aaf   :  { %v4790_v43 = vpop.permute.xlu1 %4789 }
0x1ab0   :  { %v4792_v8 = vmul.f32 %v11079_v34, %v4790_v43 }
0x1ab2   :  { %v4793_v61 = vadd.f32 %v4792_v8, %v11080_v22 }
0x1ab4   :  { %v4794_v29 = vadd.f32 %v11081_v12, %v4793_v61 }
0x1ab6   :  { %8593 = vtanh.f32 %v4794_v29  ;;  %v4795_v48 = vmul.f32 0.5, %v4794_v29 }
0x1ab8   :  { %8595 = vtanh.f32 %v4795_v48 }
0x1ac0   :  { %v8594_v58 = vpop.eup %8593 }
0x1ac1   :  { %4802 = vrot.lane.b32.xlu1 %v8594_v58, %s8901_s4 }
0x1ac2   :  { %v8596_v41 = vpop.eup %8595 }
0x1ac3   :  { %v4797_v42 = vadd.f32 1.0, %v8596_v41 }
0x1ac5   :  { %v4798_v26 = vmul.f32 0.5, %v4797_v42 }
0x1ac7   :  { %v4800_v7 = vmul.f32 %v4798_v26, %v11082_v3 }
0x1b33   :  { %v4803_v37 = vpop.permute.xlu1 %4802 }
0x1b34   :  { %v4805_v33 = vmul.f32 %v4803_v37, %v4798_v26 }
0x1b36   :  { %4807 = vrot.lane.b32.xlu1 %v4805_v33, %s8902_s23 }
0x1ba8   :  { %v4808_v17 = vpop.permute.xlu1 %4807 }
0x1ba9   :  { %v10188_v23 = vadd.f32 %v4808_v17, %v4800_v7 }
0x1bab   :  { %8597 = vtanh.f32 %v10188_v23 }
0x1bb5   :  { %v8598_v52 = vpop.eup %8597 }
0x1bb6   :  { %4813 = vrot.lane.b32.xlu1 %v8598_v52, %s8901_s4 }
0x1bba   :  { %4894 = vrot.lane.b32.xlu1 %v10188_v23, %s8903_s9 }
0x1c28   :  { %v4814_v18 = vpop.permute.xlu1 %4813 }
0x1c29   :  { %v4816_v40 = vmul.f32 %v4814_v18, %v4798_v26 }
0x1c2b   :  { %4818 = vrot.lane.b32.xlu0 %v4816_v40, %s8902_s23 }
0x1c2c   :  { %v4895_v47 = vpop.permute.xlu1 %4894 }
0x1c2d   :  { %8111 = vmatmul.mubr.msk.f32.vlgmr.msra.gmra.mrb[12].mxu0 %vm439_vm0, %v4895_v47 }
0x1c2e   :  { %8245 = vmatpush3.bf16.msra.mxu0 %v11083_v49  ;;  %8121 = vmatprep.mubr.msk.f32.mxu0 %vm8899_vm1, %v11084_v45 }
0x1c2f   :  { %8246 = vmatprep.subr.bf16.mxu0 %v11085_v24 }
0x1c32   :  { %8248 = vmatpush3.bf16.msra.mxu0 %v11086_v59  ;;  %v11093_v59 = vld [vmem:[#allocation24_spill] sm:$0xff] }
0x1c33   :  { %8257 = vmatprep.subr.bf16.mxu0 %v11085_v24 }
0x1c9d   :  { %v4819_v15 = vpop.permute.xlu0 %4818 }
0x1c9e   :  { %7982 = vmatmul.mubr.msk.f32.vlgmr.msra.gmra.mrb[8].mxu1 %vm439_vm0, %v4819_v15 }
0x1c9f   :  { %8238 = vmatpush1.bf16.msra.mxu1 %v11087_v62  ;;  %5852 = vmatprep.mubr.f32.mxu1 %v11084_v45 }
0x1ca0   :  { %8240 = vmatprep.subr.bf16.mxu1 %v11088_v19 }
0x1ca3   :  { %8242 = vmatpush1.bf16.msra.mxu1 %v11089_v27 }
0x1ca4   :  { %8250 = vmatprep.subr.bf16.mxu1 %v11090_v13 }
0x1d00   :  { %v4964_v2 = vpop.f32.mrb[12].mxu0 }
0x1d01   :  { %v8112_v38 = vpop.f32.mrb[13].mxu0 }
0x1d71   :  { %v10208_v43 = vpop.f32.mrb[8].mxu1 }
0x1d72   :  { %v4890_v34 = vpop.f32.mrb[9].mxu1 }
0x1d73   :  { %v4968_v8 = vadd.f32 %v4964_v2, %v4890_v34 }
0x1d75   :  { %v4976_v22 = vrot.slane %v4968_v8, %v9073_v31 }
0x1d77   :  { %v4984_v61 = vrot.slane %v4976_v22, %v9073_v31  ;;  %v4977_v12 = vcombine.high %v4976_v22, %v4976_v22 }
0x1d79   :  { %v4997_v29 = vrot.slane %v4984_v61, %v9232_v0  ;;  %v4991_v58 = vrot.slane %v4977_v12, %v9073_v31  ;;  %v4992_v26 = vcombine.high %v4984_v61, %v4984_v61 }
0x1d7b   :  { %v5017_v48 = vrot.slane %v4997_v29, %v9073_v31  ;;  %v5001_v41 = vrot.slane %v4991_v58, %v9232_v0  ;;  %v5010_v42 = vcombine.high %v4997_v29, %v4997_v29  ;;  %v4993_v7 = vcombine.high %v4991_v58, %v4991_v58  ;;  %v11091_v29 = vld [vmem:[#allocation22_spill] sm:$0xff] }
0x1d7c   :  { %v5005_v18 = vrot.slane %v4992_v26, %v9232_v0  ;;  %v11092_v26 = vld [vmem:[#allocation23_spill] sm:$0xff] }
0x1d7d   :  { %v5025_v37 = vcombine.high %v5017_v48, %v5017_v48  ;;  %v5024_v33 = vrot.slane %v5010_v42, %v9073_v31  ;;  %v5058_v3 = vcombine.high %v5001_v41, %v5001_v41  ;;  %v5033_v17 = vrot.slane %v5017_v48, %v9073_v31 }
0x1d7e   :  { %v5065_v52 = vrot.slane %v5001_v41, %v9073_v31  ;;  %v5009_v13 = vrot.slane %v4993_v7, %v9232_v0  ;;  %v5106_v22 = vcombine.high %v5005_v18, %v5005_v18  ;;  %v5113_v12 = vrot.slane %v5005_v18, %v9073_v31  ;;  %v11094_v18 = vld [vmem:[#allocation26_spill] sm:$0xff] }
0x1d7f   :  { %v5047_v40 = vrot.slane %v5025_v37, %v9073_v31  ;;  %v5026_v47 = vcombine.high %v5024_v33, %v5024_v33  ;;  %v5072_v15 = vrot.slane %v5058_v3, %v9073_v31  ;;  %v5040_v2 = vrot.slane %v5024_v33, %v9073_v31 }
0x1d80   :  { %v5055_v38 = vcombine.high %v5033_v17, %v5033_v17  ;;  %v5073_v34 = vcombine.high %v5065_v52, %v5065_v52  ;;  %v5081_v61 = vrot.slane %v5065_v52, %v9073_v31  ;;  %v5230_v58 = vadd.f32 %v5033_v17, %v11091_v29 }
0x1d81   :  { %v5057_v8 = vcombine.high %v5047_v40, %v5047_v40  ;;  %v5054_v48 = vrot.slane %v5026_v47, %v9073_v31  ;;  %v5074_v41 = vcombine.high %v5072_v15, %v5072_v15  ;;  %v5088_v42 = vrot.slane %v5072_v15, %v9073_v31  ;;  %v11095_v47 = vld [vmem:[#allocation25_spill] sm:$0xff] }
0x1d82   :  { %v5231_v37 = vadd.f32 %v5047_v40, %v11092_v26  ;;  %v5056_v3 = vcombine.high %v5040_v2, %v5040_v2  ;;  %v5095_v33 = vrot.slane %v5073_v34, %v9073_v31  ;;  %v5154_v7 = vcombine.high %v5009_v13, %v5009_v13  ;;  %v11096_v26 = vld [vmem:[#allocation27_spill] sm:$0xff] }
0x1d83   :  { %v5232_v27 = vadd.f32 %v5055_v38, %v11093_v59  ;;  %v5120_v24 = vrot.slane %v5106_v22, %v9073_v31  ;;  %v5161_v52 = vrot.slane %v5009_v13, %v9073_v31  ;;  %v5233_v49 = vadd.f32 %v5057_v8, %v11094_v18  ;;  %v11097_v18 = vld [vmem:[#allocation28_spill] sm:$0xff] }
0x1d84   :  { %v5103_v17 = vcombine.high %v5081_v61, %v5081_v61  ;;  %v5121_v29 = vcombine.high %v5113_v12, %v5113_v12  ;;  %v5234_v19 = vadd.f32 %v5040_v2, %v11095_v47  ;;  %8599 = vtanh.f32 %v5230_v58 }
0x1d85   :  { %v5102_v15 = vrot.slane %v5074_v41, %v9073_v31  ;;  %v5104_v40 = vcombine.high %v5088_v42, %v5088_v42  ;;  %v5235_v45 = vadd.f32 %v5054_v48, %v11096_v26  ;;  %8601 = vtanh.f32 %v5231_v37  ;;  %v11098_v41 = vld [vmem:[#allocation17_spill] sm:$0xff] }
0x1d86   :  { %v5105_v34 = vcombine.high %v5095_v33, %v5095_v33  ;;  %v5168_v38 = vrot.slane %v5154_v7, %v9073_v31  ;;  %v5236_v22 = vadd.f32 %v5056_v3, %v9308_v28  ;;  %8603 = vtanh.f32 %v5232_v27  ;;  %v11099_v7 = vld [vmem:[#allocation18_spill] sm:$0xff]  ;;  %v11100_v3 = vld [vmem:[#allocation19_spill] sm:$0xff] }
0x1d87   :  { %v5129_v13 = vrot.slane %v5113_v12, %v9073_v31  ;;  %v5169_v8 = vcombine.high %v5161_v52, %v5161_v52  ;;  %v5237_v59 = vadd.f32 %v5081_v61, %v11097_v18  ;;  %8605 = vtanh.f32 %v5233_v49 }
0x1d88   :  { %v5122_v2 = vcombine.high %v5120_v24, %v5120_v24  ;;  %v5143_v58 = vrot.slane %v5121_v29, %v9073_v31  ;;  %v5238_v47 = vadd.f32 %v5095_v33, %v11098_v41  ;;  %8607 = vtanh.f32 %v5234_v19 }
0x1d89   :  { %v5136_v48 = vrot.slane %v5120_v24, %v9073_v31  ;;  %v5177_v37 = vrot.slane %v5161_v52, %v9073_v31  ;;  %v5239_v26 = vadd.f32 %v5103_v17, %v11099_v7  ;;  %8609 = vtanh.f32 %v5235_v45  ;;  %v11101_v52 = vld [vmem:[#allocation20_spill] sm:$0xff]  ;;  %v11102_v7 = vld [vmem:[#allocation21_spill] sm:$0xff] }
0x1d8a   :  { %v5170_v27 = vcombine.high %v5168_v38, %v5168_v38  ;;  %v10248_v12 = vrot.slane %v5168_v38, %v9073_v31  ;;  %v5240_v61 = vadd.f32 %v5105_v34, %v9263_v25  ;;  %8611 = vtanh.f32 %v5236_v22 }
0x1d8b   :  { %v5151_v49 = vcombine.high %v5129_v13, %v5129_v13  ;;  %v5191_v29 = vrot.slane %v5169_v8, %v9073_v31  ;;  %v5241_v33 = vadd.f32 %v5088_v42, %v11100_v3  ;;  %8613 = vtanh.f32 %v5237_v59 }
0x1d8c   :  { %v5150_v24 = vrot.slane %v5122_v2, %v9073_v31  ;;  %v5153_v19 = vcombine.high %v5143_v58, %v5143_v58  ;;  %v5242_v41 = vadd.f32 %v5102_v15, %v11101_v52  ;;  %8615 = vtanh.f32 %v5238_v47  ;;  %v11103_v52 = vld [vmem:[#allocation29_spill] sm:$0xff] }
0x1d8d   :  { %v5152_v45 = vcombine.high %v5136_v48, %v5136_v48  ;;  %v5199_v17 = vcombine.high %v5177_v37, %v5177_v37  ;;  %v5243_v38 = vadd.f32 %v5104_v40, %v11102_v7  ;;  %8617 = vtanh.f32 %v5239_v26 }
0x1d8e   :  { %v8600_v18 = vpop.eup %8599  ;;  %v5198_v34 = vrot.slane %v5170_v27, %v9073_v31  ;;  %v5200_v22 = vcombine.high %v10248_v12, %v10248_v12  ;;  %v5244_v42 = vadd.f32 %v5129_v13, %v9277_v44  ;;  %8619 = vtanh.f32 %v5240_v61 }
0x1d8f   :  { %v8602_v59 = vpop.eup %8601  ;;  %v5201_v8 = vcombine.high %v5191_v29, %v5191_v29  ;;  %v5245_v2 = vadd.f32 %v5143_v58, %v9285_v55  ;;  %v5246_v47 = vadd.f32 %v5151_v49, %v9320_v50  ;;  %8621 = vtanh.f32 %v5241_v33 }
0x1d90   :  { %v8604_v15 = vpop.eup %8603  ;;  %v5247_v40 = vadd.f32 %v5153_v19, %v11103_v52  ;;  %8623 = vtanh.f32 %v5242_v41  ;;  %v5286_v26 = vmul.f32 %v8600_v18, %v9204_v53  ;;  %v5287_v27 = vmul.f32 %v8602_v59, %v9211_v57 }
0x1d91   :  { %v8606_v7 = vpop.eup %8605  ;;  %v5248_v3 = vadd.f32 %v5136_v48, %v9340_v30  ;;  %v5249_v13 = vadd.f32 %v5150_v24, %v9349_v32  ;;  %v5250_v61 = vadd.f32 %v5152_v45, %v9343_v20  ;;  %8625 = vtanh.f32 %v5243_v38 }
0x1d92   :  { %v8608_v58 = vpop.eup %8607  ;;  %8627 = vtanh.f32 %v5244_v42  ;;  %v5288_v49 = vmul.f32 %v8604_v15, %v9239_v5  ;;  %v5289_v33 = vmul.f32 %v8606_v7, %v9248_v10  ;;  %v5342_v19 = vcombine.low %v5286_v26, %v5287_v27 }
0x1d93   :  { %v8610_v41 = vpop.eup %8609  ;;  %v5251_v18 = vadd.f32 %v5177_v37, %v9352_v63  ;;  %v5252_v59 = vadd.f32 %v5191_v29, %v9355_v46  ;;  %v5253_v52 = vadd.f32 %v5199_v17, %v9366_v16  ;;  %8629 = vtanh.f32 %v5245_v2 }
0x1d94   :  { %v8612_v48 = vpop.eup %8611  ;;  %8631 = vtanh.f32 %v5246_v47  ;;  %v5290_v24 = vmul.f32 %v8608_v58, %v9208_v56  ;;  %v5291_v45 = vmul.f32 %v8610_v41, %v9235_v4  ;;  %v5343_v38 = vcombine.low %v5288_v49, %v5289_v33 }
0x1d95   :  { %v8614_v42 = vpop.eup %8613  ;;  %v5254_v15 = vadd.f32 %v5201_v8, %v9315_v35  ;;  %v5255_v7 = vadd.f32 %v10248_v12, %v9324_v6  ;;  %8633 = vtanh.f32 %v5247_v40  ;;  %v5292_v37 = vmul.f32 %v8612_v48, %v9244_v9 }
0x1d96   :  { %v8616_v29 = vpop.eup %8615  ;;  %8635 = vtanh.f32 %v5248_v3  ;;  %v5344_v17 = vcombine.low %v5290_v24, %v5291_v45  ;;  %v5351_v2 = vrot.slane %v5342_v19, %v9073_v31  ;;  %v5358_v47 = vrot.slane %v5343_v38, %v9073_v31 }
0x1d97   :  { %v8618_v26 = vpop.eup %8617  ;;  %v5256_v27 = vadd.f32 %v5198_v34, %v9329_v1  ;;  %8637 = vtanh.f32 %v5249_v13  ;;  %v5293_v58 = vmul.f32 %v8614_v42, %v9204_v53  ;;  %v5294_v8 = vmul.f32 %v8616_v29, %v9211_v57 }
0x1d98   :  { %v8620_v49 = vpop.eup %8619  ;;  %8639 = vtanh.f32 %v5250_v61  ;;  %v5365_v12 = vrot.slane %v5344_v17, %v9073_v31  ;;  %v5372_v40 = vrot.slane %v5292_v37, %v9073_v31  ;;  %v5373_v3 = vcombine.low %v5351_v2, %v5358_v47 }
0x1d99   :  { %v8622_v33 = vpop.eup %8621  ;;  %8641 = vtanh.f32 %v5251_v18  ;;  %v5295_v19 = vmul.f32 %v8618_v26, %v9239_v5  ;;  %v5296_v41 = vmul.f32 %v8620_v49, %v9248_v10  ;;  %v5390_v48 = vcombine.low %v5293_v58, %v5294_v8 }
0x1d9a   :  { %v8624_v34 = vpop.eup %8623  ;;  %v5257_v13 = vadd.f32 %v5200_v22, %v9334_v14  ;;  %8643 = vtanh.f32 %v5252_v59  ;;  %v5374_v24 = vcombine.low %v5365_v12, %v5372_v40  ;;  %v5381_v45 = vrot.slane %v5373_v3, %v9073_v31 }
0x1d9b   :  { %v8626_v61 = vpop.eup %8625  ;;  %8645 = vtanh.f32 %v5253_v52  ;;  %v5297_v38 = vmul.f32 %v8622_v33, %v9208_v56  ;;  %v5298_v42 = vmul.f32 %v8624_v34, %v9235_v4  ;;  %v5391_v37 = vcombine.low %v5295_v19, %v5296_v41 }
0x1d9c   :  { %v8628_v18 = vpop.eup %8627  ;;  %8647 = vtanh.f32 %v5254_v15  ;;  %v5388_v29 = vrot.slane %v5374_v24, %v9073_v31  ;;  %v5299_v17 = vmul.f32 %v8626_v61, %v9244_v9  ;;  %v5399_v59 = vrot.slane %v5390_v48, %v9073_v31 }
0x1d9d   :  { %v8630_v2 = vpop.eup %8629  ;;  %8649 = vtanh.f32 %v5255_v7  ;;  %v5392_v22 = vcombine.low %v5297_v38, %v5298_v42  ;;  %v5406_v47 = vrot.slane %v5391_v37, %v9073_v31  ;;  %v5300_v58 = vmul.f32 %v8628_v18, %v9204_v53 }
0x1d9e   :  { %v8632_v26 = vpop.eup %8631  ;;  %8651 = vtanh.f32 %v5256_v27  ;;  %v5389_v52 = vcombine.low %v5381_v45, %v5388_v29  ;;  %v5301_v8 = vmul.f32 %v8630_v2, %v9211_v57  ;;  %v5420_v12 = vrot.slane %v5299_v17, %v9073_v31 }
0x1d9f   :  { %v8634_v49 = vpop.eup %8633  ;;  %8653 = vtanh.f32 %v5257_v13  ;;  %v5413_v15 = vrot.slane %v5392_v22, %v9073_v31  ;;  %v5421_v40 = vcombine.low %v5399_v59, %v5406_v47  ;;  %v5302_v33 = vmul.f32 %v8632_v26, %v9239_v5 }
0x1da0   :  { %v8636_v7 = vpop.eup %8635  ;;  %v5538_v3 = vsel %vm1639_vm2, %v5389_v52, 0.0  ;;  %v5303_v19 = vmul.f32 %v8634_v49, %v9248_v10  ;;  %v5438_v27 = vcombine.low %v5300_v58, %v5301_v8 }
0x1da1   :  { %v8638_v41 = vpop.eup %8637  ;;  %5539 = vadd.xlane.f32.xlu1 %v5538_v3  ;;  %v5422_v48 = vcombine.low %v5413_v15, %v5420_v12  ;;  %v5429_v34 = vrot.slane %v5421_v40, %v9073_v31  ;;  %v5304_v13 = vmul.f32 %v8636_v7, %v9208_v56 }
0x1da2   :  { %v8640_v24 = vpop.eup %8639  ;;  %v5305_v45 = vmul.f32 %v8638_v41, %v9235_v4  ;;  %v5439_v61 = vcombine.low %v5302_v33, %v5303_v19  ;;  %v5447_v17 = vrot.slane %v5438_v27, %v9073_v31 }
0x1da3   :  { %v8642_v38 = vpop.eup %8641  ;;  %v5436_v42 = vrot.slane %v5422_v48, %v9073_v31  ;;  %v5306_v37 = vmul.f32 %v8640_v24, %v9244_v9 }
0x1da4   :  { %v8644_v18 = vpop.eup %8643  ;;  %v5440_v29 = vcombine.low %v5304_v13, %v5305_v45  ;;  %v5454_v2 = vrot.slane %v5439_v61, %v9073_v31  ;;  %v5307_v47 = vmul.f32 %v8642_v38, %v9204_v53 }
0x1da5   :  { %v8646_v22 = vpop.eup %8645  ;;  %v5437_v59 = vcombine.low %v5429_v34, %v5436_v42  ;;  %v5308_v26 = vmul.f32 %v8644_v18, %v9211_v57  ;;  %v5468_v8 = vrot.slane %v5306_v37, %v9073_v31 }
0x1da6   :  { %v8648_v52 = vpop.eup %8647  ;;  %v5461_v58 = vrot.slane %v5440_v29, %v9073_v31  ;;  %v5469_v49 = vcombine.low %v5447_v17, %v5454_v2  ;;  %v5309_v40 = vmul.f32 %v8646_v22, %v9239_v5 }
0x1da7   :  { %v8650_v15 = vpop.eup %8649  ;;  %v5541_v12 = vsel %vm1639_vm2, %v5437_v59, 0.0  ;;  %v5310_v7 = vmul.f32 %v8648_v52, %v9248_v10  ;;  %v5486_v3 = vcombine.low %v5307_v47, %v5308_v26 }
0x1da8   :  { %v8652_v33 = vpop.eup %8651  ;;  %5542 = vadd.xlane.f32.xlu0 %v5541_v12  ;;  %v5470_v19 = vcombine.low %v5461_v58, %v5468_v8  ;;  %v5477_v27 = vrot.slane %v5469_v49, %v9073_v31  ;;  %v5311_v48 = vmul.f32 %v8650_v15, %v9208_v56 }
0x1da9   :  { %v8654_v41 = vpop.eup %8653  ;;  %v5312_v34 = vmul.f32 %v8652_v33, %v9235_v4  ;;  %v5487_v24 = vcombine.low %v5309_v40, %v5310_v7  ;;  %v5495_v38 = vrot.slane %v5486_v3, %v9073_v31 }
0x1daa   :  { %v5484_v13 = vrot.slane %v5470_v19, %v9073_v31  ;;  %v5313_v45 = vmul.f32 %v8654_v41, %v9244_v9 }
0x1dab   :  { %v5488_v61 = vcombine.low %v5311_v48, %v5312_v34  ;;  %v5502_v42 = vrot.slane %v5487_v24, %v9073_v31 }
0x1dac   :  { %v5485_v37 = vcombine.low %v5477_v27, %v5484_v13  ;;  %v5516_v29 = vrot.slane %v5313_v45, %v9073_v31 }
0x1dad   :  { %v5509_v18 = vrot.slane %v5488_v61, %v9073_v31  ;;  %v5517_v17 = vcombine.low %v5495_v38, %v5502_v42 }
0x1dae   :  { %v5544_v2 = vsel %vm1639_vm2, %v5485_v37, 0.0 }
0x1daf   :  { %5545 = vadd.xlane.f32.xlu1 %v5544_v2  ;;  %v5518_v22 = vcombine.low %v5509_v18, %v5516_v29  ;;  %v5525_v59 = vrot.slane %v5517_v17, %v9073_v31 }
0x1db1   :  { %v5532_v47 = vrot.slane %v5518_v22, %v9073_v31 }
0x1db3   :  { %v5533_v26 = vcombine.low %v5525_v59, %v5532_v47 }
0x1db5   :  { %v5547_v52 = vsel %vm1639_vm2, %v5533_v26, 0.0 }
0x1db6   :  { %5548 = vadd.xlane.f32.xlu1 %v5547_v52 }
0x1e2e   :  { %v5540_v58 = vpop.xlane.xlu1 %5539 }
0x1e2f   :  { %v5550_v12 = vadd.f32 %v5540_v58, %v9470_v39 }
0x1e31   :  { %v5561_v3 = vrot.slane %v5550_v12, %v9468_v36 }
0x1e35   :  { %v5543_v8 = vpop.xlane.xlu0 %5542 }
0x1e36   :  { %v5551_v49 = vadd.f32 %v5543_v8, %v9470_v39 }
0x1e38   :  { %v5565_v7 = vrot.slane %v5551_v49, %v9468_v36 }
0x1e3a   :  { %v5574_v27 = vsel %vm1687_vm3, %v5565_v7, %v5561_v3 }
0x1e3c   :  { %v5546_v15 = vpop.xlane.xlu1 %5545 }
0x1e3d   :  { %v5552_v40 = vadd.f32 %v5546_v15, %v9470_v39 }
0x1e3f   :  { %v5569_v33 = vrot.slane %v5552_v40, %v9468_v36 }
0x1e41   :  { %v5575_v34 = vsel %vm1689_vm4, %v5569_v33, %v5574_v27 }
0x1e43   :  { %v5549_v19 = vpop.xlane.xlu1 %5548 }
0x1e44   :  { %v5553_v41 = vadd.f32 %v5549_v19, %v9470_v39 }
0x1e46   :  { %v5573_v48 = vrot.slane %v5553_v41, %v9468_v36 }
0x1e48   :  { %v5576_v24 = vsel %vm1691_vm5, %v5573_v48, %v5575_v34 }
0x1e49   :  { %v5578_v13 = vsel %vm1694_vm6, %v5576_v24, -inf }
0x1e4a   :  { %5579 = vmax.xlane.f32.xlu1 %v5578_v13 }
0x1ed7   :  { %v5580_v45 = vpop.xlane.xlu1 %5579 }
0x1ed8   :  { %v5585_v61 = vrot.slane %v5580_v45, %v9232_v0  ;;  %v5589_v38 = vrot.slane %v5580_v45, %v9485_v60  ;;  %v5593_v42 = vrot.slane %v5580_v45, %v9488_v54  ;;  %v5597_v37 = vrot.slane %v5580_v45, %v9493_v51 }
0x1eda   :  { %v5602_v18 = vsub.f32 %v5550_v12, %v5585_v61  ;;  %v5603_v29 = vsub.f32 %v5551_v49, %v5589_v38  ;;  %v5605_v17 = vsub.f32 %v5553_v41, %v5597_v37  ;;  %v5604_v2 = vsub.f32 %v5552_v40, %v5593_v42 }
0x1edc   :  { %v5606_v22 = vmul.f32 1.442695, %v5602_v18  ;;  %v5608_v59 = vmul.f32 1.442695, %v5603_v29  ;;  %v5612_v47 = vmul.f32 1.442695, %v5605_v17 }
0x1edd   :  { %v5610_v26 = vmul.f32 1.442695, %v5604_v2 }
0x1ede   :  { %8655 = vpow2.f32 %v5606_v22 }
0x1edf   :  { %8657 = vpow2.f32 %v5608_v59 }
0x1ee0   :  { %8659 = vpow2.f32 %v5612_v47 }
0x1ee1   :  { %8661 = vpow2.f32 %v5610_v26 }
0x1ee8   :  { %v8656_v52 = vpop.eup %8655 }
0x1ee9   :  { %v8658_v58 = vpop.eup %8657  ;;  %5619 = vperm.xlu0 %8298, %v8656_v52  }
0x1eea   :  { %5622 = vperm.xlu1 %8300, %v8658_v58   ;;  %v8660_v8 = vpop.eup %8659 }
0x1eeb   :  { %v8662_v15 = vpop.eup %8661 }
0x1eed   :  { %5628 = vperm.xlu0 %8298, %v8660_v8  }
0x1eee   :  { %5625 = vperm.xlu1 %8300, %v8662_v15  }
0x1f68   :  { %v5620_v12 = vpop.permute.xlu0 %5619 }
0x1f69   :  { %v5623_v49 = vpop.permute.xlu1 %5622  ;;  %v5633_v7 = vrot.slane %v5620_v12, %v9468_v36  ;;  %v10361_v12 = vld [vmem:[%s10983_s30 + $0x8] sm:$0x7f] }
0x1f6a   :  { %v5637_v40 = vrot.slane %v5623_v49, %v9468_v36 }
0x1f6c   :  { %v5629_v3 = vpop.permute.xlu0 %5628  ;;  %v5646_v41 = vsel %vm1687_vm3, %v5637_v40, %v5633_v7 }
0x1f6d   :  { %v5626_v33 = vpop.permute.xlu1 %5625  ;;  %v5645_v19 = vrot.slane %v5629_v3, %v9468_v36 }
0x1f6e   :  { %v5641_v27 = vrot.slane %v5626_v33, %v9468_v36 }
0x1f70   :  { %v5647_v48 = vsel %vm1689_vm4, %v5641_v27, %v5646_v41  ;;  %v10375_v41 = vld [vmem:[%s10983_s30] sm:$0x7f] }
0x1f71   :  { %v5648_v34 = vsel %vm1691_vm5, %v5645_v19, %v5647_v48 }
0x1f72   :  { %v5650_v24 = vsel %vm1694_vm6, %v5648_v34, 0.0 }
0x1f73   :  { %5651 = vadd.xlane.f32.xlu1 %v5650_v24 }
0x2000   :  { %v5652_v13 = vpop.xlane.xlu1 %5651 }
0x2001   :  { %8663 = vrcp.f32 %v5652_v13 }
0x200b   :  { %v8664_v45 = vpop.eup %8663 }
0x200c   :  { %v5654_v61 = vmul.f32 %v8664_v45, %v5652_v13 }
0x200e   :  { %v5655_v38 = vsub.f32 2.0, %v5654_v61 }
0x2010   :  { %v5656_v42 = vmul.f32 %v8664_v45, %v5655_v38 }
0x2012   :  { %v5665_v37 = vrot.slane %v5656_v42, %v9485_v60  ;;  %v5669_v29 = vrot.slane %v5656_v42, %v9488_v54  ;;  %v5661_v2 = vrot.slane %v5656_v42, %v9232_v0  ;;  %v5673_v59 = vrot.slane %v5656_v42, %v9493_v51  ;;  %v10382_v42 = vld [vmem:[%s10983_s30 + $0x18] sm:$0x7f] }
0x2014   :  { %v5679_v18 = vmul.f32 %v8658_v58, %v5665_v37  ;;  %v5680_v17 = vmul.f32 %v8662_v15, %v5669_v29  ;;  %v5678_v22 = vmul.f32 %v8656_v52, %v5661_v2  ;;  %v5681_v47 = vmul.f32 %v8660_v8, %v5673_v59  ;;  %v10368_v52 = vld [vmem:[%s10983_s30 + $0x10] sm:$0x7f] }
0x2016   :  { %5689 = vperm.xlu0 %8298, %v5679_v18  }
0x201a   :  { %5694 = vperm.xlu0 %8298, %v5680_v17  }
0x201e   :  { %5684 = vperm.xlu0 %8298, %v5678_v22  }
0x2022   :  { %5699 = vperm.xlu0 %8298, %v5681_v47  }
0x2095   :  { %v5690_v26 = vpop.permute.xlu0 %5689 }
0x2096   :  { %v5703_v58 = vmul.f32 %v10361_v12, %v5690_v26 }
0x2098   :  { %v5713_v49 = vsel %vm1639_vm2, %v5703_v58, 0.0 }
0x2099   :  { %v5714_v15 = vrot.slane %v5713_v49, 4  ;;  %v5695_v40 = vpop.permute.xlu0 %5694 }
0x209a   :  { %v5704_v8 = vmul.f32 %v10368_v52, %v5695_v40 }
0x209b   :  { %v5715_v7 = vadd.f32 %v5714_v15, %v5713_v49 }
0x209c   :  { %v5720_v3 = vsel %vm1639_vm2, %v5704_v8, 0.0 }
0x209d   :  { %v5716_v33 = vrot.slane %v5715_v7, 2  ;;  %v5721_v19 = vrot.slane %v5720_v3, 4  ;;  %v5685_v27 = vpop.permute.xlu0 %5684 }
0x209e   :  { %v5702_v48 = vmul.f32 %v10375_v41, %v5685_v27 }
0x209f   :  { %v5717_v34 = vadd.f32 %v5716_v33, %v5715_v7  ;;  %v5722_v24 = vadd.f32 %v5721_v19, %v5720_v3  ;;  %v10389_v7 = vld [vmem:[%s10890_s8] ss:$0 sm:$0xff] }
0x20a0   :  { %v5706_v13 = vsel %vm1639_vm2, %v5702_v48, 0.0 }
0x20a1   :  { %v5723_v45 = vrot.slane %v5722_v24, 2  ;;  %v5707_v61 = vrot.slane %v5706_v13, 4  ;;  %v5700_v38 = vpop.permute.xlu0 %5699  ;;  %v5718_v18 = vrot.slane %v5717_v34, 1 }
0x20a2   :  { %v5705_v37 = vmul.f32 %v10382_v42, %v5700_v38 }
0x20a3   :  { %v5724_v29 = vadd.f32 %v5723_v45, %v5722_v24  ;;  %v5708_v17 = vadd.f32 %v5707_v61, %v5706_v13  ;;  %v5719_v26 = vadd.f32 %v5718_v18, %v5717_v34 }
0x20a4   :  { %v5727_v2 = vsel %vm1639_vm2, %v5705_v37, 0.0 }
0x20a5   :  { %v5709_v22 = vrot.slane %v5708_v17, 2  ;;  %v5728_v59 = vrot.slane %v5727_v2, 4  ;;  %v5725_v47 = vrot.slane %v5724_v29, 1  ;;  %v5735_v3 = vmul.f32 %v10389_v7, %v5719_v26  ;;  %v10404_v26 = vld [vmem:[%s10891_s11] ss:$0 sm:$0xff] }
0x20a6   :  { %11104 = vst [vmem:[#allocation35_spill] sm:$0xff] %v10404_v26 }
0x20a7   :  { %v5710_v58 = vadd.f32 %v5709_v22, %v5708_v17  ;;  %v5729_v49 = vadd.f32 %v5728_v59, %v5727_v2  ;;  %v5726_v8 = vadd.f32 %v5725_v47, %v5724_v29  ;;  %v5742_v34 = vrot.slane %v5735_v3, 7 }
0x20a8   :  { %v8907_v2 = vmov 4  }
0x20a9   :  { %v5711_v15 = vrot.slane %v5710_v58, 1  ;;  %v5730_v40 = vrot.slane %v5729_v49, 2  ;;  %v5736_v24 = vmul.f32 %v10389_v7, %v5726_v8  ;;  %8301 = vset.pattern.permute.xlu1 %v8907_v2  ;;  %v11110_v2 = vmov 0.0|0.0  }
0x20ab   :  { %v5712_v33 = vadd.f32 %v5711_v15, %v5710_v58  ;;  %v5731_v19 = vadd.f32 %v5730_v40, %v5729_v49  ;;  %v5744_v38 = vrot.slane %v5736_v24, 6  ;;  %v10411_v15 = vld [vmem:[%s10892_s12] ss:$0 sm:$0xff] }
0x20ac   :  { %11105 = vst [vmem:[#allocation38_spill] sm:$0xff] %v10411_v15 }
0x20ad   :  { %v5734_v27 = vmul.f32 %v10389_v7, %v5712_v33  ;;  %v5732_v48 = vrot.slane %v5731_v19, 1 }
0x20af   :  { %v5733_v13 = vadd.f32 %v5732_v48, %v5731_v19  ;;  %v5743_v61 = vsel %vm1687_vm3, %v5742_v34, %v5734_v27 }
0x20b0   :  { %v5745_v18 = vsel %vm1689_vm4, %v5744_v38, %v5743_v61 }
0x20b1   :  { %v5737_v45 = vmul.f32 %v10389_v7, %v5733_v13 }
0x20b3   :  { %v5746_v37 = vrot.slane %v5737_v45, 5 }
0x20b5   :  { %v5747_v29 = vsel %vm1691_vm5, %v5746_v37, %v5745_v18  ;;  %v11108_v18 = vld [vmem:[#allocation13_spill] sm:$0xff] }
0x20b6   :  { %v5749_v17 = vsel %vm1872_vm7, %v5747_v29, 0.0 }
0x20b7   :  { %5750 = vadd.xlane.f32.xlu0 %v5749_v17  ;;  %v11109_v17 = vld [vmem:[#allocation14_spill] sm:$0xff] }
0x2144   :  { %v5751_v22 = vpop.xlane.xlu0 %5750 }
0x2145   :  { %v5752_v59 = vadd.f32 %v5751_v22, %v11077_v11  ;;  %v11111_v22 = vld [vmem:[#allocation15_spill] sm:$0xff] }
0x2147   :  { %5755 = vperm.xlu1 %8301, %v5752_v59   ;;  %v11112_v59 = vld [vmem:[#allocation16_spill] sm:$0xff] }
0x214b   :  { %8302 = vset.pattern.permute.xlu1 %v11078_v21 }
0x21c6   :  { %v5756_v47 = vpop.permute.xlu1 %5755 }
0x21c7   :  { %v5758_v58 = vmul.f32 %v10404_v26, %v5756_v47 }
0x21c9   :  { %v5759_v49 = vadd.f32 %v5758_v58, %v10208_v43 }
0x21cb   :  { %v5760_v40 = vadd.f32 %v10411_v15, %v5759_v49 }
0x21cd   :  { %8665 = vtanh.f32 %v5760_v40  ;;  %v5761_v3 = vmul.f32 0.5, %v5760_v40 }
0x21cf   :  { %8667 = vtanh.f32 %v5761_v3 }
0x21d7   :  { %v8666_v8 = vpop.eup %8665 }
0x21d8   :  { %5768 = vrot.lane.b32.xlu0 %v8666_v8, %s8901_s4 }
0x21d9   :  { %v8668_v33 = vpop.eup %8667 }
0x21da   :  { %v5763_v19 = vadd.f32 1.0, %v8668_v33 }
0x21dc   :  { %v5764_v27 = vmul.f32 0.5, %v5763_v19 }
0x21de   :  { %v5766_v43 = vmul.f32 %v5764_v27, %v10188_v23  ;;  %v11107_v23 = vmov 0.0  }
0x224a   :  { %v5769_v48 = vpop.permute.xlu0 %5768 }
0x224b   :  { %v5771_v24 = vmul.f32 %v5769_v48, %v5764_v27 }
0x224d   :  { %5773 = vrot.lane.b32.xlu1 %v5771_v24, %s8902_s23 }
0x22bf   :  { %v5774_v34 = vpop.permute.xlu1 %5773 }
0x22c0   :  { %v10417_v13 = vadd.f32 %v5774_v34, %v5766_v43 }
0x22c2   :  { %11106 = vst [vmem:[#allocation36_spill] sm:$0xff] %v10417_v13  ;;  %8669 = vtanh.f32 %v10417_v13 }
0x22cc   :  { %v8670_v45 = vpop.eup %8669 }
0x22cd   :  { %5779 = vrot.lane.b32.xlu1 %v8670_v45, %s8901_s4 }
0x233f   :  { %v5780_v61 = vpop.permute.xlu1 %5779 }
0x2340   :  { %v5782_v38 = vmul.f32 %v5780_v61, %v5764_v27 }
0x2342   :  { %5784 = vrot.lane.b32.xlu1 %v5782_v38, %s8902_s23 }
0x2346   :  { %5860 = vrot.lane.b32.xlu1 %v10417_v13, %s8903_s9  ;;  %v11116_v13 = vld [vmem:[#allocation24_spill] sm:$0xff] }
0x23b4   :  { %v5785_v37 = vpop.permute.xlu1 %5784 }
0x23b5   :  { %7984 = vmatmul.mubr.msk.f32.vlgmr.msra.gmra.mrb[10].mxu1 %vm439_vm0, %v5785_v37 }
0x23b6   :  { %8252 = vmatpush1.bf16.msra.mxu1 %v11087_v62  ;;  %6818 = vmatprep.mubr.f32.mxu1 %v11107_v23 }
0x23b7   :  { %8254 = vmatprep.subr.bf16.mxu1 %v11108_v18 }
0x23b8   :  { %v5861_v29 = vpop.permute.xlu1 %5860 }
0x23b9   :  { %8122 = vmatmul.mubr.msk.f32.vlgmr.msra.gmra.mrb[14].mxu0 %vm439_vm0, %v5861_v29 }
0x23ba   :  { %8259 = vmatpush3.bf16.msra.mxu0 %v11109_v17  ;;  %8132 = vmatprep.mubr.msk.f32.mxu0 %vm8899_vm1, %v11107_v23 }
0x23bb   :  { %8260 = vmatprep.subr.bf16.mxu0 %v11110_v2  ;;  %8256 = vmatpush1.bf16.msra.mxu1 %v11111_v22 }
0x23bc   :  { %8263 = vmatprep.subr.bf16.mxu1 %v11110_v2 }
0x23be   :  { %8262 = vmatpush3.bf16.msra.mxu0 %v11112_v59 }
0x23bf   :  { %8269 = vmatprep.subr.bf16.mxu0 %v11110_v2 }
0x2488   :  { %v10437_v62 = vpop.f32.mrb[10].mxu1 }
0x2489   :  { %11113 = vst [vmem:[#allocation37_spill] sm:$0xff] %v10437_v62  ;;  %v5856_v47 = vpop.f32.mrb[11].mxu1 }
0x248c   :  { %v5930_v58 = vpop.f32.mrb[14].mxu0 }
0x248d   :  { %v5934_v49 = vadd.f32 %v5930_v58, %v5856_v47  ;;  %v8123_v40 = vpop.f32.mrb[15].mxu0 }
0x248f   :  { %v5942_v8 = vrot.slane %v5934_v49, %v9073_v31 }
0x2491   :  { %v5950_v3 = vrot.slane %v5942_v8, %v9073_v31  ;;  %v5943_v33 = vcombine.high %v5942_v8, %v5942_v8 }
0x2493   :  { %v5963_v19 = vrot.slane %v5950_v3, %v9232_v0  ;;  %v5957_v27 = vrot.slane %v5943_v33, %v9073_v31  ;;  %v5958_v34 = vcombine.high %v5950_v3, %v5950_v3 }
0x2495   :  { %v5983_v48 = vrot.slane %v5963_v19, %v9073_v31  ;;  %v5967_v24 = vrot.slane %v5957_v27, %v9232_v0  ;;  %v5976_v43 = vcombine.high %v5963_v19, %v5963_v19  ;;  %v5959_v37 = vcombine.high %v5957_v27, %v5957_v27 }
0x2496   :  { %v5971_v17 = vrot.slane %v5958_v34, %v9232_v0 }
0x2497   :  { %v5991_v45 = vcombine.high %v5983_v48, %v5983_v48  ;;  %v5990_v61 = vrot.slane %v5976_v43, %v9073_v31  ;;  %v6024_v38 = vcombine.high %v5967_v24, %v5967_v24  ;;  %v5999_v18 = vrot.slane %v5983_v48, %v9073_v31  ;;  %v11114_v48 = vld [vmem:[#allocation22_spill] sm:$0xff] }
0x2498   :  { %v6031_v29 = vrot.slane %v5967_v24, %v9073_v31  ;;  %v5975_v58 = vrot.slane %v5959_v37, %v9232_v0  ;;  %v6072_v33 = vcombine.high %v5971_v17, %v5971_v17  ;;  %v6079_v27 = vrot.slane %v5971_v17, %v9073_v31  ;;  %v11117_v17 = vld [vmem:[#allocation26_spill] sm:$0xff] }
0x2499   :  { %v6013_v22 = vrot.slane %v5991_v45, %v9073_v31  ;;  %v5992_v59 = vcombine.high %v5990_v61, %v5990_v61  ;;  %v6038_v47 = vrot.slane %v6024_v38, %v9073_v31  ;;  %v6006_v49 = vrot.slane %v5990_v61, %v9073_v31  ;;  %v11115_v38 = vld [vmem:[#allocation23_spill] sm:$0xff] }
0x249a   :  { %v6021_v40 = vcombine.high %v5999_v18, %v5999_v18  ;;  %v6039_v8 = vcombine.high %v6031_v29, %v6031_v29  ;;  %v6047_v19 = vrot.slane %v6031_v29, %v9073_v31  ;;  %v6196_v24 = vadd.f32 %v5999_v18, %v11114_v48 }
0x249b   :  { %v6023_v3 = vcombine.high %v6013_v22, %v6013_v22  ;;  %v6020_v43 = vrot.slane %v5992_v59, %v9073_v31  ;;  %v6040_v34 = vcombine.high %v6038_v47, %v6038_v47  ;;  %v6054_v45 = vrot.slane %v6038_v47, %v9073_v31  ;;  %v11118_v59 = vld [vmem:[#allocation25_spill] sm:$0xff] }
0x249c   :  { %v6197_v2 = vadd.f32 %v6013_v22, %v11115_v38  ;;  %v6022_v37 = vcombine.high %v6006_v49, %v6006_v49  ;;  %v6061_v61 = vrot.slane %v6039_v8, %v9073_v31  ;;  %v6120_v23 = vcombine.high %v5975_v58, %v5975_v58  ;;  %v11119_v38 = vld [vmem:[#allocation27_spill] sm:$0xff] }
0x249d   :  { %v6198_v15 = vadd.f32 %v6021_v40, %v11116_v13  ;;  %v6086_v62 = vrot.slane %v6072_v33, %v9073_v31  ;;  %v6127_v29 = vrot.slane %v5975_v58, %v9073_v31  ;;  %v6199_v26 = vadd.f32 %v6023_v3, %v11117_v17  ;;  %v11120_v17 = vld [vmem:[#allocation28_spill] sm:$0xff] }
0x249e   :  { %v6069_v18 = vcombine.high %v6047_v19, %v6047_v19  ;;  %v6087_v48 = vcombine.high %v6079_v27, %v6079_v27  ;;  %v6200_v21 = vadd.f32 %v6006_v49, %v11118_v59  ;;  %8671 = vtanh.f32 %v6196_v24 }
0x249f   :  { %v6068_v47 = vrot.slane %v6040_v34, %v9073_v31  ;;  %v6070_v22 = vcombine.high %v6054_v45, %v6054_v45  ;;  %v6201_v11 = vadd.f32 %v6020_v43, %v11119_v38  ;;  %8673 = vtanh.f32 %v6197_v2  ;;  %v11121_v34 = vld [vmem:[#allocation17_spill] sm:$0xff] }
0x24a0   :  { %v6071_v8 = vcombine.high %v6061_v61, %v6061_v61  ;;  %v6134_v40 = vrot.slane %v6120_v23, %v9073_v31  ;;  %v6202_v33 = vadd.f32 %v6022_v37, %v9308_v28  ;;  %8675 = vtanh.f32 %v6198_v15  ;;  %v11122_v23 = vld [vmem:[#allocation18_spill] sm:$0xff]  ;;  %v11123_v37 = vld [vmem:[#allocation19_spill] sm:$0xff] }
0x24a1   :  { %v6095_v58 = vrot.slane %v6079_v27, %v9073_v31  ;;  %v6135_v3 = vcombine.high %v6127_v29, %v6127_v29  ;;  %v6203_v13 = vadd.f32 %v6047_v19, %v11120_v17  ;;  %8677 = vtanh.f32 %v6199_v26 }
0x24a2   :  { %v6088_v49 = vcombine.high %v6086_v62, %v6086_v62  ;;  %v6109_v24 = vrot.slane %v6087_v48, %v9073_v31  ;;  %v6204_v59 = vadd.f32 %v6061_v61, %v11121_v34  ;;  %8679 = vtanh.f32 %v6200_v21 }
0x24a3   :  { %v6102_v2 = vrot.slane %v6086_v62, %v9073_v31  ;;  %v6143_v43 = vrot.slane %v6127_v29, %v9073_v31  ;;  %v6205_v38 = vadd.f32 %v6069_v18, %v11122_v23  ;;  %8681 = vtanh.f32 %v6201_v11  ;;  %v11124_v29 = vld [vmem:[#allocation20_spill] sm:$0xff]  ;;  %v11125_v23 = vld [vmem:[#allocation21_spill] sm:$0xff] }
0x24a4   :  { %v6136_v15 = vcombine.high %v6134_v40, %v6134_v40  ;;  %v10477_v27 = vrot.slane %v6134_v40, %v9073_v31  ;;  %v6206_v19 = vadd.f32 %v6071_v8, %v9263_v25  ;;  %8683 = vtanh.f32 %v6202_v33 }
0x24a5   :  { %v6117_v26 = vcombine.high %v6095_v58, %v6095_v58  ;;  %v6157_v48 = vrot.slane %v6135_v3, %v9073_v31  ;;  %v6207_v61 = vadd.f32 %v6054_v45, %v11123_v37  ;;  %8685 = vtanh.f32 %v6203_v13 }
0x24a6   :  { %v6116_v21 = vrot.slane %v6088_v49, %v9073_v31  ;;  %v6119_v62 = vcombine.high %v6109_v24, %v6109_v24  ;;  %v6208_v34 = vadd.f32 %v6068_v47, %v11124_v29  ;;  %8687 = vtanh.f32 %v6204_v59  ;;  %v11126_v29 = vld [vmem:[#allocation29_spill] sm:$0xff] }
0x24a7   :  { %v6118_v11 = vcombine.high %v6102_v2, %v6102_v2  ;;  %v6165_v18 = vcombine.high %v6143_v43, %v6143_v43  ;;  %v6209_v40 = vadd.f32 %v6070_v22, %v11125_v23  ;;  %8689 = vtanh.f32 %v6205_v38 }
0x24a8   :  { %v8672_v17 = vpop.eup %8671  ;;  %v6164_v8 = vrot.slane %v6136_v15, %v9073_v31  ;;  %v6166_v33 = vcombine.high %v10477_v27, %v10477_v27  ;;  %v6210_v45 = vadd.f32 %v6095_v58, %v9277_v44  ;;  %8691 = vtanh.f32 %v6206_v19 }
0x24a9   :  { %v8674_v13 = vpop.eup %8673  ;;  %v6167_v3 = vcombine.high %v6157_v48, %v6157_v48  ;;  %v6211_v49 = vadd.f32 %v6109_v24, %v9285_v55  ;;  %v6212_v59 = vadd.f32 %v6117_v26, %v9320_v50  ;;  %8693 = vtanh.f32 %v6207_v61 }
0x24aa   :  { %v8676_v47 = vpop.eup %8675  ;;  %v6213_v22 = vadd.f32 %v6119_v62, %v11126_v29  ;;  %8695 = vtanh.f32 %v6208_v34  ;;  %v6252_v38 = vmul.f32 %v8672_v17, %v9204_v53  ;;  %v6253_v15 = vmul.f32 %v8674_v13, %v9211_v57 }
0x24ab   :  { %v8678_v23 = vpop.eup %8677  ;;  %v6214_v37 = vadd.f32 %v6102_v2, %v9340_v30  ;;  %v6215_v58 = vadd.f32 %v6116_v21, %v9349_v32  ;;  %v6216_v19 = vadd.f32 %v6118_v11, %v9343_v20  ;;  %8697 = vtanh.f32 %v6209_v40 }
0x24ac   :  { %v8680_v24 = vpop.eup %8679  ;;  %8699 = vtanh.f32 %v6210_v45  ;;  %v6254_v26 = vmul.f32 %v8676_v47, %v9239_v5  ;;  %v6255_v61 = vmul.f32 %v8678_v23, %v9248_v10  ;;  %v6308_v62 = vcombine.low %v6252_v38, %v6253_v15 }
0x24ad   :  { %v8682_v34 = vpop.eup %8681  ;;  %v6217_v17 = vadd.f32 %v6143_v43, %v9352_v63  ;;  %v6218_v13 = vadd.f32 %v6157_v48, %v9355_v46  ;;  %v6219_v29 = vadd.f32 %v6165_v18, %v9366_v16  ;;  %8701 = vtanh.f32 %v6211_v49 }
0x24ae   :  { %v8684_v2 = vpop.eup %8683  ;;  %8703 = vtanh.f32 %v6212_v59  ;;  %v6256_v21 = vmul.f32 %v8680_v24, %v9208_v56  ;;  %v6257_v11 = vmul.f32 %v8682_v34, %v9235_v4  ;;  %v6309_v40 = vcombine.low %v6254_v26, %v6255_v61 }
0x24af   :  { %v8686_v45 = vpop.eup %8685  ;;  %v6220_v47 = vadd.f32 %v6167_v3, %v9315_v35  ;;  %v6221_v23 = vadd.f32 %v10477_v27, %v9324_v6  ;;  %8705 = vtanh.f32 %v6213_v22  ;;  %v6258_v43 = vmul.f32 %v8684_v2, %v9244_v9 }
0x24b0   :  { %v8688_v48 = vpop.eup %8687  ;;  %8707 = vtanh.f32 %v6214_v37  ;;  %v6310_v18 = vcombine.low %v6256_v21, %v6257_v11  ;;  %v6317_v49 = vrot.slane %v6308_v62, %v9073_v31  ;;  %v6324_v59 = vrot.slane %v6309_v40, %v9073_v31 }
0x24b1   :  { %v8690_v38 = vpop.eup %8689  ;;  %v6222_v15 = vadd.f32 %v6164_v8, %v9329_v1  ;;  %8709 = vtanh.f32 %v6215_v58  ;;  %v6259_v24 = vmul.f32 %v8686_v45, %v9204_v53  ;;  %v6260_v3 = vmul.f32 %v8688_v48, %v9211_v57 }
0x24b2   :  { %v8692_v26 = vpop.eup %8691  ;;  %8711 = vtanh.f32 %v6216_v19  ;;  %v6331_v27 = vrot.slane %v6310_v18, %v9073_v31  ;;  %v6338_v22 = vrot.slane %v6258_v43, %v9073_v31  ;;  %v6339_v37 = vcombine.low %v6317_v49, %v6324_v59 }
0x24b3   :  { %v8694_v61 = vpop.eup %8693  ;;  %8713 = vtanh.f32 %v6217_v17  ;;  %v6261_v62 = vmul.f32 %v8690_v38, %v9239_v5  ;;  %v6262_v34 = vmul.f32 %v8692_v26, %v9248_v10  ;;  %v6356_v2 = vcombine.low %v6259_v24, %v6260_v3 }
0x24b4   :  { %v8696_v8 = vpop.eup %8695  ;;  %v6223_v58 = vadd.f32 %v6166_v33, %v9334_v14  ;;  %8715 = vtanh.f32 %v6218_v13  ;;  %v6340_v21 = vcombine.low %v6331_v27, %v6338_v22  ;;  %v6347_v11 = vrot.slane %v6339_v37, %v9073_v31 }
0x24b5   :  { %v8698_v19 = vpop.eup %8697  ;;  %8717 = vtanh.f32 %v6219_v29  ;;  %v6263_v40 = vmul.f32 %v8694_v61, %v9208_v56  ;;  %v6264_v45 = vmul.f32 %v8696_v8, %v9235_v4  ;;  %v6357_v43 = vcombine.low %v6261_v62, %v6262_v34 }
0x24b6   :  { %v8700_v17 = vpop.eup %8699  ;;  %8719 = vtanh.f32 %v6220_v47  ;;  %v6354_v48 = vrot.slane %v6340_v21, %v9073_v31  ;;  %v6265_v18 = vmul.f32 %v8698_v19, %v9244_v9  ;;  %v6365_v13 = vrot.slane %v6356_v2, %v9073_v31 }
0x24b7   :  { %v8702_v49 = vpop.eup %8701  ;;  %8721 = vtanh.f32 %v6221_v23  ;;  %v6358_v33 = vcombine.low %v6263_v40, %v6264_v45  ;;  %v6372_v59 = vrot.slane %v6357_v43, %v9073_v31  ;;  %v6266_v24 = vmul.f32 %v8700_v17, %v9204_v53 }
0x24b8   :  { %v8704_v38 = vpop.eup %8703  ;;  %8723 = vtanh.f32 %v6222_v15  ;;  %v6355_v29 = vcombine.low %v6347_v11, %v6354_v48  ;;  %v6267_v3 = vmul.f32 %v8702_v49, %v9211_v57  ;;  %v6386_v27 = vrot.slane %v6265_v18, %v9073_v31 }
0x24b9   :  { %v8706_v26 = vpop.eup %8705  ;;  %8725 = vtanh.f32 %v6223_v58  ;;  %v6379_v47 = vrot.slane %v6358_v33, %v9073_v31  ;;  %v6387_v22 = vcombine.low %v6365_v13, %v6372_v59  ;;  %v6268_v61 = vmul.f32 %v8704_v38, %v9239_v5 }
0x24ba   :  { %v8708_v23 = vpop.eup %8707  ;;  %v6504_v37 = vsel %vm1639_vm2, %v6355_v29, 0.0  ;;  %v6269_v62 = vmul.f32 %v8706_v26, %v9248_v10  ;;  %v6404_v15 = vcombine.low %v6266_v24, %v6267_v3 }
0x24bb   :  { %v8710_v34 = vpop.eup %8709  ;;  %6505 = vadd.xlane.f32.xlu1 %v6504_v37  ;;  %v6388_v2 = vcombine.low %v6379_v47, %v6386_v27  ;;  %v6395_v8 = vrot.slane %v6387_v22, %v9073_v31  ;;  %v6270_v58 = vmul.f32 %v8708_v23, %v9208_v56 }
0x24bc   :  { %v8712_v21 = vpop.eup %8711  ;;  %v6271_v11 = vmul.f32 %v8710_v34, %v9235_v4  ;;  %v6405_v19 = vcombine.low %v6268_v61, %v6269_v62  ;;  %v6413_v18 = vrot.slane %v6404_v15, %v9073_v31 }
0x24bd   :  { %v8714_v40 = vpop.eup %8713  ;;  %v6402_v45 = vrot.slane %v6388_v2, %v9073_v31  ;;  %v6272_v43 = vmul.f32 %v8712_v21, %v9244_v9 }
0x24be   :  { %v8716_v17 = vpop.eup %8715  ;;  %v6406_v48 = vcombine.low %v6270_v58, %v6271_v11  ;;  %v6420_v49 = vrot.slane %v6405_v19, %v9073_v31  ;;  %v6273_v59 = vmul.f32 %v8714_v40, %v9204_v53 }
0x24bf   :  { %v8718_v33 = vpop.eup %8717  ;;  %v6403_v13 = vcombine.low %v6395_v8, %v6402_v45  ;;  %v6274_v38 = vmul.f32 %v8716_v17, %v9211_v57  ;;  %v6434_v3 = vrot.slane %v6272_v43, %v9073_v31 }
0x24c0   :  { %v8720_v29 = vpop.eup %8719  ;;  %v6427_v24 = vrot.slane %v6406_v48, %v9073_v31  ;;  %v6435_v26 = vcombine.low %v6413_v18, %v6420_v49  ;;  %v6275_v22 = vmul.f32 %v8718_v33, %v9239_v5 }
0x24c1   :  { %v8722_v47 = vpop.eup %8721  ;;  %v6507_v27 = vsel %vm1639_vm2, %v6403_v13, 0.0  ;;  %v6276_v23 = vmul.f32 %v8720_v29, %v9248_v10  ;;  %v6452_v37 = vcombine.low %v6273_v59, %v6274_v38 }
0x24c2   :  { %v8724_v61 = vpop.eup %8723  ;;  %6508 = vadd.xlane.f32.xlu0 %v6507_v27  ;;  %v6436_v62 = vcombine.low %v6427_v24, %v6434_v3  ;;  %v6443_v15 = vrot.slane %v6435_v26, %v9073_v31  ;;  %v6277_v2 = vmul.f32 %v8722_v47, %v9208_v56 }
0x24c3   :  { %v8726_v34 = vpop.eup %8725  ;;  %v6278_v8 = vmul.f32 %v8724_v61, %v9235_v4  ;;  %v6453_v21 = vcombine.low %v6275_v22, %v6276_v23  ;;  %v6461_v40 = vrot.slane %v6452_v37, %v9073_v31 }
0x24c4   :  { %v6279_v58 = vmul.f32 %v8726_v34, %v9244_v9  ;;  %v6450_v11 = vrot.slane %v6436_v62, %v9073_v31 }
0x24c5   :  { %v6454_v19 = vcombine.low %v6277_v2, %v6278_v8  ;;  %v6468_v45 = vrot.slane %v6453_v21, %v9073_v31 }
0x24c6   :  { %v6451_v43 = vcombine.low %v6443_v15, %v6450_v11  ;;  %v6482_v48 = vrot.slane %v6279_v58, %v9073_v31 }
0x24c7   :  { %v6475_v17 = vrot.slane %v6454_v19, %v9073_v31  ;;  %v6483_v18 = vcombine.low %v6461_v40, %v6468_v45 }
0x24c8   :  { %v6510_v49 = vsel %vm1639_vm2, %v6451_v43, 0.0 }
0x24c9   :  { %v6484_v33 = vcombine.low %v6475_v17, %v6482_v48  ;;  %v6491_v13 = vrot.slane %v6483_v18, %v9073_v31  ;;  %6511 = vadd.xlane.f32.xlu0 %v6510_v49 }
0x24cb   :  { %v6498_v59 = vrot.slane %v6484_v33, %v9073_v31 }
0x24cd   :  { %v6499_v38 = vcombine.low %v6491_v13, %v6498_v59 }
0x24cf   :  { %v6513_v29 = vsel %vm1639_vm2, %v6499_v38, 0.0 }
0x24d0   :  { %6514 = vadd.xlane.f32.xlu1 %v6513_v29 }
0x2548   :  { %v6506_v3 = vpop.xlane.xlu1 %6505 }
0x2549   :  { %v6516_v22 = vadd.f32 %v6506_v3, %v9470_v39 }
0x254b   :  { %v6527_v61 = vrot.slane %v6516_v22, %v9468_v36 }
0x254f   :  { %v6509_v24 = vpop.xlane.xlu0 %6508 }
0x2550   :  { %v6517_v26 = vadd.f32 %v6509_v24, %v9470_v39 }
0x2552   :  { %v6531_v23 = vrot.slane %v6517_v26, %v9468_v36 }
0x2554   :  { %v6540_v15 = vsel %vm1687_vm3, %v6531_v23, %v6527_v61 }
0x2556   :  { %v6512_v47 = vpop.xlane.xlu0 %6511 }
0x2557   :  { %v6518_v27 = vadd.f32 %v6512_v47, %v9470_v39 }
0x2559   :  { %v6535_v37 = vrot.slane %v6518_v27, %v9468_v36 }
0x255b   :  { %v6541_v2 = vsel %vm1689_vm4, %v6535_v37, %v6540_v15 }
0x255d   :  { %v6515_v62 = vpop.xlane.xlu1 %6514 }
0x255e   :  { %v6519_v34 = vadd.f32 %v6515_v62, %v9470_v39 }
0x2560   :  { %v6539_v8 = vrot.slane %v6519_v34, %v9468_v36 }
0x2562   :  { %v6542_v21 = vsel %vm1691_vm5, %v6539_v8, %v6541_v2 }
0x2563   :  { %v6544_v58 = vsel %vm1694_vm6, %v6542_v21, -inf }
0x2564   :  { %6545 = vmax.xlane.f32.xlu0 %v6544_v58 }
0x25f1   :  { %v6546_v11 = vpop.xlane.xlu0 %6545 }
0x25f2   :  { %v6551_v19 = vrot.slane %v6546_v11, %v9232_v0  ;;  %v6555_v40 = vrot.slane %v6546_v11, %v9485_v60  ;;  %v6559_v45 = vrot.slane %v6546_v11, %v9488_v54  ;;  %v6563_v43 = vrot.slane %v6546_v11, %v9493_v51 }
0x25f4   :  { %v6568_v17 = vsub.f32 %v6516_v22, %v6551_v19  ;;  %v6569_v48 = vsub.f32 %v6517_v26, %v6555_v40  ;;  %v6570_v18 = vsub.f32 %v6518_v27, %v6559_v45  ;;  %v6571_v13 = vsub.f32 %v6519_v34, %v6563_v43 }
0x25f6   :  { %v6572_v49 = vmul.f32 1.442695, %v6568_v17  ;;  %v6574_v33 = vmul.f32 1.442695, %v6569_v48  ;;  %v6576_v59 = vmul.f32 1.442695, %v6570_v18 }
0x25f7   :  { %v6578_v38 = vmul.f32 1.442695, %v6571_v13 }
0x25f8   :  { %8727 = vpow2.f32 %v6572_v49 }
0x25f9   :  { %8729 = vpow2.f32 %v6574_v33 }
0x25fa   :  { %8731 = vpow2.f32 %v6576_v59 }
0x25fb   :  { %8733 = vpow2.f32 %v6578_v38 }
0x2602   :  { %v8728_v29 = vpop.eup %8727 }
0x2603   :  { %v8730_v24 = vpop.eup %8729  ;;  %6585 = vperm.xlu1 %8302, %v8728_v29  }
0x2604   :  { %6588 = vperm.xlu0 %8298, %v8730_v24   ;;  %v8732_v3 = vpop.eup %8731 }
0x2605   :  { %v8734_v47 = vpop.eup %8733 }
0x2607   :  { %6591 = vperm.xlu1 %8302, %v8732_v3  }
0x260b   :  { %6594 = vperm.xlu1 %8302, %v8734_v47  }
0x2682   :  { %v6586_v22 = vpop.permute.xlu1 %6585 }
0x2683   :  { %v6589_v26 = vpop.permute.xlu0 %6588  ;;  %v6599_v37 = vrot.slane %v6586_v22, %v9468_v36 }
0x2684   :  { %v6603_v23 = vrot.slane %v6589_v26, %v9468_v36 }
0x2686   :  { %v6592_v27 = vpop.permute.xlu1 %6591  ;;  %v6612_v15 = vsel %vm1687_vm3, %v6603_v23, %v6599_v37 }
0x2687   :  { %v6607_v61 = vrot.slane %v6592_v27, %v9468_v36 }
0x2689   :  { %v6613_v2 = vsel %vm1689_vm4, %v6607_v61, %v6612_v15 }
0x268a   :  { %v6595_v62 = vpop.permute.xlu1 %6594 }
0x268b   :  { %v6611_v34 = vrot.slane %v6595_v62, %v9468_v36 }
0x268d   :  { %v6614_v8 = vsel %vm1691_vm5, %v6611_v34, %v6613_v2 }
0x268e   :  { %v6616_v21 = vsel %vm1694_vm6, %v6614_v8, 0.0 }
0x268f   :  { %6617 = vadd.xlane.f32.xlu0 %v6616_v21 }
0x271c   :  { %v6618_v58 = vpop.xlane.xlu0 %6617 }
0x271d   :  { %8735 = vrcp.f32 %v6618_v58 }
0x2727   :  { %v8736_v11 = vpop.eup %8735 }
0x2728   :  { %v6620_v19 = vmul.f32 %v8736_v11, %v6618_v58 }
0x272a   :  { %v6621_v40 = vsub.f32 2.0, %v6620_v19 }
0x272c   :  { %v6622_v45 = vmul.f32 %v8736_v11, %v6621_v40 }
0x272e   :  { %v6631_v43 = vrot.slane %v6622_v45, %v9485_v60  ;;  %v6635_v48 = vrot.slane %v6622_v45, %v9488_v54  ;;  %v6627_v49 = vrot.slane %v6622_v45, %v9232_v0  ;;  %v6639_v13 = vrot.slane %v6622_v45, %v9493_v51 }
0x2730   :  { %v6645_v17 = vmul.f32 %v8730_v24, %v6631_v43  ;;  %v6646_v18 = vmul.f32 %v8732_v3, %v6635_v48  ;;  %v6644_v33 = vmul.f32 %v8728_v29, %v6627_v49  ;;  %v6647_v59 = vmul.f32 %v8734_v47, %v6639_v13 }
0x2732   :  { %6655 = vperm.xlu1 %8302, %v6645_v17  }
0x2736   :  { %6660 = vperm.xlu1 %8302, %v6646_v18  }
0x273a   :  { %6650 = vperm.xlu1 %8302, %v6644_v33  }
0x273e   :  { %6665 = vperm.xlu1 %8302, %v6647_v59  }
0x27b1   :  { %v6656_v38 = vpop.permute.xlu1 %6655 }
0x27b2   :  { %v6669_v22 = vmul.f32 %v10361_v12, %v6656_v38 }
0x27b4   :  { %v6679_v26 = vsel %vm1639_vm2, %v6669_v22, 0.0 }
0x27b5   :  { %v6680_v27 = vrot.slane %v6679_v26, 4  ;;  %v6661_v24 = vpop.permute.xlu1 %6660 }
0x27b6   :  { %v6670_v23 = vmul.f32 %v10368_v52, %v6661_v24 }
0x27b7   :  { %v6681_v37 = vadd.f32 %v6680_v27, %v6679_v26 }
0x27b8   :  { %v6686_v3 = vsel %vm1639_vm2, %v6670_v23, 0.0 }
0x27b9   :  { %v6682_v61 = vrot.slane %v6681_v37, 2  ;;  %v6687_v62 = vrot.slane %v6686_v3, 4  ;;  %v6651_v29 = vpop.permute.xlu1 %6650 }
0x27ba   :  { %v6668_v15 = vmul.f32 %v10375_v41, %v6651_v29 }
0x27bb   :  { %v6683_v34 = vadd.f32 %v6682_v61, %v6681_v37  ;;  %v6688_v47 = vadd.f32 %v6687_v62, %v6686_v3 }
0x27bc   :  { %v6672_v2 = vsel %vm1639_vm2, %v6668_v15, 0.0 }
0x27bd   :  { %v6689_v8 = vrot.slane %v6688_v47, 2  ;;  %v6673_v12 = vrot.slane %v6672_v2, 4  ;;  %v6666_v21 = vpop.permute.xlu1 %6665  ;;  %v6684_v11 = vrot.slane %v6683_v34, 1 }
0x27be   :  { %v6671_v58 = vmul.f32 %v10382_v42, %v6666_v21  ;;  %v11128_v21 = vmov 0  }
0x27bf   :  { %v6690_v19 = vadd.f32 %v6689_v8, %v6688_v47  ;;  %v6674_v52 = vadd.f32 %v6673_v12, %v6672_v2  ;;  %v6685_v48 = vadd.f32 %v6684_v11, %v6683_v34  ;;  %v8908_v47 = vmov 5   ;;  %v11127_v8 = vld [vmem:[#allocation34_spill] sm:$0xff] }
0x27c0   :  { %v6693_v40 = vsel %vm1639_vm2, %v6671_v58, 0.0  ;;  %8303 = vset.pattern.permute.xlu0 %v8908_v47  ;;  %v11129_v58 = vld [vmem:[#allocation35_spill] sm:$0xff] }
0x27c1   :  { %v6675_v45 = vrot.slane %v6674_v52, 2  ;;  %v6694_v43 = vrot.slane %v6693_v40, 4  ;;  %v6691_v17 = vrot.slane %v6690_v19, 1  ;;  %v6701_v59 = vmul.f32 %v10389_v7, %v6685_v48 }
0x27c3   :  { %v6676_v18 = vadd.f32 %v6675_v45, %v6674_v52  ;;  %v6695_v41 = vadd.f32 %v6694_v43, %v6693_v40  ;;  %v6692_v13 = vadd.f32 %v6691_v17, %v6690_v19  ;;  %v6708_v24 = vrot.slane %v6701_v59, 7  ;;  %v11130_v19 = vld [vmem:[#allocation37_spill] sm:$0xff]  ;;  %v11131_v40 = vld [vmem:[#allocation38_spill] sm:$0xff] }
0x27c5   :  { %v6677_v49 = vrot.slane %v6676_v18, 1  ;;  %v6696_v33 = vrot.slane %v6695_v41, 2  ;;  %v6702_v27 = vmul.f32 %v10389_v7, %v6692_v13  ;;  %v11132_v13 = vld [vmem:[#allocation36_spill] sm:$0xff] }
0x27c7   :  { %v6678_v38 = vadd.f32 %v6677_v49, %v6676_v18  ;;  %v6697_v22 = vadd.f32 %v6696_v33, %v6695_v41  ;;  %v6710_v61 = vrot.slane %v6702_v27, 6 }
0x27c9   :  { %v6700_v42 = vmul.f32 %v10389_v7, %v6678_v38  ;;  %v6698_v26 = vrot.slane %v6697_v22, 1 }
0x27cb   :  { %v6699_v23 = vadd.f32 %v6698_v26, %v6697_v22  ;;  %v6709_v3 = vsel %vm1687_vm3, %v6708_v24, %v6700_v42 }
0x27cc   :  { %v6711_v29 = vsel %vm1689_vm4, %v6710_v61, %v6709_v3 }
0x27cd   :  { %v6703_v37 = vmul.f32 %v10389_v7, %v6699_v23  ;;  %v11133_v23 = vmov 0.0  }
0x27cf   :  { %v6712_v62 = vrot.slane %v6703_v37, 5 }
0x27d1   :  { %v6713_v15 = vsel %vm1691_vm5, %v6712_v62, %v6711_v29 }
0x27d2   :  { %v6715_v34 = vsel %vm1872_vm7, %v6713_v15, 0.0 }
0x27d3   :  { %6716 = vadd.xlane.f32.xlu1 %v6715_v34 }
0x2860   :  { %v6717_v2 = vpop.xlane.xlu1 %6716 }
0x2861   :  { %v6718_v12 = vadd.f32 %v6717_v2, %v11127_v8 }
0x2863   :  { %6721 = vperm.xlu0 %8303, %v6718_v12  }
0x2867   :  { %8304 = vset.pattern.permute.xlu0 %v11128_v21 }
0x28e2   :  { %v6722_v7 = vpop.permute.xlu0 %6721 }
0x28e3   :  { %v6724_v11 = vmul.f32 %v11129_v58, %v6722_v7 }
0x28e5   :  { %v6725_v52 = vadd.f32 %v6724_v11, %v11130_v19 }
0x28e7   :  { %v6726_v45 = vadd.f32 %v11131_v40, %v6725_v52 }
0x28e9   :  { %8737 = vtanh.f32 %v6726_v45  ;;  %v6727_v17 = vmul.f32 0.5, %v6726_v45 }
0x28eb   :  { %8739 = vtanh.f32 %v6727_v17 }
0x28f3   :  { %v8738_v43 = vpop.eup %8737 }
0x28f4   :  { %6734 = vrot.lane.b32.xlu1 %v8738_v43, %s8901_s4 }
0x28f5   :  { %v8740_v48 = vpop.eup %8739 }
0x28f6   :  { %v6729_v18 = vadd.f32 1.0, %v8740_v48 }
0x28f8   :  { %v6730_v41 = vmul.f32 0.5, %v6729_v18 }
0x28fa   :  { %v6732_v59 = vmul.f32 %v6730_v41, %v11132_v13 }
0x2966   :  { %v6735_v49 = vpop.permute.xlu1 %6734 }
0x2967   :  { %v6737_v33 = vmul.f32 %v6735_v49, %v6730_v41 }
0x2969   :  { %6739 = vrot.lane.b32.xlu1 %v6737_v33, %s8902_s23 }
0x29db   :  { %v6740_v38 = vpop.permute.xlu1 %6739 }
0x29dc   :  { %v10611_v22 = vadd.f32 %v6740_v38, %v6732_v59 }
0x29de   :  { %8741 = vtanh.f32 %v10611_v22 }
0x29e8   :  { %v8742_v42 = vpop.eup %8741 }
0x29e9   :  { %6745 = vrot.lane.b32.xlu1 %v8742_v42, %s8901_s4 }
0x29ed   :  { %6826 = vrot.lane.b32.xlu1 %v10611_v22, %s8903_s9 }
0x2a5b   :  { %v6746_v26 = vpop.permute.xlu1 %6745 }
0x2a5c   :  { %v6748_v27 = vmul.f32 %v6746_v26, %v6730_v41 }
0x2a5e   :  { %6750 = vrot.lane.b32.xlu0 %v6748_v27, %s8902_s23 }
0x2a5f   :  { %v6827_v24 = vpop.permute.xlu1 %6826 }
0x2a60   :  { %8133 = vmatmul.mubr.msk.f32.vlgmr.msra.gmra.mrb[16].mxu0 %vm439_vm0, %v6827_v24 }
0x2a61   :  { %8154 = vmatprep.mubr.msk.f32.mxu0 %vm8899_vm1, %v11133_v23 }
0x2ad0   :  { %v6751_v37 = vpop.permute.xlu0 %6750 }
0x2ad1   :  { %7986 = vmatmul.mubr.msk.f32.vlgmr.msra.gmra.mrb[12].mxu1 %vm439_vm0, %v6751_v37  ;;  %v11134_v37 = vld [vmem:[#allocation22_spill] sm:$0xff] }
0x2ad2   :  { %8143 = vmatprep.mubr.msk.f32.mxu1 %vm8899_vm1, %v11133_v23 }
0x2b33   :  { %v6896_v3 = vpop.f32.mrb[16].mxu0 }
0x2b34   :  { %v8134_v61 = vpop.f32.mrb[17].mxu0 }
0x2ba4   :  { %v10624_v62 = vpop.f32.mrb[12].mxu1 }
0x2ba5   :  { %v6822_v29 = vpop.f32.mrb[13].mxu1 }
0x2ba6   :  { %v6900_v15 = vadd.f32 %v6896_v3, %v6822_v29 }
0x2ba8   :  { %v6908_v34 = vrot.slane %v6900_v15, %v9073_v31 }
0x2baa   :  { %v6916_v47 = vrot.slane %v6908_v34, %v9073_v31  ;;  %v6909_v2 = vcombine.high %v6908_v34, %v6908_v34  ;;  %v11135_v34 = vld [vmem:[#allocation23_spill] sm:$0xff] }
0x2bac   :  { %v6929_v12 = vrot.slane %v6916_v47, %v9232_v0  ;;  %v6923_v21 = vrot.slane %v6909_v2, %v9073_v31  ;;  %v6924_v19 = vcombine.high %v6916_v47, %v6916_v47 }
0x2bae   :  { %v6949_v7 = vrot.slane %v6929_v12, %v9073_v31  ;;  %v6933_v58 = vrot.slane %v6923_v21, %v9232_v0  ;;  %v6942_v11 = vcombine.high %v6929_v12, %v6929_v12  ;;  %v6925_v43 = vcombine.high %v6923_v21, %v6923_v21 }
0x2baf   :  { %v6937_v18 = vrot.slane %v6924_v19, %v9232_v0 }
0x2bb0   :  { %v6957_v52 = vcombine.high %v6949_v7, %v6949_v7  ;;  %v6956_v40 = vrot.slane %v6942_v11, %v9073_v31  ;;  %v6990_v45 = vcombine.high %v6933_v58, %v6933_v58  ;;  %v6965_v17 = vrot.slane %v6949_v7, %v9073_v31  ;;  %v11136_v7 = vld [vmem:[#allocation24_spill] sm:$0xff] }
0x2bb1   :  { %v6997_v48 = vrot.slane %v6933_v58, %v9073_v31  ;;  %v6941_v13 = vrot.slane %v6925_v43, %v9232_v0  ;;  %v7038_v27 = vcombine.high %v6937_v18, %v6937_v18  ;;  %v7045_v23 = vrot.slane %v6937_v18, %v9073_v31 }
0x2bb2   :  { %v6979_v41 = vrot.slane %v6957_v52, %v9073_v31  ;;  %v6958_v49 = vcombine.high %v6956_v40, %v6956_v40  ;;  %v7004_v33 = vrot.slane %v6990_v45, %v9073_v31  ;;  %v6972_v59 = vrot.slane %v6956_v40, %v9073_v31  ;;  %v11137_v52 = vld [vmem:[#allocation26_spill] sm:$0xff] }
0x2bb3   :  { %v6987_v38 = vcombine.high %v6965_v17, %v6965_v17  ;;  %v7005_v42 = vcombine.high %v6997_v48, %v6997_v48  ;;  %v7013_v24 = vrot.slane %v6997_v48, %v9073_v31  ;;  %v7162_v3 = vadd.f32 %v6965_v17, %v11134_v37  ;;  %v11138_v17 = vld [vmem:[#allocation25_spill] sm:$0xff]  ;;  %v11140_v37 = vld [vmem:[#allocation28_spill] sm:$0xff] }
0x2bb4   :  { %v6989_v26 = vcombine.high %v6979_v41, %v6979_v41  ;;  %v6986_v61 = vrot.slane %v6958_v49, %v9073_v31  ;;  %v7006_v29 = vcombine.high %v7004_v33, %v7004_v33  ;;  %v7020_v15 = vrot.slane %v7004_v33, %v9073_v31  ;;  %v11139_v49 = vld [vmem:[#allocation27_spill] sm:$0xff] }
0x2bb5   :  { %v7163_v47 = vadd.f32 %v6979_v41, %v11135_v34  ;;  %v6988_v2 = vcombine.high %v6972_v59, %v6972_v59  ;;  %v7027_v12 = vrot.slane %v7005_v42, %v9073_v31  ;;  %v7086_v21 = vcombine.high %v6941_v13, %v6941_v13 }
0x2bb6   :  { %v7164_v58 = vadd.f32 %v6987_v38, %v11136_v7  ;;  %v7052_v11 = vrot.slane %v7038_v27, %v9073_v31  ;;  %v7093_v19 = vrot.slane %v6941_v13, %v9073_v31  ;;  %v7165_v40 = vadd.f32 %v6989_v26, %v11137_v52 }
0x2bb7   :  { %v7035_v45 = vcombine.high %v7013_v24, %v7013_v24  ;;  %v7053_v43 = vcombine.high %v7045_v23, %v7045_v23  ;;  %v7166_v48 = vadd.f32 %v6972_v59, %v11138_v17  ;;  %8743 = vtanh.f32 %v7162_v3 }
0x2bb8   :  { %v7034_v18 = vrot.slane %v7006_v29, %v9073_v31  ;;  %v7036_v41 = vcombine.high %v7020_v15, %v7020_v15  ;;  %v7167_v33 = vadd.f32 %v6986_v61, %v11139_v49  ;;  %8745 = vtanh.f32 %v7163_v47  ;;  %v11141_v29 = vld [vmem:[#allocation17_spill] sm:$0xff] }
0x2bb9   :  { %v7037_v42 = vcombine.high %v7027_v12, %v7027_v12  ;;  %v7100_v38 = vrot.slane %v7086_v21, %v9073_v31  ;;  %v7168_v27 = vadd.f32 %v6988_v2, %v9308_v28  ;;  %8747 = vtanh.f32 %v7164_v58  ;;  %v11142_v21 = vld [vmem:[#allocation18_spill] sm:$0xff]  ;;  %v11145_v49 = vld [vmem:[#allocation21_spill] sm:$0xff] }
0x2bba   :  { %v7061_v13 = vrot.slane %v7045_v23, %v9073_v31  ;;  %v7101_v26 = vcombine.high %v7093_v19, %v7093_v19  ;;  %v7169_v34 = vadd.f32 %v7013_v24, %v11140_v37  ;;  %8749 = vtanh.f32 %v7165_v40  ;;  %v11143_v40 = vld [vmem:[#allocation19_spill] sm:$0xff] }
0x2bbb   :  { %v7054_v59 = vcombine.high %v7052_v11, %v7052_v11  ;;  %v7075_v3 = vrot.slane %v7053_v43, %v9073_v31  ;;  %v7170_v7 = vadd.f32 %v7027_v12, %v11141_v29  ;;  %8751 = vtanh.f32 %v7166_v48 }
0x2bbc   :  { %v7068_v61 = vrot.slane %v7052_v11, %v9073_v31  ;;  %v7109_v47 = vrot.slane %v7093_v19, %v9073_v31  ;;  %v7171_v52 = vadd.f32 %v7035_v45, %v11142_v21  ;;  %8753 = vtanh.f32 %v7167_v33  ;;  %v11144_v19 = vld [vmem:[#allocation20_spill] sm:$0xff] }
0x2bbd   :  { %v7102_v28 = vcombine.high %v7100_v38, %v7100_v38  ;;  %v10664_v23 = vrot.slane %v7100_v38, %v9073_v31  ;;  %v7172_v24 = vadd.f32 %v7037_v42, %v9263_v25  ;;  %8755 = vtanh.f32 %v7168_v27 }
0x2bbe   :  { %v7083_v2 = vcombine.high %v7061_v13, %v7061_v13  ;;  %v7123_v58 = vrot.slane %v7101_v26, %v9073_v31  ;;  %v7173_v12 = vadd.f32 %v7020_v15, %v11143_v40  ;;  %8757 = vtanh.f32 %v7169_v34 }
0x2bbf   :  { %v7082_v11 = vrot.slane %v7054_v59, %v9073_v31  ;;  %v7085_v43 = vcombine.high %v7075_v3, %v7075_v3  ;;  %v7174_v17 = vadd.f32 %v7034_v18, %v11144_v19  ;;  %8759 = vtanh.f32 %v7170_v7  ;;  %v11146_v59 = vld [vmem:[#allocation29_spill] sm:$0xff] }
0x2bc0   :  { %v7084_v45 = vcombine.high %v7068_v61, %v7068_v61  ;;  %v7131_v48 = vcombine.high %v7109_v47, %v7109_v47  ;;  %v7175_v33 = vadd.f32 %v7036_v41, %v11145_v49  ;;  %8761 = vtanh.f32 %v7171_v52 }
0x2bc1   :  { %v8744_v38 = vpop.eup %8743  ;;  %v7130_v25 = vrot.slane %v7102_v28, %v9073_v31  ;;  %v7132_v42 = vcombine.high %v10664_v23, %v10664_v23  ;;  %v7176_v15 = vadd.f32 %v7061_v13, %v9277_v44  ;;  %8763 = vtanh.f32 %v7172_v24 }
0x2bc2   :  { %v8746_v27 = vpop.eup %8745  ;;  %v7133_v26 = vcombine.high %v7123_v58, %v7123_v58  ;;  %v7177_v37 = vadd.f32 %v7075_v3, %v9285_v55  ;;  %v7178_v18 = vadd.f32 %v7083_v2, %v9320_v50  ;;  %8765 = vtanh.f32 %v7173_v12 }
0x2bc3   :  { %v8748_v34 = vpop.eup %8747  ;;  %v7179_v41 = vadd.f32 %v7085_v43, %v11146_v59  ;;  %8767 = vtanh.f32 %v7174_v17  ;;  %v7218_v29 = vmul.f32 %v8744_v38, %v9204_v53  ;;  %v7219_v7 = vmul.f32 %v8746_v27, %v9211_v57 }
0x2bc4   :  { %v8750_v21 = vpop.eup %8749  ;;  %v7180_v52 = vadd.f32 %v7068_v61, %v9340_v30  ;;  %v7181_v44 = vadd.f32 %v7082_v11, %v9349_v32  ;;  %v7182_v13 = vadd.f32 %v7084_v45, %v9343_v20  ;;  %8769 = vtanh.f32 %v7175_v33 }
0x2bc5   :  { %v8752_v55 = vpop.eup %8751  ;;  %8771 = vtanh.f32 %v7176_v15  ;;  %v7220_v50 = vmul.f32 %v8748_v34, %v9239_v5  ;;  %v7221_v3 = vmul.f32 %v8750_v21, %v9248_v10  ;;  %v7274_v28 = vcombine.low %v7218_v29, %v7219_v7 }
0x2bc6   :  { %v8754_v24 = vpop.eup %8753  ;;  %v7183_v2 = vadd.f32 %v7109_v47, %v9352_v63  ;;  %v7184_v40 = vadd.f32 %v7123_v58, %v9355_v46  ;;  %v7185_v12 = vadd.f32 %v7131_v48, %v9366_v16  ;;  %8773 = vtanh.f32 %v7177_v37 }
0x2bc7   :  { %v8756_v30 = vpop.eup %8755  ;;  %8775 = vtanh.f32 %v7178_v18  ;;  %v7222_v32 = vmul.f32 %v8752_v55, %v9208_v56  ;;  %v7223_v20 = vmul.f32 %v8754_v24, %v9235_v4  ;;  %v7275_v61 = vcombine.low %v7220_v50, %v7221_v3 }
0x2bc8   :  { %v8758_v11 = vpop.eup %8757  ;;  %v7186_v43 = vadd.f32 %v7133_v26, %v9315_v35  ;;  %v7187_v19 = vadd.f32 %v10664_v23, %v9324_v6  ;;  %8777 = vtanh.f32 %v7179_v41  ;;  %v7224_v63 = vmul.f32 %v8756_v30, %v9244_v9 }
0x2bc9   :  { %v8760_v46 = vpop.eup %8759  ;;  %8779 = vtanh.f32 %v7180_v52  ;;  %v7276_v16 = vcombine.low %v7222_v32, %v7223_v20  ;;  %v7283_v47 = vrot.slane %v7274_v28, %v9073_v31  ;;  %v7290_v58 = vrot.slane %v7275_v61, %v9073_v31 }
0x2bca   :  { %v8762_v17 = vpop.eup %8761  ;;  %v7188_v45 = vadd.f32 %v7130_v25, %v9329_v1  ;;  %8781 = vtanh.f32 %v7181_v44  ;;  %v7225_v48 = vmul.f32 %v8758_v11, %v9204_v53  ;;  %v7226_v35 = vmul.f32 %v8760_v46, %v9211_v57 }
0x2bcb   :  { %v8764_v49 = vpop.eup %8763  ;;  %8783 = vtanh.f32 %v7182_v13  ;;  %v7297_v6 = vrot.slane %v7276_v16, %v9073_v31  ;;  %v7304_v23 = vrot.slane %v7224_v63, %v9073_v31  ;;  %v7305_v33 = vcombine.low %v7283_v47, %v7290_v58 }
0x2bcc   :  { %v8766_v38 = vpop.eup %8765  ;;  %8785 = vtanh.f32 %v7183_v2  ;;  %v7227_v15 = vmul.f32 %v8762_v17, %v9239_v5  ;;  %v7228_v27 = vmul.f32 %v8764_v49, %v9248_v10  ;;  %v7322_v26 = vcombine.low %v7225_v48, %v7226_v35 }
0x2bcd   :  { %v8768_v1 = vpop.eup %8767  ;;  %v7189_v25 = vadd.f32 %v7132_v42, %v9334_v14  ;;  %8787 = vtanh.f32 %v7184_v40  ;;  %v7306_v37 = vcombine.low %v7297_v6, %v7304_v23  ;;  %v7313_v18 = vrot.slane %v7305_v33, %v9073_v31 }
0x2bce   :  { %v8770_v34 = vpop.eup %8769  ;;  %8789 = vtanh.f32 %v7185_v12  ;;  %v7229_v59 = vmul.f32 %v8766_v38, %v9208_v56  ;;  %v7230_v41 = vmul.f32 %v8768_v1, %v9235_v4  ;;  %v7323_v29 = vcombine.low %v7227_v15, %v7228_v27 }
0x2bcf   :  { %v8772_v7 = vpop.eup %8771  ;;  %8791 = vtanh.f32 %v7186_v43  ;;  %v7320_v21 = vrot.slane %v7306_v37, %v9073_v31  ;;  %v7231_v52 = vmul.f32 %v8770_v34, %v9244_v9  ;;  %v7331_v42 = vrot.slane %v7322_v26, %v9073_v31 }
0x2bd0   :  { %v8774_v44 = vpop.eup %8773  ;;  %8793 = vtanh.f32 %v7187_v19  ;;  %v7324_v14 = vcombine.low %v7229_v59, %v7230_v41  ;;  %v7338_v13 = vrot.slane %v7323_v29, %v9073_v31  ;;  %v7232_v3 = vmul.f32 %v8772_v7, %v9204_v53 }
0x2bd1   :  { %v8776_v55 = vpop.eup %8775  ;;  %8795 = vtanh.f32 %v7188_v45  ;;  %v7321_v50 = vcombine.low %v7313_v18, %v7320_v21  ;;  %v7233_v28 = vmul.f32 %v8774_v44, %v9211_v57  ;;  %v7352_v40 = vrot.slane %v7231_v52, %v9073_v31 }
0x2bd2   :  { %v8778_v24 = vpop.eup %8777  ;;  %8797 = vtanh.f32 %v7189_v25  ;;  %v7345_v2 = vrot.slane %v7324_v14, %v9073_v31  ;;  %v7353_v12 = vcombine.low %v7331_v42, %v7338_v13  ;;  %v7234_v20 = vmul.f32 %v8776_v55, %v9239_v5 }
0x2bd3   :  { %v8780_v30 = vpop.eup %8779  ;;  %v7470_v32 = vsel %vm1639_vm2, %v7321_v50, 0.0  ;;  %v7235_v61 = vmul.f32 %v8778_v24, %v9248_v10  ;;  %v7370_v11 = vcombine.low %v7232_v3, %v7233_v28 }
0x2bd4   :  { %v8782_v43 = vpop.eup %8781  ;;  %7471 = vadd.xlane.f32.xlu0 %v7470_v32  ;;  %v7354_v19 = vcombine.low %v7345_v2, %v7352_v40  ;;  %v7361_v63 = vrot.slane %v7353_v12, %v9073_v31  ;;  %v7236_v16 = vmul.f32 %v8780_v30, %v9208_v56 }
0x2bd5   :  { %v8784_v46 = vpop.eup %8783  ;;  %v7237_v47 = vmul.f32 %v8782_v43, %v9235_v4  ;;  %v7371_v58 = vcombine.low %v7234_v20, %v7235_v61  ;;  %v7379_v6 = vrot.slane %v7370_v11, %v9073_v31 }
0x2bd6   :  { %v8786_v17 = vpop.eup %8785  ;;  %v7368_v45 = vrot.slane %v7354_v19, %v9073_v31  ;;  %v7238_v48 = vmul.f32 %v8784_v46, %v9244_v9 }
0x2bd7   :  { %v8788_v35 = vpop.eup %8787  ;;  %v7372_v49 = vcombine.low %v7236_v16, %v7237_v47  ;;  %v7386_v23 = vrot.slane %v7371_v58, %v9073_v31  ;;  %v7239_v15 = vmul.f32 %v8786_v17, %v9204_v53 }
0x2bd8   :  { %v8790_v33 = vpop.eup %8789  ;;  %v7369_v38 = vcombine.low %v7361_v63, %v7368_v45  ;;  %v7240_v27 = vmul.f32 %v8788_v35, %v9211_v57  ;;  %v7400_v25 = vrot.slane %v7238_v48, %v9073_v31 }
0x2bd9   :  { %v8792_v26 = vpop.eup %8791  ;;  %v7393_v1 = vrot.slane %v7372_v49, %v9073_v31  ;;  %v7401_v37 = vcombine.low %v7379_v6, %v7386_v23  ;;  %v7241_v59 = vmul.f32 %v8790_v33, %v9239_v5 }
0x2bda   :  { %v8794_v18 = vpop.eup %8793  ;;  %v7473_v34 = vsel %vm1639_vm2, %v7369_v38, 0.0  ;;  %v7242_v41 = vmul.f32 %v8792_v26, %v9248_v10  ;;  %v7418_v29 = vcombine.low %v7239_v15, %v7240_v27 }
0x2bdb   :  { %v8796_v7 = vpop.eup %8795  ;;  %7474 = vadd.xlane.f32.xlu1 %v7473_v34  ;;  %v7402_v21 = vcombine.low %v7393_v1, %v7400_v25  ;;  %v7409_v53 = vrot.slane %v7401_v37, %v9073_v31  ;;  %v7243_v52 = vmul.f32 %v8794_v18, %v9208_v56 }
0x2bdc   :  { %v8798_v57 = vpop.eup %8797  ;;  %v7244_v44 = vmul.f32 %v8796_v7, %v9235_v4  ;;  %v7419_v14 = vcombine.low %v7241_v59, %v7242_v41  ;;  %v7427_v5 = vrot.slane %v7418_v29, %v9073_v31 }
0x2bdd   :  { %v7416_v42 = vrot.slane %v7402_v21, %v9073_v31  ;;  %v7245_v13 = vmul.f32 %v8798_v57, %v9244_v9 }
0x2bde   :  { %v7420_v55 = vcombine.low %v7243_v52, %v7244_v44  ;;  %v7434_v10 = vrot.slane %v7419_v14, %v9073_v31 }
0x2bdf   :  { %v7417_v50 = vcombine.low %v7409_v53, %v7416_v42  ;;  %v7448_v28 = vrot.slane %v7245_v13, %v9073_v31 }
0x2be0   :  { %v7441_v3 = vrot.slane %v7420_v55, %v9073_v31  ;;  %v7449_v24 = vcombine.low %v7427_v5, %v7434_v10 }
0x2be1   :  { %v7476_v56 = vsel %vm1639_vm2, %v7417_v50, 0.0 }
0x2be2   :  { %7477 = vadd.xlane.f32.xlu0 %v7476_v56  ;;  %v7450_v4 = vcombine.low %v7441_v3, %v7448_v28  ;;  %v7457_v2 = vrot.slane %v7449_v24, %v9073_v31 }
0x2be4   :  { %v7464_v40 = vrot.slane %v7450_v4, %v9073_v31 }
0x2be6   :  { %v7465_v9 = vcombine.low %v7457_v2, %v7464_v40 }
0x2be8   :  { %v7479_v12 = vsel %vm1639_vm2, %v7465_v9, 0.0 }
0x2be9   :  { %7480 = vadd.xlane.f32.xlu0 %v7479_v12 }
0x2c61   :  { %v7472_v30 = vpop.xlane.xlu0 %7471 }
0x2c62   :  { %v7482_v11 = vadd.f32 %v7472_v30, %v9470_v39 }
0x2c64   :  { %v7493_v63 = vrot.slane %v7482_v11, %v9468_v36 }
0x2c68   :  { %v7475_v32 = vpop.xlane.xlu1 %7474 }
0x2c69   :  { %v7483_v20 = vadd.f32 %v7475_v32, %v9470_v39  ;;  %v7719_v32 = vld [vmem:[%s10894_s14] sm:$0xff] }
0x2c6b   :  { %v7497_v19 = vrot.slane %v7483_v20, %v9468_v36 }
0x2c6d   :  { %v7506_v16 = vsel %vm1687_vm3, %v7497_v19, %v7493_v63 }
0x2c6f   :  { %v7478_v61 = vpop.xlane.xlu0 %7477 }
0x2c70   :  { %v7484_v43 = vadd.f32 %v7478_v61, %v9470_v39 }
0x2c72   :  { %v7501_v46 = vrot.slane %v7484_v43, %v9468_v36 }
0x2c74   :  { %v7507_v17 = vsel %vm1689_vm4, %v7501_v46, %v7506_v16  ;;  %v8842_v16 = vld [vmem:[%s10983_s30 + $0x10] sm:$0x7f] }
0x2c76   :  { %v7481_v31 = vpop.xlane.xlu0 %7480 }
0x2c77   :  { %v7485_v47 = vadd.f32 %v7481_v31, %v9470_v39 }
0x2c79   :  { %v7505_v58 = vrot.slane %v7485_v47, %v9468_v36 }
0x2c7b   :  { %v7508_v45 = vsel %vm1691_vm5, %v7505_v58, %v7507_v17 }
0x2c7c   :  { %v7510_v48 = vsel %vm1694_vm6, %v7508_v45, -inf }
0x2c7d   :  { %7511 = vmax.xlane.f32.xlu1 %v7510_v48 }
0x2d0a   :  { %v7512_v35 = vpop.xlane.xlu1 %7511 }
0x2d0b   :  { %v7517_v49 = vrot.slane %v7512_v35, %v9232_v0  ;;  %v7521_v6 = vrot.slane %v7512_v35, %v9485_v60  ;;  %v7525_v23 = vrot.slane %v7512_v35, %v9488_v54  ;;  %v7529_v39 = vrot.slane %v7512_v35, %v9493_v51 }
0x2d0d   :  { %v7534_v33 = vsub.f32 %v7482_v11, %v7517_v49  ;;  %v7535_v38 = vsub.f32 %v7483_v20, %v7521_v6  ;;  %v7536_v15 = vsub.f32 %v7484_v43, %v7525_v23  ;;  %v7537_v1 = vsub.f32 %v7485_v47, %v7529_v39  ;;  %v8841_v43 = vld [vmem:[%s10983_s30 + $0x8] sm:$0x7f]  ;;  %v8843_v49 = vld [vmem:[%s10983_s30] sm:$0x7f] }
0x2d0e   :  { %v11147_v20 = vmov 0.0|0.0  }
0x2d0f   :  { %v7538_v27 = vmul.f32 1.442695, %v7534_v33  ;;  %v7540_v26 = vmul.f32 1.442695, %v7535_v38  ;;  %v7542_v25 = vmul.f32 1.442695, %v7536_v15 }
0x2d10   :  { %v7544_v37 = vmul.f32 1.442695, %v7537_v1 }
0x2d11   :  { %8799 = vpow2.f32 %v7538_v27 }
0x2d12   :  { %8801 = vpow2.f32 %v7540_v26  ;;  %v8844_v26 = vld [vmem:[%s10983_s30 + $0x18] sm:$0x7f] }
0x2d13   :  { %8803 = vpow2.f32 %v7542_v25 }
0x2d14   :  { %8805 = vpow2.f32 %v7544_v37 }
0x2d1b   :  { %v8800_v18 = vpop.eup %8799 }
0x2d1c   :  { %v8802_v34 = vpop.eup %8801  ;;  %7551 = vperm.xlu0 %8304, %v8800_v18  }
0x2d1d   :  { %7554 = vperm.xlu1 %8302, %v8802_v34   ;;  %v8804_v59 = vpop.eup %8803 }
0x2d1e   :  { %v8806_v41 = vpop.eup %8805 }
0x2d21   :  { %7557 = vperm.xlu1 %8302, %v8804_v59  }
0x2d25   :  { %7560 = vperm.xlu1 %8302, %v8806_v41  }
0x2d9b   :  { %v7552_v7 = vpop.permute.xlu0 %7551 }
0x2d9c   :  { %v7555_v29 = vpop.permute.xlu1 %7554  ;;  %v7565_v57 = vrot.slane %v7552_v7, %v9468_v36 }
0x2d9d   :  { %v7569_v53 = vrot.slane %v7555_v29, %v9468_v36 }
0x2d9f   :  { %v7578_v14 = vsel %vm1687_vm3, %v7569_v53, %v7565_v57 }
0x2da0   :  { %v7558_v21 = vpop.permute.xlu1 %7557 }
0x2da1   :  { %v7573_v52 = vrot.slane %v7558_v21, %v9468_v36 }
0x2da3   :  { %v7579_v13 = vsel %vm1689_vm4, %v7573_v52, %v7578_v14  ;;  %v8845_v14 = vld [vmem:[%s10890_s8] ss:$0 sm:$0xff] }
0x2da4   :  { %v7561_v44 = vpop.permute.xlu1 %7560 }
0x2da5   :  { %v7577_v42 = vrot.slane %v7561_v44, %v9468_v36 }
0x2da7   :  { %v7580_v55 = vsel %vm1691_vm5, %v7577_v42, %v7579_v13 }
0x2da8   :  { %v7582_v5 = vsel %vm1694_vm6, %v7580_v55, 0.0 }
0x2da9   :  { %7583 = vadd.xlane.f32.xlu1 %v7582_v5 }
0x2e36   :  { %v7584_v10 = vpop.xlane.xlu1 %7583 }
0x2e37   :  { %8807 = vrcp.f32 %v7584_v10 }
0x2e41   :  { %v8808_v50 = vpop.eup %8807 }
0x2e42   :  { %v7586_v3 = vmul.f32 %v8808_v50, %v7584_v10 }
0x2e44   :  { %v7587_v28 = vsub.f32 2.0, %v7586_v3 }
0x2e46   :  { %v7588_v24 = vmul.f32 %v8808_v50, %v7587_v28 }
0x2e48   :  { %v7597_v56 = vrot.slane %v7588_v24, %v9485_v60  ;;  %v7601_v2 = vrot.slane %v7588_v24, %v9488_v54  ;;  %v7593_v40 = vrot.slane %v7588_v24, %v9232_v0  ;;  %v7605_v12 = vrot.slane %v7588_v24, %v9493_v51  ;;  %v7720_v60 = vld [vmem:[%s10894_s14 + $0x8] sm:$0xff]  ;;  %v7721_v0 = vld [vmem:[%s10894_s14 + $0x10] sm:$0xff]  ;;  %v7722_v51 = vld [vmem:[%s10894_s14 + $0x18] sm:$0xff] }
0x2e49   :  { %v8264_v54 = vpack.c.bf16 %v7720_v60, %v7719_v32  ;;  %v8267_v61 = vpack.c.bf16 %v7722_v51, %v7721_v0  ;;  %v8909_v60 = vmov 6  }
0x2e4a   :  { %v7611_v4 = vmul.f32 %v8802_v34, %v7597_v56  ;;  %v7612_v36 = vmul.f32 %v8804_v59, %v7601_v2  ;;  %v7610_v9 = vmul.f32 %v8800_v18, %v7593_v40  ;;  %v7613_v30 = vmul.f32 %v8806_v41, %v7605_v12  ;;  %8305 = vset.pattern.permute.xlu1 %v8909_v60 }
0x2e4b   :  { %8265 = vmatpush3.bf16.msra.mxu1 %v8264_v54 }
0x2e4c   :  { %7621 = vperm.xlu0 %8304, %v7611_v4   ;;  %8266 = vmatprep.subr.bf16.mxu1 %v11147_v20 }
0x2e4f   :  { %8268 = vmatpush3.bf16.msra.mxu1 %v8267_v61 }
0x2e50   :  { %7626 = vperm.xlu0 %8304, %v7612_v36  }
0x2e54   :  { %7616 = vperm.xlu0 %8304, %v7610_v9  }
0x2e58   :  { %7631 = vperm.xlu0 %8304, %v7613_v30  }
0x2e5c   :  { %8306 = vset.pattern.permute.xlu0 %v8909_v60 }
0x2ecb   :  { %v7622_v11 = vpop.permute.xlu0 %7621 }
0x2ecc   :  { %v7635_v19 = vmul.f32 %v8841_v43, %v7622_v11  ;;  %v8846_v43 = vld [vmem:[%s10891_s11] ss:$0 sm:$0xff] }
0x2ece   :  { %v7645_v63 = vsel %vm1639_vm2, %v7635_v19, 0.0 }
0x2ecf   :  { %v7646_v46 = vrot.slane %v7645_v63, 4  ;;  %v7627_v31 = vpop.permute.xlu0 %7626 }
0x2ed0   :  { %v7636_v47 = vmul.f32 %v8842_v16, %v7627_v31 }
0x2ed1   :  { %v7647_v58 = vadd.f32 %v7646_v46, %v7645_v63  ;;  %v8847_v46 = vld [vmem:[%s10892_s12] ss:$0 sm:$0xff] }
0x2ed2   :  { %v7652_v17 = vsel %vm1639_vm2, %v7636_v47, 0.0 }
0x2ed3   :  { %v7648_v45 = vrot.slane %v7647_v58, 2  ;;  %v7653_v48 = vrot.slane %v7652_v17, 4  ;;  %v7617_v35 = vpop.permute.xlu0 %7616 }
0x2ed4   :  { %v7634_v6 = vmul.f32 %v8843_v49, %v7617_v35 }
0x2ed5   :  { %v7649_v23 = vadd.f32 %v7648_v45, %v7647_v58  ;;  %v7654_v33 = vadd.f32 %v7653_v48, %v7652_v17 }
0x2ed6   :  { %v7638_v38 = vsel %vm1639_vm2, %v7634_v6, 0.0  ;;  %v7715_v6 = vld [vmem:[%s10893_s13] sm:$0xff] }
0x2ed7   :  { %v7655_v39 = vrot.slane %v7654_v33, 2  ;;  %v7639_v15 = vrot.slane %v7638_v38, 4  ;;  %v7632_v27 = vpop.permute.xlu0 %7631  ;;  %v7650_v25 = vrot.slane %v7649_v23, 1 }
0x2ed8   :  { %v7637_v1 = vmul.f32 %v8844_v26, %v7632_v27 }
0x2ed9   :  { %v7656_v37 = vadd.f32 %v7655_v39, %v7654_v33  ;;  %v7640_v18 = vadd.f32 %v7639_v15, %v7638_v38  ;;  %v7651_v7 = vadd.f32 %v7650_v25, %v7649_v23  ;;  %v7716_v23 = vld [vmem:[%s10893_s13 + $0x8] sm:$0xff]  ;;  %v7717_v33 = vld [vmem:[%s10893_s13 + $0x10] sm:$0xff] }
0x2eda   :  { %v7659_v34 = vsel %vm1639_vm2, %v7637_v1, 0.0  ;;  %v8270_v38 = vpack.c.bf16 %v7716_v23, %v7715_v6 }
0x2edb   :  { %v7641_v59 = vrot.slane %v7640_v18, 2  ;;  %v7660_v41 = vrot.slane %v7659_v34, 4  ;;  %v7657_v29 = vrot.slane %v7656_v37, 1  ;;  %v7667_v42 = vmul.f32 %v8845_v14, %v7651_v7 }
0x2edc   :  { %8271 = vmatpush3.bf16.msra.mxu0 %v8270_v38 }
0x2edd   :  { %v7642_v21 = vadd.f32 %v7641_v59, %v7640_v18  ;;  %v7661_v53 = vadd.f32 %v7660_v41, %v7659_v34  ;;  %v7658_v44 = vadd.f32 %v7657_v29, %v7656_v37  ;;  %v7674_v28 = vrot.slane %v7667_v42, 7  ;;  %8272 = vmatprep.subr.bf16.mxu0 %v11147_v20  ;;  %v7990_v37 = vld [vmem:[%s10895_s15] ss:$0 sm:$0xff]  ;;  %s8910_s15 = smov 124  }
0x2edf   :  { %v7643_v57 = vrot.slane %v7642_v21, 1  ;;  %v7662_v52 = vrot.slane %v7661_v53, 2  ;;  %v7668_v3 = vmul.f32 %v8845_v14, %v7658_v44 }
0x2ee1   :  { %v7644_v13 = vadd.f32 %v7643_v57, %v7642_v21  ;;  %v7663_v55 = vadd.f32 %v7662_v52, %v7661_v53  ;;  %v7676_v40 = vrot.slane %v7668_v3, 6 }
0x2ee3   :  { %v7666_v5 = vmul.f32 %v8845_v14, %v7644_v13  ;;  %v7664_v10 = vrot.slane %v7663_v55, 1  ;;  %v7727_v50 = vsel %vm1687_vm3, %v7651_v7, %v7644_v13 }
0x2ee4   :  { %v7728_v56 = vsel %vm1689_vm4, %v7658_v44, %v7727_v50 }
0x2ee5   :  { %v7665_v24 = vadd.f32 %v7664_v10, %v7663_v55  ;;  %v7675_v36 = vsel %vm1687_vm3, %v7674_v28, %v7666_v5 }
0x2ee6   :  { %v7677_v12 = vsel %vm1689_vm4, %v7676_v40, %v7675_v36 }
0x2ee7   :  { %v7729_v4 = vsel %vm1691_vm5, %v7665_v24, %v7728_v56  ;;  %v7669_v2 = vmul.f32 %v8845_v14, %v7665_v24 }
0x2ee8   :  { %8144 = vmatmul.mubr.msk.f32.vlgmr.msra.gmra.mrb[14].mxu1 %vm439_vm0, %v7729_v4 }
0x2ee9   :  { %v7678_v9 = vrot.slane %v7669_v2, 5 }
0x2eeb   :  { %v7679_v30 = vsel %vm1691_vm5, %v7678_v9, %v7677_v12 }
0x2eec   :  { %v7681_v32 = vsel %vm1872_vm7, %v7679_v30, 0.0 }
0x2eed   :  { %7682 = vadd.xlane.f32.xlu0 %v7681_v32 }
0x2f7a   :  { %v7683_v54 = vpop.xlane.xlu0 %7682 }
0x2f7b   :  { %v7684_v0 = vadd.f32 %v7683_v54, %v11127_v8 }
0x2f7d   :  { %7687 = vperm.xlu1 %8305, %v7684_v0  }
0x2fbb   :  { %v7798_v51 = vpop.f32.mrb[14].mxu1 }
0x2fbc   :  { %v8145_v61 = vpop.f32.mrb[15].mxu1 }
0x2ffc   :  { %v7688_v11 = vpop.permute.xlu1 %7687 }
0x2ffd   :  { %v7690_v19 = vmul.f32 %v8846_v43, %v7688_v11 }
0x2fff   :  { %v7691_v63 = vadd.f32 %v7690_v19, %v10624_v62 }
0x3001   :  { %v7692_v31 = vadd.f32 %v8847_v46, %v7691_v63 }
0x3003   :  { %8809 = vtanh.f32 %v7692_v31  ;;  %v7693_v8 = vmul.f32 0.5, %v7692_v31 }
0x3005   :  { %8811 = vtanh.f32 %v7693_v8 }
0x300d   :  { %v8810_v16 = vpop.eup %8809 }
0x300e   :  { %7700 = vrot.lane.b32.xlu1 %v8810_v16, %s8901_s4 }
0x300f   :  { %v8812_v47 = vpop.eup %8811 }
0x3010   :  { %v7695_v58 = vadd.f32 1.0, %v8812_v47 }
0x3012   :  { %v7696_v17 = vmul.f32 0.5, %v7695_v58 }
0x3014   :  { %v7698_v62 = vmul.f32 %v7696_v17, %v10611_v22  ;;  %v7718_v22 = vld [vmem:[%s10893_s13 + $0x18] sm:$0xff] }
0x3015   :  { %v8273_v39 = vpack.c.bf16 %v7718_v22, %v7717_v33 }
0x3017   :  { %8274 = vmatpush3.bf16.msra.mxu0 %v8273_v39 }
0x3080   :  { %v7701_v45 = vpop.permute.xlu1 %7700 }
0x3081   :  { %v7703_v48 = vmul.f32 %v7701_v45, %v7696_v17 }
0x3083   :  { %7705 = vrot.lane.b32.xlu1 %v7703_v48, %s8902_s23 }
0x30f5   :  { %v7706_v35 = vpop.permute.xlu1 %7705 }
0x30f6   :  { %v7708_v49 = vadd.f32 %v7706_v35, %v7698_v62 }
0x30f8   :  { %8813 = vtanh.f32 %v7708_v49 }
0x3102   :  { %v8814_v15 = vpop.eup %8813 }
0x3103   :  { %7711 = vrot.lane.b32.xlu1 %v8814_v15, %s8901_s4 }
0x3175   :  { %v7712_v27 = vpop.permute.xlu1 %7711 }
0x3176   :  { %v7714_v26 = vmul.f32 %v7712_v27, %v7696_v17 }
0x3178   :  { %7803 = vrot.lane.b32.xlu0 %v7714_v26, %s8902_s23  ;;  %s8911_s23 = smov 127  }
0x31ea   :  { %v7804_v1 = vpop.permute.xlu0 %7803 }
0x31eb   :  { %8155 = vmatmul.mubr.msk.f32.vlgmr.msra.gmra.mrb[18].mxu0 %vm439_vm0, %v7804_v1 }
0x32be   :  { %v7873_v25 = vpop.f32.mrb[18].mxu0 }
0x32bf   :  { %v7874_v18 = vadd.f32 %v7873_v25, %v7798_v51  ;;  %v8156_v34 = vpop.f32.mrb[19].mxu0 }
0x32c1   :  { %v7884_v20 = vadd.f32 %v7990_v37, %v7874_v18 }
0x32c3   :  { %7886 = vst.msk [vmem:[%s10896_s16] sm:$0xf] %vm7885_vm8, %v7884_v20  ;;  %v7910_v59 = vsel %vm7909_vm9, %v7884_v20, -inf  ;;  %v7888_v41 = vsel %vm7887_vm10, %v7884_v20, -inf  ;;  %s8912_s16 = smov [#allocation7]  }
0x32c4   :  { %7911 = vmax.xlane.f32.xlu0 %v7910_v59  ;;  %7889 = vmax.xlane.f32.xlu1 %v7888_v41  ;;  %s7948_s7 = sshll.u32 %s8912_s16, 4  ;;  %s7949_s7 = int_to_ptr.vmem [resolvable:$true] %s7948_s7 }
0x32c5   :  { %s8848_s6 = scalar_lea.vmem %s7949_s7, 64  ;;  %p8853_p1 = scmp.lt.s32.totalorder %s7949_s7, %s7949_s7 }
0x32c6   :  { %p8849_p0 = scmp.ne.s32.totalorder %s7949_s7, %s8848_s6  ;;  %p8854_p2 = scmp.lt.s32.totalorder %s8848_s6, %s8848_s6 }
0x32c8   :  { %p8855_p3 = por %p8854_p2, %p8853_p1 }
0x32ca   :  { %p8856_p4 = pnand %p8855_p3, %p8849_p0 }
0x3351   :  { %v7912_v29 = vpop.xlane.xlu0 %7911  ;;  %v7890_v7 = vpop.xlane.xlu1 %7889 }
0x3352   :  { %v7913_v21 = vsub.f32 %v7884_v20, %v7912_v29  ;;  %v7891_v53 = vsub.f32 %v7884_v20, %v7890_v7 }
0x3354   :  { %v7914_v57 = vmul.f32 1.442695, %v7913_v21  ;;  %v7892_v52 = vmul.f32 1.442695, %v7891_v53 }
0x3356   :  { %8815 = vpow2.f32 %v7914_v57 }
0x3357   :  { %8817 = vpow2.f32 %v7892_v52 }
0x3360   :  { %v8816_v44 = vpop.eup %8815 }
0x3361   :  { %v8818_v14 = vpop.eup %8817  ;;  %7917 = vrot.lane.b32.xlu0 %v8816_v44, %s8910_s15 }
0x3362   :  { %7895 = vrot.lane.b32.xlu1 %v8818_v14, %s8911_s23 }
0x33d3   :  { %v7918_v42 = vpop.permute.xlu0 %7917 }
0x33d4   :  { %v7920_v13 = vsel %vm7898_vm11, %v7918_v42, 0.0  ;;  %v7896_v55 = vpop.permute.xlu1 %7895 }
0x33d5   :  { %v7899_v5 = vsel %vm7898_vm11, %v7896_v55, 0.0  ;;  %7921 = vadd.xlane.f32.xlu0 %v7920_v13 }
0x33d6   :  { %7900 = vadd.xlane.f32.xlu1 %v7899_v5 }
0x3462   :  { %v7922_v10 = vpop.xlane.xlu0 %7921 }
0x3463   :  { %8819 = vrcp.f32 %v7922_v10  ;;  %v7901_v50 = vpop.xlane.xlu1 %7900 }
0x3464   :  { %8821 = vrcp.f32 %v7901_v50 }
0x346d   :  { %v8820_v3 = vpop.eup %8819 }
0x346e   :  { %v8822_v28 = vpop.eup %8821  ;;  %v7924_v24 = vmul.f32 %v8820_v3, %v8816_v44 }
0x346f   :  { %v7903_v56 = vmul.f32 %v8822_v28, %v8818_v14 }
0x3470   :  { %7926 = vrot.lane.b32.xlu0 %v7924_v24, %s8910_s15 }
0x3471   :  { %7905 = vrot.lane.b32.xlu1 %v7903_v56, %s8911_s23 }
0x34e2   :  { %v7927_v4 = vpop.permute.xlu0 %7926 }
0x34e3   :  { %7929 = vst.msk [vmem:[#allocation7] sm:$0xf] %vm7898_vm11, %v7927_v4  ;;  %v7906_v2 = vpop.permute.xlu1 %7905 }
0x34e4   :  { %7908 = vst.msk [vmem:[#allocation5] sm:$0xf] %vm7898_vm11, %v7906_v2 }
0x34e5   :  { %8859 = shalt.err (!%p8856_p4)
}
0x34e6   :  { %s8860_s25 = scalar_lea.hbm %s10898_s18, 64 }
0x34e7   :  { %p8861_p5 = scmp.ne.s32.totalorder %s10898_s18, %s8860_s25  ;;  %p8864_p6 = scmp.lt.u32.totalorder %s8860_s25, %s10898_s18 }
0x34e9   :  { %p8866_p7 = pnand %p8864_p6, %p8861_p5 }
0x34eb   :  { %8869 = shalt.err (!%p8866_p7)
}
0x34ec   :  { %7951 = dma.vmem_to_hbm [thread:$0]  %s7949_s7, 64, %s10898_s18, [#allocation8]  }
0x34ed   :  { %s8870_s0 = scalar_lea.vmem %s10849_s3, 64  ;;  %p8875_p9 = scmp.lt.s32.totalorder %s10849_s3, %s10849_s3 }
0x34ee   :  { %p8871_p8 = scmp.ne.s32.totalorder %s10849_s3, %s8870_s0  ;;  %p8876_p10 = scmp.lt.s32.totalorder %s8870_s0, %s8870_s0 }
0x34f0   :  { %p8877_p11 = por %p8876_p10, %p8875_p9 }
0x34f2   :  { %p8878_p12 = pnand %p8877_p11, %p8871_p8 }
0x34f4   :  { %8881 = shalt.err (!%p8878_p12)
}
0x34f5   :  { %s8882_s9 = scalar_lea.hbm %s10897_s17, 64 }
0x34f6   :  { %p8883_p13 = scmp.ne.s32.totalorder %s10897_s17, %s8882_s9  ;;  %p8886_p0 = scmp.lt.u32.totalorder %s8882_s9, %s10897_s17 }
0x34f8   :  { %p8888_p1 = pnand %p8886_p0, %p8883_p13 }
0x34fa   :  { %8891 = shalt.err (!%p8888_p1)
}
0x34fb   :  { %7941 = dma.vmem_to_hbm [thread:$0]  %s10849_s3, 64, %s10897_s17, [#allocation6]  }
0x34fc   :  { %8892 = dma.done.wait [#allocation6], 64  }
0x34fd   :  { %8893 = vsyncadd [#allocation6], 4294967232 }
0x34fe   :  { %8894 = dma.done.wait [#allocation8], 64  }
0x34ff   :  { %8895 = vsyncadd [#allocation8], 4294967232 }
0x3500   :  { %7960 = vsyncpa [#allocation6], 1 }
0x3501   :  { %7961 = vsyncpa [#allocation8], 1 }

</bundles_post_ra>
